<compile_context>
chip_gen: v6e
topology: v6e:2x2x1
jax: 0.10.0
libtpu: 0.0.40
codegen_flags: <defaults>
</compile_context>

<pallas_src>
import jax
import jax.numpy as jnp
import numpy as np
from jax.experimental import pallas as pl
from jax.experimental.pallas import tpu as pltpu

FILTERS = [32, 32, 32, 32]
KERNEL_SIZES = [2, 3, 4, 5]
K_MAX = max(KERNEL_SIZES)
NEG = -1e30  # finite "minus infinity" for masked conv positions


# ---------------------------------------------------------------------------
# Fused Pallas kernel: conv(all 4 branches) + max-pool + view/cat scramble + highway
# ---------------------------------------------------------------------------
def _fused_kernel(xcol_ref, wflat_ref, mb_ref, lsel_ref, whc_ref, bhw_ref, o_ref, r_ref):
    # xcol_ref: (1, K_MAX*E, W*C)   im2col input, lane index = j*W + w (j = conv position)
    # wflat_ref: (D, K_MAX*E)       all conv weights, zero-padded to K_MAX taps
    # mb_ref:   (D, W*C)            conv bias on valid positions, -1e30 on invalid ones
    # lsel_ref: (D//W, W, D)        0/1 row-selection matrices for the .view(b,w,-1)+cat
    # whc_ref:  (D, 2D)             [highway_h.weight^T | highway_t.weight^T]
    # bhw_ref:  (1, 2D)             [bh | bt]
    # o_ref:    (1, W, D)           lane-dense output block
    # r_ref:    (W, D)              VMEM scratch holding the highway input
    n_blk, W, D = lsel_ref.shape
    WC = xcol_ref.shape[-1]
    C = WC // W

    # All four conv branches as one dense MXU matmul:
    #   acc[f, j*W + w] = sum_{kk,e} wflat[f, kk*E+e] * xv[e, w, j+kk]
    acc = jnp.dot(wflat_ref[...], xcol_ref[0], preferred_element_type=jnp.float32)
    acc = acc + mb_ref[...]  # + bias where the conv position is valid, -1e30 otherwise

    # Max-pool over the C conv positions. Lanes are j-major, so each position j is a
    # static W-lane slice: no strided lane access, no in-kernel reshape.
    pooled = acc[:, 0:W]
    for j in range(1, C):
        pooled = jnp.maximum(pooled, acc[:, j * W:(j + 1) * W])   # (D filters, W words)

    # torch `.view(b, w, -1)` + cat scramble as constant row-selection matmuls, written
    # lane-dense into the (W, D) scratch (16 x (W,D)@(D,W) selections; exact picks).
    for t in range(n_blk):
        r_ref[:, t * W:(t + 1) * W] = jnp.dot(
            lsel_ref[t], pooled, preferred_element_type=jnp.float32)
    r = r_ref[...]                                                # (W, D)

    # Highway: single fused matmul against [Wh^T | Wt^T], then split halves.
    y = jnp.dot(r, whc_ref[...], preferred_element_type=jnp.float32) + bhw_ref[...]
    h = jnp.maximum(y[:, :D], 0.0)
    t_gate = jax.nn.sigmoid(y[:, D:])
    o_ref[0] = r + t_gate * (h - r)        # == h*t + r*(1-t)


def _build_lsel(filters, W):
    """0/1 selection matrices reproducing `pooled.view(b, w, -1)` + cat along filters."""
    D = sum(filters)
    lsel = np.zeros((D // W, W, D), np.float32)
    t, off = 0, 0
    for fg in filters:
        assert fg % W == 0, "each conv's filter count must be divisible by the word count"
        step = fg // W
        for q in range(step):
            for i in range(W):
                lsel[t, i, off + i * step + q] = 1.0
            t += 1
        off += fg
    return lsel


# ---------------------------------------------------------------------------
# Forward pass.  Matches CharacterEmbedding.forward(x, train=False).
# TODO(synk): training-time dropout (train=True) is not implemented; this is the eval path.
# ---------------------------------------------------------------------------
def character_embedding_forward(x_idx, params):
    emb = params["embedding"]                      # (E, E)
    B, W, C = x_idx.shape
    E = emb.shape[1]
    D = sum(FILTERS)

    # ---- tiny XLA prologue: embedding gather, torch-style .view, im2col ----------------
    xe = jnp.take(emb, x_idx, axis=0)              # (B, W, C, E)
    xv = xe.reshape(B, E, W, C)                    # torch x.view(b, e, w, c) reinterpretation
    taps = []
    for kk in range(K_MAX):
        sh = xv[:, :, :, kk:]                                      # (B, E, W, C-kk)
        taps.append(jnp.pad(sh, ((0, 0), (0, 0), (0, 0), (0, kk))))
    xcol = jnp.stack(taps, axis=1)                                 # (B, K_MAX, E, W, C)
    xcol = xcol.transpose(0, 1, 2, 4, 3).reshape(B, K_MAX * E, C * W)   # lane = j*W + w

    # ---- parameter packing (glue; precomputed once in a real deployment) ---------------
    wrows = []
    for i, k in enumerate(KERNEL_SIZES):
        wg = jnp.transpose(params["conv_w"][i], (0, 2, 1))         # (F_g, k, E)
        wg = jnp.pad(wg, ((0, 0), (0, K_MAX - k), (0, 0)))         # (F_g, K_MAX, E)
        wrows.append(wg.reshape(FILTERS[i], K_MAX * E))
    wflat = jnp.concatenate(wrows, axis=0)                         # (D, K_MAX*E)

    lane_j = jnp.arange(W * C, dtype=jnp.int32) // W               # conv position per lane
    cout_f = jnp.concatenate([jnp.full((f,), C - k + 1, jnp.int32)
                              for f, k in zip(FILTERS, KERNEL_SIZES)])
    bias_f = jnp.concatenate(params["conv_b"])                     # (D,)
    mb = jnp.where(lane_j[None, :] < cout_f[:, None], bias_f[:, None],
                   jnp.float32(NEG))                               # (D, W*C)

    lsel = jnp.asarray(_build_lsel(FILTERS, W))                    # (D//W, W, D)
    whc = jnp.concatenate([params["wh"].T, params["wt"].T], axis=1)     # (D, 2D)
    bhw = jnp.concatenate([params["bh"], params["bt"]]).reshape(1, 2 * D)

    return pl.pallas_call(
        _fused_kernel,
        out_shape=jax.ShapeDtypeStruct((B, W, D), jnp.float32),
        grid=(B,),
        in_specs=[
            pl.BlockSpec((1, K_MAX * E, W * C), lambda b: (b, 0, 0)),
            pl.BlockSpec((D, K_MAX * E), lambda b: (0, 0)),
            pl.BlockSpec((D, W * C), lambda b: (0, 0)),
            pl.BlockSpec((D // W, W, D), lambda b: (0, 0, 0)),
            pl.BlockSpec((D, 2 * D), lambda b: (0, 0)),
            pl.BlockSpec((1, 2 * D), lambda b: (0, 0)),
        ],
        out_specs=pl.BlockSpec((1, W, D), lambda b: (b, 0, 0)),
        scratch_shapes=[pltpu.VMEM((W, D), jnp.float32)],
        compiler_params=pltpu.CompilerParams(dimension_semantics=("parallel",)),
    )(xcol, wflat, mb, lsel, whc, bhw)


# ---------------------------------------------------------------------------
# Pure-JAX reference (mirrors the PyTorch module exactly)
# ---------------------------------------------------------------------------
def reference_forward(x_idx, params):
    emb = params["embedding"]
    B, W, C = x_idx.shape
    xe = emb[x_idx]
    xv = xe.reshape(B, emb.shape[1], W, C)
    outs = []
    for i, k in enumerate(KERNEL_SIZES):
        w, b = params["conv_w"][i], params["conv_b"][i]
        cout = C - k + 1
        s = jnp.zeros((B, w.shape[0], W, cout), jnp.float32)
        for kk in range(k):
            s = s + jnp.einsum("bewc,fe->bfwc", xv[:, :, :, kk:kk + cout], w[:, :, kk],
                               precision=jax.lax.Precision.HIGHEST)
        s = s + b[None, :, None, None]
        outs.append(jnp.max(s, axis=-1).reshape(B, W, -1))
    r = jnp.concatenate(outs, axis=-1)
    h = jax.nn.relu(jnp.dot(r, params["wh"].T, precision=jax.lax.Precision.HIGHEST)
                    + params["bh"])
    t = jax.nn.sigmoid(jnp.dot(r, params["wt"].T, precision=jax.lax.Precision.HIGHEST)
                       + params["bt"])
    return h * t + r * (1.0 - t)


# ---------------------------------------------------------------------------
# Deterministic parameter init (shapes implied by the module __init__)
# ---------------------------------------------------------------------------
def init_params(key, E):
    D = sum(FILTERS)
    keys = jax.random.split(key, 13)
    emb = jax.random.normal(keys[0], (E, E), jnp.float32) * 0.5       # weight_matrix (E, E)
    conv_w, conv_b = [], []
    for i, (f, k) in enumerate(zip(FILTERS, KERNEL_SIZES)):
        # torch Conv1d weight is (f, E, 1, k); height-1 dim squeezed here -> (f, E, k)
        conv_w.append(jax.random.normal(keys[1 + i], (f, E, k), jnp.float32) * 0.1)
        conv_b.append(jax.random.normal(keys[5 + i], (f,), jnp.float32) * 0.1)
    wh = jax.random.normal(keys[9], (D, D), jnp.float32) * 0.05
    bh = jax.random.normal(keys[10], (D,), jnp.float32) * 0.05
    wt = jax.random.normal(keys[11], (D, D), jnp.float32) * 0.05
    bt = jax.random.normal(keys[12], (D,), jnp.float32) * 0.05
    return {"embedding": emb, "conv_w": conv_w, "conv_b": conv_b,
            "wh": wh, "bh": bh, "wt": wt, "bt": bt}


if __name__ == "__main__":
    key = jax.random.PRNGKey(0)
    k_idx, k_params = jax.random.split(key)
    B, W, C, E = 2, 8, 16, 16                      # batch, words, chars/word, char-vocab/embed dim
    params = init_params(k_params, E)
    x_idx = jax.random.randint(k_idx, (B, W, C), 0, E, dtype=jnp.int32)

    out = jax.jit(character_embedding_forward)(x_idx, params)
    out = jax.block_until_ready(out)

    ref = reference_forward(x_idx, params)
    assert out.shape == (B, W, sum(FILTERS)), out.shape
    np.testing.assert_allclose(np.asarray(out), np.asarray(ref), rtol=5e-3, atol=5e-3)
    print("KERNEL_OK")
</pallas_src>

<mosaic_0001>
module attributes {stable_mosaic.version = 11 : i64} {
  func.func @_fused_kernel(%arg0: i32, %arg1: memref<1x80x128xf32, #tpu.memory_space<vmem>>, %arg2: memref<128x80xf32, #tpu.memory_space<vmem>>, %arg3: memref<128x128xf32, #tpu.memory_space<vmem>>, %arg4: memref<16x8x128xf32, #tpu.memory_space<vmem>>, %arg5: memref<128x256xf32, #tpu.memory_space<vmem>>, %arg6: memref<1x256xf32, #tpu.memory_space<vmem>>, %arg7: memref<1x8x128xf32, #tpu.memory_space<vmem>>, %arg8: memref<8x128xf32, #tpu.memory_space<vmem>>) attributes {dimension_semantics = [#tpu.dimension_semantics<parallel>], iteration_bounds = array<i64: 2>, scalar_prefetch = 0 : i64, scratch_operands = 1 : i64, tpu.core_type = #tpu.core_type<tc>, window_params = [{transform_indices = @transform_0, window_bounds = array<i64: 1, 80, 128>}, {pipeline_mode = #tpu.pipeline_mode<synchronous>, transform_indices = @transform_1, window_bounds = array<i64: 128, 80>}, {pipeline_mode = #tpu.pipeline_mode<synchronous>, transform_indices = @transform_2, window_bounds = array<i64: 128, 128>}, {pipeline_mode = #tpu.pipeline_mode<synchronous>, transform_indices = @transform_3, window_bounds = array<i64: 16, 8, 128>}, {pipeline_mode = #tpu.pipeline_mode<synchronous>, transform_indices = @transform_4, window_bounds = array<i64: 128, 256>}, {pipeline_mode = #tpu.pipeline_mode<synchronous>, transform_indices = @transform_5, window_bounds = array<i64: 1, 256>}, {transform_indices = @transform_6, window_bounds = array<i64: 1, 8, 128>}]} {
    %c0 = arith.constant 0 : index
    %c0_0 = arith.constant 0 : index
    %0 = vector.load %arg2[%c0, %c0_0] : memref<128x80xf32, #tpu.memory_space<vmem>>, vector<128x80xf32>
    %c0_1 = arith.constant 0 : index
    %c0_2 = arith.constant 0 : index
    %c0_3 = arith.constant 0 : index
    %1 = vector.load %arg1[%c0_1, %c0_2, %c0_3] : memref<1x80x128xf32, #tpu.memory_space<vmem>>, vector<1x80x128xf32>
    %2 = vector.shape_cast %1 : vector<1x80x128xf32> to vector<80x128xf32>
    %cst = arith.constant dense<0.000000e+00> : vector<128x128xf32>
    %3 = tpu.matmul %0, %2, %cst {dimension_numbers = #tpu.dot_dimension_numbers<[1], [0], [0], [1], [0, 0, 1, 1], [], []>} : vector<128x80xf32>, vector<80x128xf32>, vector<128x128xf32> -> vector<128x128xf32>
    %c0_4 = arith.constant 0 : index
    %c0_5 = arith.constant 0 : index
    %4 = vector.load %arg3[%c0_4, %c0_5] : memref<128x128xf32, #tpu.memory_space<vmem>>, vector<128x128xf32>
    %5 = arith.addf %3, %4 : vector<128x128xf32>
    %6 = vector.extract_strided_slice %5 {offsets = [0, 0], sizes = [128, 8], strides = [1, 1]} : vector<128x128xf32> to vector<128x8xf32>
    %7 = vector.extract_strided_slice %5 {offsets = [0, 8], sizes = [128, 8], strides = [1, 1]} : vector<128x128xf32> to vector<128x8xf32>
    %8 = arith.maximumf %6, %7 : vector<128x8xf32>
    %9 = vector.extract_strided_slice %5 {offsets = [0, 16], sizes = [128, 8], strides = [1, 1]} : vector<128x128xf32> to vector<128x8xf32>
    %10 = arith.maximumf %8, %9 : vector<128x8xf32>
    %11 = vector.extract_strided_slice %5 {offsets = [0, 24], sizes = [128, 8], strides = [1, 1]} : vector<128x128xf32> to vector<128x8xf32>
    %12 = arith.maximumf %10, %11 : vector<128x8xf32>
    %13 = vector.extract_strided_slice %5 {offsets = [0, 32], sizes = [128, 8], strides = [1, 1]} : vector<128x128xf32> to vector<128x8xf32>
    %14 = arith.maximumf %12, %13 : vector<128x8xf32>
    %15 = vector.extract_strided_slice %5 {offsets = [0, 40], sizes = [128, 8], strides = [1, 1]} : vector<128x128xf32> to vector<128x8xf32>
    %16 = arith.maximumf %14, %15 : vector<128x8xf32>
    %17 = vector.extract_strided_slice %5 {offsets = [0, 48], sizes = [128, 8], strides = [1, 1]} : vector<128x128xf32> to vector<128x8xf32>
    %18 = arith.maximumf %16, %17 : vector<128x8xf32>
    %19 = vector.extract_strided_slice %5 {offsets = [0, 56], sizes = [128, 8], strides = [1, 1]} : vector<128x128xf32> to vector<128x8xf32>
    %20 = arith.maximumf %18, %19 : vector<128x8xf32>
    %21 = vector.extract_strided_slice %5 {offsets = [0, 64], sizes = [128, 8], strides = [1, 1]} : vector<128x128xf32> to vector<128x8xf32>
    %22 = arith.maximumf %20, %21 : vector<128x8xf32>
    %23 = vector.extract_strided_slice %5 {offsets = [0, 72], sizes = [128, 8], strides = [1, 1]} : vector<128x128xf32> to vector<128x8xf32>
    %24 = arith.maximumf %22, %23 : vector<128x8xf32>
    %25 = vector.extract_strided_slice %5 {offsets = [0, 80], sizes = [128, 8], strides = [1, 1]} : vector<128x128xf32> to vector<128x8xf32>
    %26 = arith.maximumf %24, %25 : vector<128x8xf32>
    %27 = vector.extract_strided_slice %5 {offsets = [0, 88], sizes = [128, 8], strides = [1, 1]} : vector<128x128xf32> to vector<128x8xf32>
    %28 = arith.maximumf %26, %27 : vector<128x8xf32>
    %29 = vector.extract_strided_slice %5 {offsets = [0, 96], sizes = [128, 8], strides = [1, 1]} : vector<128x128xf32> to vector<128x8xf32>
    %30 = arith.maximumf %28, %29 : vector<128x8xf32>
    %31 = vector.extract_strided_slice %5 {offsets = [0, 104], sizes = [128, 8], strides = [1, 1]} : vector<128x128xf32> to vector<128x8xf32>
    %32 = arith.maximumf %30, %31 : vector<128x8xf32>
    %33 = vector.extract_strided_slice %5 {offsets = [0, 112], sizes = [128, 8], strides = [1, 1]} : vector<128x128xf32> to vector<128x8xf32>
    %34 = arith.maximumf %32, %33 : vector<128x8xf32>
    %35 = vector.extract_strided_slice %5 {offsets = [0, 120], sizes = [128, 8], strides = [1, 1]} : vector<128x128xf32> to vector<128x8xf32>
    %36 = arith.maximumf %34, %35 : vector<128x8xf32>
    %c0_6 = arith.constant 0 : index
    %c0_7 = arith.constant 0 : index
    %c0_8 = arith.constant 0 : index
    %37 = vector.load %arg4[%c0_6, %c0_7, %c0_8] : memref<16x8x128xf32, #tpu.memory_space<vmem>>, vector<1x8x128xf32>
    %38 = vector.shape_cast %37 : vector<1x8x128xf32> to vector<8x128xf32>
    %cst_9 = arith.constant dense<0.000000e+00> : vector<8x8xf32>
    %39 = tpu.matmul %38, %36, %cst_9 {dimension_numbers = #tpu.dot_dimension_numbers<[1], [0], [0], [1], [0, 0, 1, 1], [], []>} : vector<8x128xf32>, vector<128x8xf32>, vector<8x8xf32> -> vector<8x8xf32>
    %c0_10 = arith.constant 0 : index
    %c0_11 = arith.constant 0 : index
    %40 = vector.load %arg8[%c0_10, %c0_11] : memref<8x128xf32, #tpu.memory_space<vmem>>, vector<8x8xf32>
    tpu.vector_store %arg8[%c0_10, %c0_11], %39 {strides = array<i32>} : memref<8x128xf32, #tpu.memory_space<vmem>>, vector<8x8xf32>,
    %c1 = arith.constant 1 : index
    %c0_12 = arith.constant 0 : index
    %c0_13 = arith.constant 0 : index
    %41 = vector.load %arg4[%c1, %c0_12, %c0_13] : memref<16x8x128xf32, #tpu.memory_space<vmem>>, vector<1x8x128xf32>
    %42 = vector.shape_cast %41 : vector<1x8x128xf32> to vector<8x128xf32>
    %cst_14 = arith.constant dense<0.000000e+00> : vector<8x8xf32>
    %43 = tpu.matmul %42, %36, %cst_14 {dimension_numbers = #tpu.dot_dimension_numbers<[1], [0], [0], [1], [0, 0, 1, 1], [], []>} : vector<8x128xf32>, vector<128x8xf32>, vector<8x8xf32> -> vector<8x8xf32>
    %c0_15 = arith.constant 0 : index
    %c8 = arith.constant 8 : index
    %44 = vector.load %arg8[%c0_15, %c8] : memref<8x128xf32, #tpu.memory_space<vmem>>, vector<8x8xf32>
    tpu.vector_store %arg8[%c0_15, %c8], %43 {strides = array<i32>} : memref<8x128xf32, #tpu.memory_space<vmem>>, vector<8x8xf32>,
    %c2 = arith.constant 2 : index
    %c0_16 = arith.constant 0 : index
    %c0_17 = arith.constant 0 : index
    %45 = vector.load %arg4[%c2, %c0_16, %c0_17] : memref<16x8x128xf32, #tpu.memory_space<vmem>>, vector<1x8x128xf32>
    %46 = vector.shape_cast %45 : vector<1x8x128xf32> to vector<8x128xf32>
    %cst_18 = arith.constant dense<0.000000e+00> : vector<8x8xf32>
    %47 = tpu.matmul %46, %36, %cst_18 {dimension_numbers = #tpu.dot_dimension_numbers<[1], [0], [0], [1], [0, 0, 1, 1], [], []>} : vector<8x128xf32>, vector<128x8xf32>, vector<8x8xf32> -> vector<8x8xf32>
    %c0_19 = arith.constant 0 : index
    %c16 = arith.constant 16 : index
    %48 = vector.load %arg8[%c0_19, %c16] : memref<8x128xf32, #tpu.memory_space<vmem>>, vector<8x8xf32>
    tpu.vector_store %arg8[%c0_19, %c16], %47 {strides = array<i32>} : memref<8x128xf32, #tpu.memory_space<vmem>>, vector<8x8xf32>,
    %c3 = arith.constant 3 : index
    %c0_20 = arith.constant 0 : index
    %c0_21 = arith.constant 0 : index
    %49 = vector.load %arg4[%c3, %c0_20, %c0_21] : memref<16x8x128xf32, #tpu.memory_space<vmem>>, vector<1x8x128xf32>
    %50 = vector.shape_cast %49 : vector<1x8x128xf32> to vector<8x128xf32>
    %cst_22 = arith.constant dense<0.000000e+00> : vector<8x8xf32>
    %51 = tpu.matmul %50, %36, %cst_22 {dimension_numbers = #tpu.dot_dimension_numbers<[1], [0], [0], [1], [0, 0, 1, 1], [], []>} : vector<8x128xf32>, vector<128x8xf32>, vector<8x8xf32> -> vector<8x8xf32>
    %c0_23 = arith.constant 0 : index
    %c24 = arith.constant 24 : index
    %52 = vector.load %arg8[%c0_23, %c24] : memref<8x128xf32, #tpu.memory_space<vmem>>, vector<8x8xf32>
    tpu.vector_store %arg8[%c0_23, %c24], %51 {strides = array<i32>} : memref<8x128xf32, #tpu.memory_space<vmem>>, vector<8x8xf32>,
    %c4 = arith.constant 4 : index
    %c0_24 = arith.constant 0 : index
    %c0_25 = arith.constant 0 : index
    %53 = vector.load %arg4[%c4, %c0_24, %c0_25] : memref<16x8x128xf32, #tpu.memory_space<vmem>>, vector<1x8x128xf32>
    %54 = vector.shape_cast %53 : vector<1x8x128xf32> to vector<8x128xf32>
    %cst_26 = arith.constant dense<0.000000e+00> : vector<8x8xf32>
    %55 = tpu.matmul %54, %36, %cst_26 {dimension_numbers = #tpu.dot_dimension_numbers<[1], [0], [0], [1], [0, 0, 1, 1], [], []>} : vector<8x128xf32>, vector<128x8xf32>, vector<8x8xf32> -> vector<8x8xf32>
    %c0_27 = arith.constant 0 : index
    %c32 = arith.constant 32 : index
    %56 = vector.load %arg8[%c0_27, %c32] : memref<8x128xf32, #tpu.memory_space<vmem>>, vector<8x8xf32>
    tpu.vector_store %arg8[%c0_27, %c32], %55 {strides = array<i32>} : memref<8x128xf32, #tpu.memory_space<vmem>>, vector<8x8xf32>,
    %c5 = arith.constant 5 : index
    %c0_28 = arith.constant 0 : index
    %c0_29 = arith.constant 0 : index
    %57 = vector.load %arg4[%c5, %c0_28, %c0_29] : memref<16x8x128xf32, #tpu.memory_space<vmem>>, vector<1x8x128xf32>
    %58 = vector.shape_cast %57 : vector<1x8x128xf32> to vector<8x128xf32>
    %cst_30 = arith.constant dense<0.000000e+00> : vector<8x8xf32>
    %59 = tpu.matmul %58, %36, %cst_30 {dimension_numbers = #tpu.dot_dimension_numbers<[1], [0], [0], [1], [0, 0, 1, 1], [], []>} : vector<8x128xf32>, vector<128x8xf32>, vector<8x8xf32> -> vector<8x8xf32>
    %c0_31 = arith.constant 0 : index
    %c40 = arith.constant 40 : index
    %60 = vector.load %arg8[%c0_31, %c40] : memref<8x128xf32, #tpu.memory_space<vmem>>, vector<8x8xf32>
    tpu.vector_store %arg8[%c0_31, %c40], %59 {strides = array<i32>} : memref<8x128xf32, #tpu.memory_space<vmem>>, vector<8x8xf32>,
    %c6 = arith.constant 6 : index
    %c0_32 = arith.constant 0 : index
    %c0_33 = arith.constant 0 : index
    %61 = vector.load %arg4[%c6, %c0_32, %c0_33] : memref<16x8x128xf32, #tpu.memory_space<vmem>>, vector<1x8x128xf32>
    %62 = vector.shape_cast %61 : vector<1x8x128xf32> to vector<8x128xf32>
    %cst_34 = arith.constant dense<0.000000e+00> : vector<8x8xf32>
    %63 = tpu.matmul %62, %36, %cst_34 {dimension_numbers = #tpu.dot_dimension_numbers<[1], [0], [0], [1], [0, 0, 1, 1], [], []>} : vector<8x128xf32>, vector<128x8xf32>, vector<8x8xf32> -> vector<8x8xf32>
    %c0_35 = arith.constant 0 : index
    %c48 = arith.constant 48 : index
    %64 = vector.load %arg8[%c0_35, %c48] : memref<8x128xf32, #tpu.memory_space<vmem>>, vector<8x8xf32>
    tpu.vector_store %arg8[%c0_35, %c48], %63 {strides = array<i32>} : memref<8x128xf32, #tpu.memory_space<vmem>>, vector<8x8xf32>,
    %c7 = arith.constant 7 : index
    %c0_36 = arith.constant 0 : index
    %c0_37 = arith.constant 0 : index
    %65 = vector.load %arg4[%c7, %c0_36, %c0_37] : memref<16x8x128xf32, #tpu.memory_space<vmem>>, vector<1x8x128xf32>
    %66 = vector.shape_cast %65 : vector<1x8x128xf32> to vector<8x128xf32>
    %cst_38 = arith.constant dense<0.000000e+00> : vector<8x8xf32>
    %67 = tpu.matmul %66, %36, %cst_38 {dimension_numbers = #tpu.dot_dimension_numbers<[1], [0], [0], [1], [0, 0, 1, 1], [], []>} : vector<8x128xf32>, vector<128x8xf32>, vector<8x8xf32> -> vector<8x8xf32>
    %c0_39 = arith.constant 0 : index
    %c56 = arith.constant 56 : index
    %68 = vector.load %arg8[%c0_39, %c56] : memref<8x128xf32, #tpu.memory_space<vmem>>, vector<8x8xf32>
    tpu.vector_store %arg8[%c0_39, %c56], %67 {strides = array<i32>} : memref<8x128xf32, #tpu.memory_space<vmem>>, vector<8x8xf32>,
    %c8_40 = arith.constant 8 : index
    %c0_41 = arith.constant 0 : index
    %c0_42 = arith.constant 0 : index
    %69 = vector.load %arg4[%c8_40, %c0_41, %c0_42] : memref<16x8x128xf32, #tpu.memory_space<vmem>>, vector<1x8x128xf32>
    %70 = vector.shape_cast %69 : vector<1x8x128xf32> to vector<8x128xf32>
    %cst_43 = arith.constant dense<0.000000e+00> : vector<8x8xf32>
    %71 = tpu.matmul %70, %36, %cst_43 {dimension_numbers = #tpu.dot_dimension_numbers<[1], [0], [0], [1], [0, 0, 1, 1], [], []>} : vector<8x128xf32>, vector<128x8xf32>, vector<8x8xf32> -> vector<8x8xf32>
    %c0_44 = arith.constant 0 : index
    %c64 = arith.constant 64 : index
    %72 = vector.load %arg8[%c0_44, %c64] : memref<8x128xf32, #tpu.memory_space<vmem>>, vector<8x8xf32>
    tpu.vector_store %arg8[%c0_44, %c64], %71 {strides = array<i32>} : memref<8x128xf32, #tpu.memory_space<vmem>>, vector<8x8xf32>,
    %c9 = arith.constant 9 : index
    %c0_45 = arith.constant 0 : index
    %c0_46 = arith.constant 0 : index
    %73 = vector.load %arg4[%c9, %c0_45, %c0_46] : memref<16x8x128xf32, #tpu.memory_space<vmem>>, vector<1x8x128xf32>
    %74 = vector.shape_cast %73 : vector<1x8x128xf32> to vector<8x128xf32>
    %cst_47 = arith.constant dense<0.000000e+00> : vector<8x8xf32>
    %75 = tpu.matmul %74, %36, %cst_47 {dimension_numbers = #tpu.dot_dimension_numbers<[1], [0], [0], [1], [0, 0, 1, 1], [], []>} : vector<8x128xf32>, vector<128x8xf32>, vector<8x8xf32> -> vector<8x8xf32>
    %c0_48 = arith.constant 0 : index
    %c72 = arith.constant 72 : index
    %76 = vector.load %arg8[%c0_48, %c72] : memref<8x128xf32, #tpu.memory_space<vmem>>, vector<8x8xf32>
    tpu.vector_store %arg8[%c0_48, %c72], %75 {strides = array<i32>} : memref<8x128xf32, #tpu.memory_space<vmem>>, vector<8x8xf32>,
    %c10 = arith.constant 10 : index
    %c0_49 = arith.constant 0 : index
    %c0_50 = arith.constant 0 : index
    %77 = vector.load %arg4[%c10, %c0_49, %c0_50] : memref<16x8x128xf32, #tpu.memory_space<vmem>>, vector<1x8x128xf32>
    %78 = vector.shape_cast %77 : vector<1x8x128xf32> to vector<8x128xf32>
    %cst_51 = arith.constant dense<0.000000e+00> : vector<8x8xf32>
    %79 = tpu.matmul %78, %36, %cst_51 {dimension_numbers = #tpu.dot_dimension_numbers<[1], [0], [0], [1], [0, 0, 1, 1], [], []>} : vector<8x128xf32>, vector<128x8xf32>, vector<8x8xf32> -> vector<8x8xf32>
    %c0_52 = arith.constant 0 : index
    %c80 = arith.constant 80 : index
    %80 = vector.load %arg8[%c0_52, %c80] : memref<8x128xf32, #tpu.memory_space<vmem>>, vector<8x8xf32>
    tpu.vector_store %arg8[%c0_52, %c80], %79 {strides = array<i32>} : memref<8x128xf32, #tpu.memory_space<vmem>>, vector<8x8xf32>,
    %c11 = arith.constant 11 : index
    %c0_53 = arith.constant 0 : index
    %c0_54 = arith.constant 0 : index
    %81 = vector.load %arg4[%c11, %c0_53, %c0_54] : memref<16x8x128xf32, #tpu.memory_space<vmem>>, vector<1x8x128xf32>
    %82 = vector.shape_cast %81 : vector<1x8x128xf32> to vector<8x128xf32>
    %cst_55 = arith.constant dense<0.000000e+00> : vector<8x8xf32>
    %83 = tpu.matmul %82, %36, %cst_55 {dimension_numbers = #tpu.dot_dimension_numbers<[1], [0], [0], [1], [0, 0, 1, 1], [], []>} : vector<8x128xf32>, vector<128x8xf32>, vector<8x8xf32> -> vector<8x8xf32>
    %c0_56 = arith.constant 0 : index
    %c88 = arith.constant 88 : index
    %84 = vector.load %arg8[%c0_56, %c88] : memref<8x128xf32, #tpu.memory_space<vmem>>, vector<8x8xf32>
    tpu.vector_store %arg8[%c0_56, %c88], %83 {strides = array<i32>} : memref<8x128xf32, #tpu.memory_space<vmem>>, vector<8x8xf32>,
    %c12 = arith.constant 12 : index
    %c0_57 = arith.constant 0 : index
    %c0_58 = arith.constant 0 : index
    %85 = vector.load %arg4[%c12, %c0_57, %c0_58] : memref<16x8x128xf32, #tpu.memory_space<vmem>>, vector<1x8x128xf32>
    %86 = vector.shape_cast %85 : vector<1x8x128xf32> to vector<8x128xf32>
    %cst_59 = arith.constant dense<0.000000e+00> : vector<8x8xf32>
    %87 = tpu.matmul %86, %36, %cst_59 {dimension_numbers = #tpu.dot_dimension_numbers<[1], [0], [0], [1], [0, 0, 1, 1], [], []>} : vector<8x128xf32>, vector<128x8xf32>, vector<8x8xf32> -> vector<8x8xf32>
    %c0_60 = arith.constant 0 : index
    %c96 = arith.constant 96 : index
    %88 = vector.load %arg8[%c0_60, %c96] : memref<8x128xf32, #tpu.memory_space<vmem>>, vector<8x8xf32>
    tpu.vector_store %arg8[%c0_60, %c96], %87 {strides = array<i32>} : memref<8x128xf32, #tpu.memory_space<vmem>>, vector<8x8xf32>,
    %c13 = arith.constant 13 : index
    %c0_61 = arith.constant 0 : index
    %c0_62 = arith.constant 0 : index
    %89 = vector.load %arg4[%c13, %c0_61, %c0_62] : memref<16x8x128xf32, #tpu.memory_space<vmem>>, vector<1x8x128xf32>
    %90 = vector.shape_cast %89 : vector<1x8x128xf32> to vector<8x128xf32>
    %cst_63 = arith.constant dense<0.000000e+00> : vector<8x8xf32>
    %91 = tpu.matmul %90, %36, %cst_63 {dimension_numbers = #tpu.dot_dimension_numbers<[1], [0], [0], [1], [0, 0, 1, 1], [], []>} : vector<8x128xf32>, vector<128x8xf32>, vector<8x8xf32> -> vector<8x8xf32>
    %c0_64 = arith.constant 0 : index
    %c104 = arith.constant 104 : index
    %92 = vector.load %arg8[%c0_64, %c104] : memref<8x128xf32, #tpu.memory_space<vmem>>, vector<8x8xf32>
    tpu.vector_store %arg8[%c0_64, %c104], %91 {strides = array<i32>} : memref<8x128xf32, #tpu.memory_space<vmem>>, vector<8x8xf32>,
    %c14 = arith.constant 14 : index
    %c0_65 = arith.constant 0 : index
    %c0_66 = arith.constant 0 : index
    %93 = vector.load %arg4[%c14, %c0_65, %c0_66] : memref<16x8x128xf32, #tpu.memory_space<vmem>>, vector<1x8x128xf32>
    %94 = vector.shape_cast %93 : vector<1x8x128xf32> to vector<8x128xf32>
    %cst_67 = arith.constant dense<0.000000e+00> : vector<8x8xf32>
    %95 = tpu.matmul %94, %36, %cst_67 {dimension_numbers = #tpu.dot_dimension_numbers<[1], [0], [0], [1], [0, 0, 1, 1], [], []>} : vector<8x128xf32>, vector<128x8xf32>, vector<8x8xf32> -> vector<8x8xf32>
    %c0_68 = arith.constant 0 : index
    %c112 = arith.constant 112 : index
    %96 = vector.load %arg8[%c0_68, %c112] : memref<8x128xf32, #tpu.memory_space<vmem>>, vector<8x8xf32>
    tpu.vector_store %arg8[%c0_68, %c112], %95 {strides = array<i32>} : memref<8x128xf32, #tpu.memory_space<vmem>>, vector<8x8xf32>,
    %c15 = arith.constant 15 : index
    %c0_69 = arith.constant 0 : index
    %c0_70 = arith.constant 0 : index
    %97 = vector.load %arg4[%c15, %c0_69, %c0_70] : memref<16x8x128xf32, #tpu.memory_space<vmem>>, vector<1x8x128xf32>
    %98 = vector.shape_cast %97 : vector<1x8x128xf32> to vector<8x128xf32>
    %cst_71 = arith.constant dense<0.000000e+00> : vector<8x8xf32>
    %99 = tpu.matmul %98, %36, %cst_71 {dimension_numbers = #tpu.dot_dimension_numbers<[1], [0], [0], [1], [0, 0, 1, 1], [], []>} : vector<8x128xf32>, vector<128x8xf32>, vector<8x8xf32> -> vector<8x8xf32>
    %c0_72 = arith.constant 0 : index
    %c120 = arith.constant 120 : index
    %100 = vector.load %arg8[%c0_72, %c120] : memref<8x128xf32, #tpu.memory_space<vmem>>, vector<8x8xf32>
    tpu.vector_store %arg8[%c0_72, %c120], %99 {strides = array<i32>} : memref<8x128xf32, #tpu.memory_space<vmem>>, vector<8x8xf32>,
    %c0_73 = arith.constant 0 : index
    %c0_74 = arith.constant 0 : index
    %101 = vector.load %arg8[%c0_73, %c0_74] : memref<8x128xf32, #tpu.memory_space<vmem>>, vector<8x128xf32>
    %c0_75 = arith.constant 0 : index
    %c0_76 = arith.constant 0 : index
    %102 = vector.load %arg5[%c0_75, %c0_76] : memref<128x256xf32, #tpu.memory_space<vmem>>, vector<128x256xf32>
    %cst_77 = arith.constant dense<0.000000e+00> : vector<8x256xf32>
    %103 = tpu.matmul %101, %102, %cst_77 {dimension_numbers = #tpu.dot_dimension_numbers<[1], [0], [0], [1], [0, 0, 1, 1], [], []>} : vector<8x128xf32>, vector<128x256xf32>, vector<8x256xf32> -> vector<8x256xf32>
    %c0_78 = arith.constant 0 : index
    %c0_79 = arith.constant 0 : index
    %104 = vector.load %arg6[%c0_78, %c0_79] : memref<1x256xf32, #tpu.memory_space<vmem>>, vector<1x256xf32>
    %105 = vector.broadcast %104 : vector<1x256xf32> to vector<8x256xf32>
    %106 = arith.addf %103, %105 : vector<8x256xf32>
    %107 = vector.extract_strided_slice %106 {offsets = [0, 0], sizes = [8, 128], strides = [1, 1]} : vector<8x256xf32> to vector<8x128xf32>
    %cst_80 = arith.constant 0.000000e+00 : f32
    %108 = vector.broadcast %cst_80 : f32 to vector<8x128xf32>
    %109 = arith.maximumf %107, %108 : vector<8x128xf32>
    %110 = vector.extract_strided_slice %106 {offsets = [0, 128], sizes = [8, 128], strides = [1, 1]} : vector<8x256xf32> to vector<8x128xf32>
    %111 = arith.negf %110 : vector<8x128xf32>
    %112 = math.exp %111 : vector<8x128xf32>
    %cst_81 = arith.constant 1.000000e+00 : f32
    %113 = vector.broadcast %cst_81 : f32 to vector<8x128xf32>
    %114 = arith.addf %113, %112 : vector<8x128xf32>
    %115 = arith.divf %113, %114 : vector<8x128xf32>
    %116 = arith.subf %109, %101 : vector<8x128xf32>
    %117 = arith.mulf %115, %116 : vector<8x128xf32>
    %118 = arith.addf %101, %117 : vector<8x128xf32>
    %c0_82 = arith.constant 0 : index
    %c0_83 = arith.constant 0 : index
    %c0_84 = arith.constant 0 : index
    %119 = vector.load %arg7[%c0_82, %c0_83, %c0_84] : memref<1x8x128xf32, #tpu.memory_space<vmem>>, vector<1x8x128xf32>
    %120 = vector.shape_cast %119 : vector<1x8x128xf32> to vector<8x128xf32>
    %121 = vector.shape_cast %118 : vector<8x128xf32> to vector<1x8x128xf32>
    tpu.vector_store %arg7[%c0_82, %c0_83, %c0_84], %121 {strides = array<i32>} : memref<1x8x128xf32, #tpu.memory_space<vmem>>, vector<1x8x128xf32>,
    return
  }
  func.func @transform_0(%arg0: i32) -> (i32, i32, i32) {
    %c0_i32 = arith.constant 0 : i32
    %c0_i32_0 = arith.constant 0 : i32
    %c0_i32_1 = arith.constant 0 : i32
    return %arg0, %c0_i32, %c0_i32_0 : i32, i32, i32
  }
  func.func @transform_1(%arg0: i32) -> (i32, i32) {
    %c0_i32 = arith.constant 0 : i32
    %c0_i32_0 = arith.constant 0 : i32
    %c0_i32_1 = arith.constant 0 : i32
    return %c0_i32, %c0_i32_0 : i32, i32
  }
  func.func @transform_2(%arg0: i32) -> (i32, i32) {
    %c0_i32 = arith.constant 0 : i32
    %c0_i32_0 = arith.constant 0 : i32
    %c0_i32_1 = arith.constant 0 : i32
    return %c0_i32, %c0_i32_0 : i32, i32
  }
  func.func @transform_3(%arg0: i32) -> (i32, i32, i32) {
    %c0_i32 = arith.constant 0 : i32
    %c0_i32_0 = arith.constant 0 : i32
    %c0_i32_1 = arith.constant 0 : i32
    %c0_i32_2 = arith.constant 0 : i32
    return %c0_i32, %c0_i32_0, %c0_i32_1 : i32, i32, i32
  }
  func.func @transform_4(%arg0: i32) -> (i32, i32) {
    %c0_i32 = arith.constant 0 : i32
    %c0_i32_0 = arith.constant 0 : i32
    %c0_i32_1 = arith.constant 0 : i32
    return %c0_i32, %c0_i32_0 : i32, i32
  }
  func.func @transform_5(%arg0: i32) -> (i32, i32) {
    %c0_i32 = arith.constant 0 : i32
    %c0_i32_0 = arith.constant 0 : i32
    %c0_i32_1 = arith.constant 0 : i32
    return %c0_i32, %c0_i32_0 : i32, i32
  }
  func.func @transform_6(%arg0: i32) -> (i32, i32, i32) {
    %c0_i32 = arith.constant 0 : i32
    %c0_i32_0 = arith.constant 0 : i32
    %c0_i32_1 = arith.constant 0 : i32
    return %arg0, %c0_i32, %c0_i32_0 : i32, i32, i32
  }
}

</mosaic_0001>

<bundles_post_ra>
// kernel: character_embedding_forward.1
= control target key start
LH: loop header
LB: loop body
LE: loop exit
PB: predicated region body
PF: predicated region fallthrough
CT: control target
= control target key end

     0   :  { %11 = vsyncpa [#allocation4], 0  ;;  %s5989_s0 = inlined_call_operand.vmem [shape: f32[2,80,128], index: 0, kind: input, shape index: {}]   ;;  %s5990_s1 = inlined_call_operand.vmem [shape: f32[128,80], index: 1, kind: input, shape index: {}]   ;;  %s5991_s2 = inlined_call_operand.vmem [shape: f32[128,128], index: 2, kind: input, shape index: {}]   ;;  %s5992_s3 = inlined_call_operand.vmem [shape: f32[16,8,128], index: 3, kind: input, shape index: {}]   ;;  %s5993_s4 = inlined_call_operand.vmem [shape: f32[128,256], index: 4, kind: input, shape index: {}]   ;;  %s5994_s5 = inlined_call_operand.vmem [shape: f32[1,256], index: 5, kind: input, shape index: {}]   ;;  %s5995_s6 = inlined_call_operand.hbm [shape: f32[2,8,128], index: 6, kind: output, shape index: {}]  }
   0x1   :  { %13 = vsyncpa [#allocation4 + $0x1], 0  ;;  %s4025_s21 = smov 0   ;;  %s4027_s22 = smov 0  }
   0x2   :  { %s4029_s23 = smov 0   ;;  %s4031_s24 = smov 0  }
   0x3 LB: > { %s4046_s25 = sadd.s32 4294967295, %s3970_s24   ;;  %s2905_s26 = sadd.s32 4294967294, %s3970_s24   ;;  %s3970_s24 = sphi %s4031_s24, %s6165_s24   ;;  %s3966_s23 = sphi %s4029_s23, %s6164_s23   ;;  %s3962_s22 = sphi %s4027_s22, %s6163_s22   ;;  %s3958_s21 = sphi %s4025_s21, %s6162_s21  }
   0x4   : > { %s4050_s27 = sadd.s32 1, %s3970_s24   ;;  %s157_s28 = sadd.s32 1, %s3966_s23 }
   0x5   : > { %s154_s29 = ssub.s32 %s3970_s24, %s4050_s27  ;;  %p167_p0 = scmp.ne.s32.totalorder %s3966_s23, %s3962_s22 }
   0x6   : > { %p155_p1 = scmp.eq.s32.totalorder %s154_s29, 0  ;;  %p168_p2 = scmp.eq.s32.totalorder %s4046_s25, 1 }
   0x7   : > { %p173_p3 = scmp.ne.s32.totalorder %s3962_s22, %s3958_s21  ;;  %p174_p4 = scmp.eq.s32.totalorder %s2905_s26, 1 }
   0x8   : > { %s4061_s30 = scalar_select %p155_p1, %s3966_s23, %s157_s28  }
   0x9   : > { %p4063_p5 = por %p168_p2, %p167_p0  ;;  %p4067_p6 = por %p174_p4, %p173_p3 }
   0xa   : > { %p2908_p7 = scmp.ge.s32.totalorder %s3970_s24, 1  ;;  %p215_p8 = scmp.lt.s32.totalorder %s3970_s24, 3 }
   0xc   : > { %p216_p9 = pnand %p2908_p7, %p215_p8 }
   0xe   : > { %219 = sbr.rel (%p216_p9) target bundleno = 1641 (0x669), region = 44 }
  0x13   : > { %p245_p10 = scmp.lt.s32.totalorder %s4046_s25, 1  ;;  %v250_v0 = vld [vmem:[%s5990_s1] sm:$0xff]  ;;  %vm292_vm0 = vcmask 654336   ;;  %v251_v11 = vld [vmem:[%s5990_s1 + $0x8] sm:$0xff]  ;;  %v252_v12 = vld [vmem:[%s5990_s1 + $0x10] sm:$0xff]  ;;  %s6008_s28 = smov 120  }
  0x14   : > { %3265 = vmatprep.mubr.msk.f32.mxu0 %vm292_vm0, %v250_v0  ;;  %v253_v13 = vld [vmem:[%s5990_s1 + $0x18] sm:$0xff]  ;;  %v254_v14 = vld [vmem:[%s5990_s1 + $0x20] sm:$0xff]  ;;  %v255_v15 = vld [vmem:[%s5990_s1 + $0x28] sm:$0xff]  ;;  %s6009_s29 = smov 112   ;;  %s6010_s9 = smov 104   ;;  %vm3988_vm1 = vmmov 0  }
  0x15   : > { %s246_s11 = scalar_select %p245_p10, %s4046_s25, 1  ;;  %v256_v16 = vld [vmem:[%s5990_s1 + $0x30] sm:$0xff]  ;;  %v257_v17 = vld [vmem:[%s5990_s1 + $0x38] sm:$0xff]  ;;  %v258_v18 = vld [vmem:[%s5990_s1 + $0x40] sm:$0xff]  ;;  %vm1533_vm2 = vcmask 64512   ;;  %vm1611_vm3 = vcmask 130112  }
  0x16   : > { %v259_v19 = vld [vmem:[%s5990_s1 + $0x48] sm:$0xff]  ;;  %v260_v20 = vld [vmem:[%s5990_s1 + $0x50] sm:$0xff]  ;;  %v261_v21 = vld [vmem:[%s5990_s1 + $0x58] sm:$0xff]  ;;  %s3976_s17 = smov 88   ;;  %s3977_s18 = smov 80   ;;  %vm1689_vm4 = vcmask 195712  }
  0x17   : > { %s3849_s12 = smul.u32 80, %s246_s11  ;;  %v262_v22 = vld [vmem:[%s5990_s1 + $0x60] sm:$0xff]  ;;  %v263_v23 = vld [vmem:[%s5990_s1 + $0x68] sm:$0xff]  ;;  %v264_v24 = vld [vmem:[%s5990_s1 + $0x70] sm:$0xff]  ;;  %s3978_s26 = smov 72   ;;  %vm1767_vm5 = vcmask 261312  }
  0x18   : > { %v265_v25 = vld [vmem:[%s5990_s1 + $0x78] sm:$0xff]  ;;  %v277_v26 = vld [vmem:[%s5991_s2 + $0x8] sm:$0xff]  ;;  %v276_v28 = vld [vmem:[%s5991_s2] sm:$0xff]  ;;  %s3979_s13 = smov 64   ;;  %s3980_s20 = smov 56   ;;  %vm1845_vm6 = vcmask 326912  }
  0x19   : > { %s249_s15 = scalar_lea.vmem %s5989_s0, %s3849_s12  ;;  %v279_v31 = vld [vmem:[%s5991_s2 + $0x18] sm:$0xff]  ;;  %v278_v36 = vld [vmem:[%s5991_s2 + $0x10] sm:$0xff]  ;;  %s6011_s12 = smov 96   ;;  %v281_v38 = vld [vmem:[%s5991_s2 + $0x28] sm:$0xff]  ;;  %vm1923_vm7 = vcmask 392512   ;;  %vm2001_vm8 = vcmask 458112  }
  0x1a   : > { %v275_v1 = vld [vmem:[%s249_s15 + $0x48] sm:$0xff]  ;;  %v274_v2 = vld [vmem:[%s249_s15 + $0x40] sm:$0xff]  ;;  %v273_v3 = vld [vmem:[%s249_s15 + $0x38] sm:$0xff]  ;;  %s3981_s16 = smov 40   ;;  %s5996_s19 = smov 48   ;;  %vm2079_vm9 = vcmask 523712  }
  0x1b   : > { %3245 = vmatprep.subr.mxu0 %v275_v1  ;;  %v272_v4 = vld [vmem:[%s249_s15 + $0x30] sm:$0xff]  ;;  %v271_v5 = vld [vmem:[%s249_s15 + $0x28] sm:$0xff]  ;;  %v270_v6 = vld [vmem:[%s249_s15 + $0x20] sm:$0xff]  ;;  %s3983_s10 = smov 32   ;;  %s3984_s11 = smov 24   ;;  %vm2157_vm10 = vcmask 589312  }
  0x1c   : > { %3246 = vmatpush3.msra.mxu0 %v275_v1  ;;  %v269_v7 = vld [vmem:[%s249_s15 + $0x18] sm:$0xff]  ;;  %v268_v8 = vld [vmem:[%s249_s15 + $0x10] sm:$0xff]  ;;  %v267_v9 = vld [vmem:[%s249_s15 + $0x8] sm:$0xff]  ;;  %s3987_s14 = smov 8   ;;  %vm2235_vm11 = vcmask 654912   ;;  %vm2313_vm12 = vcmask 720512  }
  0x1d   : > { %3247 = vmatprep.subr.mxu0 %v274_v2  ;;  %v266_v10 = vld [vmem:[%s249_s15] sm:$0xff]  ;;  %v283_v44 = vld [vmem:[%s5991_s2 + $0x38] sm:$0xff]  ;;  %v282_v48 = vld [vmem:[%s5991_s2 + $0x30] sm:$0xff]  ;;  %s6070_s15 = smov 48   ;;  %vm2391_vm13 = vcmask 786112   ;;  %vm2469_vm14 = vcmask 851712  }
  0x1e   : > { %3248 = vmatpush3.msra.mxu0 %v274_v2  ;;  %v280_v42 = vld [vmem:[%s5991_s2 + $0x20] sm:$0xff]  ;;  %v285_v50 = vld [vmem:[%s5991_s2 + $0x48] sm:$0xff]  ;;  %v287_v56 = vld [vmem:[%s5991_s2 + $0x58] sm:$0xff]  ;;  %vm2547_vm15 = vcmask 917312  }
  0x1f   : > { %3249 = vmatprep.subr.mxu0 %v273_v3  ;;  %v284_v54 = vld [vmem:[%s5991_s2 + $0x40] sm:$0xff]  ;;  %v286_v1 = vld [vmem:[%s5991_s2 + $0x50] sm:$0xff] }
  0x20   : > { %3250 = vmatpush3.msra.mxu0 %v273_v3 }
  0x21   : > { %3251 = vmatprep.subr.mxu0 %v272_v4 }
  0x22   : > { %3252 = vmatpush3.msra.mxu0 %v272_v4 }
  0x23   : > { %3253 = vmatprep.subr.mxu0 %v271_v5 }
  0x24   : > { %3254 = vmatpush3.msra.mxu0 %v271_v5 }
  0x25   : > { %3255 = vmatprep.subr.mxu0 %v270_v6 }
  0x26   : > { %3256 = vmatpush3.msra.mxu0 %v270_v6 }
  0x27   : > { %3257 = vmatprep.subr.mxu0 %v269_v7 }
  0x28   : > { %3258 = vmatpush3.msra.mxu0 %v269_v7 }
  0x29   : > { %3259 = vmatprep.subr.mxu0 %v268_v8 }
  0x2a   : > { %3260 = vmatpush3.msra.mxu0 %v268_v8 }
  0x2b   : > { %3261 = vmatprep.subr.mxu0 %v267_v9 }
  0x2c   : > { %3262 = vmatpush3.msra.mxu0 %v267_v9 }
  0x2d   : > { %3263 = vmatprep.subr.mxu0 %v266_v10 }
  0x2e   : > { %3264 = vmatpush3.msra.mxu0 %v266_v10 }
  0x2f   : > { %3266 = vmatmul.mubr.msk.f32.vlgmr.msra.gmra.mxu0 %vm292_vm0, %v251_v11 }
  0x30   : > { %3268 = vmatprep.mubr.msk.f32.mxu0 %vm292_vm0, %v252_v12  ;;  %v289_v12 = vld [vmem:[%s5991_s2 + $0x68] sm:$0xff] }
  0x33   : > { %3269 = vmatmul.mubr.msk.f32.gmra.mxu0 %vm292_vm0, %v253_v13 }
  0x34   : > { %3271 = vmatprep.mubr.msk.f32.mxu0 %vm292_vm0, %v254_v14 }
  0x37   : > { %3272 = vmatmul.mubr.msk.f32.gmra.mxu0 %vm292_vm0, %v255_v15 }
  0x38   : > { %3274 = vmatprep.mubr.msk.f32.mxu0 %vm292_vm0, %v256_v16 }
  0x3b   : > { %3275 = vmatmul.mubr.msk.f32.gmra.mxu0 %vm292_vm0, %v257_v17 }
  0x3c   : > { %3277 = vmatprep.mubr.msk.f32.mxu0 %vm292_vm0, %v258_v18 }
  0x3f   : > { %3278 = vmatmul.mubr.msk.f32.gmra.mxu0 %vm292_vm0, %v259_v19 }
  0x40   : > { %3280 = vmatprep.mubr.msk.f32.mxu0 %vm292_vm0, %v260_v20 }
  0x43   : > { %3281 = vmatmul.mubr.msk.f32.gmra.mxu0 %vm292_vm0, %v261_v21 }
  0x44   : > { %3283 = vmatprep.mubr.msk.f32.mxu0 %vm292_vm0, %v262_v22 }
  0x47   : > { %3284 = vmatmul.mubr.msk.f32.gmra.mxu0 %vm292_vm0, %v263_v23 }
  0x48   : > { %3286 = vmatprep.mubr.msk.f32.mxu0 %vm292_vm0, %v264_v24 }
  0x4b   : > { %3287 = vmatmul.mubr.msk.f32.gmra.mxu0 %vm292_vm0, %v265_v25  ;;  %vm2625_vm0 = vcmask 982912  }
  0xef   : > { %v3267_v27 = vpop.f32.mrf.mxu0 }
  0xf0   : > { %v4148_v29 = vadd.f32 %v3267_v27, %v277_v26 }
  0xf1   : > { %v407_v30 = vpop.f32.mrf.mxu0 }
  0xf2   : > { %v4153_v32 = vadd.f32 %v407_v30, %v276_v28  ;;  %504 = vrot.lane.b32.xlu1 %v4148_v29, %s6008_s28 }
  0xf3   : > { %v3270_v33 = vpop.f32.mrf.mxu0 }
  0xf4   : > { %v4157_v34 = vadd.f32 %v3270_v33, %v279_v31  ;;  %502 = vrot.lane.b32.xlu0 %v4153_v32, %s6008_s28  ;;  %v288_v31 = vld [vmem:[%s5991_s2 + $0x60] sm:$0xff] }
  0xf5   : > { %v417_v35 = vpop.f32.mrf.mxu0 }
  0xf6   : > { %568 = vrot.lane.b32.xlu1 %v4148_v29, %s6009_s29  ;;  %v4172_v37 = vadd.f32 %v417_v35, %v278_v36 }
  0xf7   : > { %v3273_v39 = vpop.f32.mrf.mxu0 }
  0xf8   : > { %508 = vrot.lane.b32.xlu0 %v4157_v34, %s6008_s28  ;;  %v4183_v40 = vadd.f32 %v3273_v39, %v281_v38 }
  0xf9   : > { %v427_v41 = vpop.f32.mrf.mxu0 }
  0xfa   : > { %636 = vrot.lane.b32.xlu1 %v4157_v34, %s6010_s9  ;;  %v4198_v43 = vadd.f32 %v427_v41, %v280_v42 }
  0xfb   : > { %v3276_v45 = vpop.f32.mrf.mxu0 }
  0xfc   : > { %572 = vrot.lane.b32.xlu0 %v4157_v34, %s6009_s29  ;;  %v4213_v46 = vadd.f32 %v3276_v45, %v283_v44 }
  0xfd   : > { %v437_v47 = vpop.f32.mrf.mxu0 }
  0xfe   : > { %700 = vrot.lane.b32.xlu1 %v4157_v34, %s6011_s12  ;;  %v4236_v49 = vadd.f32 %v437_v47, %v282_v48 }
  0xff   : > { %v3279_v51 = vpop.f32.mrf.mxu0 }
 0x100   : > { %570 = vrot.lane.b32.xlu0 %v4172_v37, %s6009_s29  ;;  %v4255_v52 = vadd.f32 %v3279_v51, %v285_v50  ;;  %v291_v51 = vld [vmem:[%s5991_s2 + $0x78] sm:$0xff] }
 0x101   : > { %v447_v53 = vpop.f32.mrf.mxu0 }
 0x102   : > { %506 = vrot.lane.b32.xlu1 %v4172_v37, %s6008_s28  ;;  %v4278_v55 = vadd.f32 %v447_v53, %v284_v54 }
 0x103   : > { %v3282_v57 = vpop.f32.mrf.mxu0 }
 0x104   : > { %634 = vrot.lane.b32.xlu0 %v4172_v37, %s6010_s9  ;;  %v4297_v58 = vadd.f32 %v3282_v57, %v287_v56 }
 0x105   : > { %v457_v0 = vpop.f32.mrf.mxu0 }
 0x106   : > { %512 = vrot.lane.b32.xlu1 %v4183_v40, %s6008_s28  ;;  %v4338_v3 = vadd.f32 %v457_v0, %v286_v1 }
 0x107   : > { %v3285_v13 = vpop.f32.mrf.mxu0 }
 0x108   : > { %640 = vrot.lane.b32.xlu0 %v4183_v40, %s6010_s9  ;;  %v4383_v16 = vadd.f32 %v3285_v13, %v289_v12 }
 0x109   : > { %v467_v30 = vpop.f32.mrf.mxu0 }
 0x10a   : > { %576 = vrot.lane.b32.xlu1 %v4183_v40, %s6009_s29  ;;  %v4440_v35 = vadd.f32 %v467_v30, %v288_v31 }
 0x10b   : > { %v3288_v54 = vpop.f32.mrf.mxu0 }
 0x10c   : > { %704 = vrot.lane.b32.xlu0 %v4183_v40, %s6011_s12  ;;  %v4489_v56 = vadd.f32 %v3288_v54, %v291_v51 }
 0x10e   : > { %768 = vrot.lane.b32.xlu1 %v4183_v40, %s3976_s17 }
 0x110   : > { %510 = vrot.lane.b32.xlu0 %v4198_v43, %s6008_s28 }
 0x112   : > { %832 = vrot.lane.b32.xlu1 %v4183_v40, %s3977_s18 }
 0x114   : > { %702 = vrot.lane.b32.xlu0 %v4198_v43, %s6011_s12 }
 0x116   : > { %574 = vrot.lane.b32.xlu1 %v4198_v43, %s6009_s29 }
 0x118   : > { %766 = vrot.lane.b32.xlu0 %v4198_v43, %s3976_s17 }
 0x11a   : > { %638 = vrot.lane.b32.xlu1 %v4198_v43, %s6010_s9 }
 0x11c   : > { %516 = vrot.lane.b32.xlu0 %v4213_v46, %s6008_s28 }
 0x11e   : > { %644 = vrot.lane.b32.xlu1 %v4213_v46, %s6010_s9 }
 0x120   : > { %580 = vrot.lane.b32.xlu0 %v4213_v46, %s6009_s29 }
 0x122   : > { %708 = vrot.lane.b32.xlu1 %v4213_v46, %s6011_s12 }
 0x124   : > { %772 = vrot.lane.b32.xlu0 %v4213_v46, %s3976_s17 }
 0x126   : > { %900 = vrot.lane.b32.xlu1 %v4213_v46, %s3978_s26 }
 0x128   : > { %836 = vrot.lane.b32.xlu0 %v4213_v46, %s3977_s18 }
 0x12a   : > { %964 = vrot.lane.b32.xlu1 %v4213_v46, %s3979_s13 }
 0x12c   : > { %578 = vrot.lane.b32.xlu0 %v4236_v49, %s6009_s29 }
 0x12e   : > { %514 = vrot.lane.b32.xlu1 %v4236_v49, %s6008_s28 }
 0x130   : > { %642 = vrot.lane.b32.xlu0 %v4236_v49, %s6010_s9 }
 0x132   : > { %706 = vrot.lane.b32.xlu1 %v4236_v49, %s6011_s12 }
 0x134   : > { %834 = vrot.lane.b32.xlu0 %v4236_v49, %s3977_s18 }
 0x136   : > { %770 = vrot.lane.b32.xlu1 %v4236_v49, %s3976_s17 }
 0x138   : > { %898 = vrot.lane.b32.xlu0 %v4236_v49, %s3978_s26 }
 0x13a   : > { %520 = vrot.lane.b32.xlu1 %v4255_v52, %s6008_s28 }
 0x13c   : > { %648 = vrot.lane.b32.xlu0 %v4255_v52, %s6010_s9 }
 0x13e   : > { %584 = vrot.lane.b32.xlu1 %v4255_v52, %s6009_s29 }
 0x140   : > { %712 = vrot.lane.b32.xlu0 %v4255_v52, %s6011_s12 }
 0x142   : > { %776 = vrot.lane.b32.xlu1 %v4255_v52, %s3976_s17 }
 0x144   : > { %904 = vrot.lane.b32.xlu0 %v4255_v52, %s3978_s26 }
 0x146   : > { %840 = vrot.lane.b32.xlu1 %v4255_v52, %s3977_s18 }
 0x148   : > { %968 = vrot.lane.b32.xlu0 %v4255_v52, %s3979_s13 }
 0x14a   : > { %1032 = vrot.lane.b32.xlu1 %v4255_v52, %s3980_s20 }
 0x14c   : > { %518 = vrot.lane.b32.xlu0 %v4278_v55, %s6008_s28 }
 0x14e   : > { %582 = vrot.lane.b32.xlu1 %v4278_v55, %s6009_s29 }
 0x150   : > { %710 = vrot.lane.b32.xlu0 %v4278_v55, %s6011_s12 }
 0x152   : > { %646 = vrot.lane.b32.xlu1 %v4278_v55, %s6010_s9 }
 0x154   : > { %774 = vrot.lane.b32.xlu0 %v4278_v55, %s3976_s17 }
 0x156   : > { %838 = vrot.lane.b32.xlu1 %v4278_v55, %s3977_s18 }
 0x158   : > { %966 = vrot.lane.b32.xlu0 %v4278_v55, %s3979_s13 }
 0x15a   : > { %902 = vrot.lane.b32.xlu1 %v4278_v55, %s3978_s26 }
 0x15c   : > { %524 = vrot.lane.b32.xlu0 %v4297_v58, %s6008_s28 }
 0x15e   : > { %652 = vrot.lane.b32.xlu1 %v4297_v58, %s6010_s9 }
 0x160   : > { %588 = vrot.lane.b32.xlu0 %v4297_v58, %s6009_s29 }
 0x162   : > { %716 = vrot.lane.b32.xlu1 %v4297_v58, %s6011_s12 }
 0x164   : > { %v4311_v59 = vpop.permute.xlu1 %504  ;;  %780 = vrot.lane.b32.xlu0 %v4297_v58, %s3976_s17 }
 0x165   : > { %6014 = vst [vmem:[#allocation6_spill] sm:$0xff] %v4311_v59 }
 0x166   : > { %908 = vrot.lane.b32.xlu1 %v4297_v58, %s3978_s26  ;;  %v4317_v60 = vpop.permute.xlu0 %502 }
 0x167   : > { %6015 = vst [vmem:[#allocation7_spill] sm:$0xff] %v4317_v60 }
 0x168   : > { %v4319_v61 = vpop.permute.xlu1 %568  ;;  %844 = vrot.lane.b32.xlu0 %v4297_v58, %s3977_s18 }
 0x169   : > { %6016 = vst [vmem:[#allocation8_spill] sm:$0xff] %v4319_v61 }
 0x16a   : > { %972 = vrot.lane.b32.xlu1 %v4297_v58, %s3979_s13  ;;  %v4325_v62 = vpop.permute.xlu0 %508 }
 0x16b   : > { %6017 = vst [vmem:[#allocation9_spill] sm:$0xff] %v4325_v62 }
 0x16c   : > { %v4327_v63 = vpop.permute.xlu1 %636  ;;  %1036 = vrot.lane.b32.xlu0 %v4297_v58, %s3980_s20 }
 0x16d   : > { %6018 = vst [vmem:[#allocation10_spill] sm:$0xff] %v4327_v63 }
 0x16e   : > { %1164 = vrot.lane.b32.xlu1 %v4297_v58, %s3981_s16  ;;  %v4336_v2 = vpop.permute.xlu0 %572 }
 0x16f   : > { %6019 = vst [vmem:[#allocation11_spill] sm:$0xff] %v4336_v2 }
 0x170   : > { %v4340_v4 = vpop.permute.xlu1 %700  ;;  %1100 = vrot.lane.b32.xlu0 %v4297_v58, %s5996_s19 }
 0x171   : > { %6020 = vst [vmem:[#allocation12_spill] sm:$0xff] %v4340_v4 }
 0x172   : > { %522 = vrot.lane.b32.xlu1 %v4338_v3, %s6008_s28  ;;  %v4346_v5 = vpop.permute.xlu0 %570 }
 0x173   : > { %6021 = vst [vmem:[#allocation13_spill] sm:$0xff] %v4346_v5 }
 0x174   : > { %v4348_v6 = vpop.permute.xlu1 %506  ;;  %586 = vrot.lane.b32.xlu0 %v4338_v3, %s6009_s29 }
 0x175   : > { %6022 = vst [vmem:[#allocation14_spill] sm:$0xff] %v4348_v6 }
 0x176   : > { %714 = vrot.lane.b32.xlu1 %v4338_v3, %s6011_s12  ;;  %v4354_v7 = vpop.permute.xlu0 %634 }
 0x177   : > { %6023 = vst [vmem:[#allocation15_spill] sm:$0xff] %v4354_v7 }
 0x178   : > { %v4356_v8 = vpop.permute.xlu1 %512  ;;  %650 = vrot.lane.b32.xlu0 %v4338_v3, %s6010_s9 }
 0x17a   : > { %778 = vrot.lane.b32.xlu1 %v4338_v3, %s3976_s17  ;;  %v4362_v9 = vpop.permute.xlu0 %640 }
 0x17b   : > { %6024 = vst [vmem:[#allocation16_spill] sm:$0xff] %v4362_v9 }
 0x17c   : > { %v4364_v10 = vpop.permute.xlu1 %576  ;;  %842 = vrot.lane.b32.xlu0 %v4338_v3, %s3977_s18 }
 0x17d   : > { %6025 = vst [vmem:[#allocation17_spill] sm:$0xff] %v4364_v10 }
 0x17e   : > { %970 = vrot.lane.b32.xlu1 %v4338_v3, %s3979_s13  ;;  %v4370_v11 = vpop.permute.xlu0 %704 }
 0x17f   : > { %6026 = vst [vmem:[#allocation18_spill] sm:$0xff] %v4370_v11 }
 0x180   : > { %v4375_v14 = vpop.permute.xlu1 %768  ;;  %906 = vrot.lane.b32.xlu0 %v4338_v3, %s3978_s26 }
 0x181   : > { %6027 = vst [vmem:[#allocation19_spill] sm:$0xff] %v4375_v14 }
 0x182   : > { %1034 = vrot.lane.b32.xlu1 %v4338_v3, %s3980_s20  ;;  %v4381_v15 = vpop.permute.xlu0 %510 }
 0x183   : > { %6028 = vst [vmem:[#allocation20_spill] sm:$0xff] %v4381_v15 }
 0x184   : > { %v4385_v17 = vpop.permute.xlu1 %832  ;;  %1098 = vrot.lane.b32.xlu0 %v4338_v3, %s5996_s19 }
 0x185   : > { %6029 = vst [vmem:[#allocation21_spill] sm:$0xff] %v4385_v17 }
 0x186   : > { %528 = vrot.lane.b32.xlu1 %v4383_v16, %s6008_s28  ;;  %v4391_v18 = vpop.permute.xlu0 %702 }
 0x187   : > { %6030 = vst [vmem:[#allocation22_spill] sm:$0xff] %v4391_v18 }
 0x188   : > { %v4393_v19 = vpop.permute.xlu1 %574  ;;  %656 = vrot.lane.b32.xlu0 %v4383_v16, %s6010_s9 }
 0x189   : > { %6031 = vst [vmem:[#allocation23_spill] sm:$0xff] %v4393_v19 }
 0x18a   : > { %592 = vrot.lane.b32.xlu1 %v4383_v16, %s6009_s29  ;;  %v4399_v20 = vpop.permute.xlu0 %766 }
 0x18b   : > { %6032 = vst [vmem:[#allocation24_spill] sm:$0xff] %v4399_v20 }
 0x18c   : > { %v4401_v21 = vpop.permute.xlu1 %638  ;;  %720 = vrot.lane.b32.xlu0 %v4383_v16, %s6011_s12 }
 0x18d   : > { %6033 = vst [vmem:[#allocation25_spill] sm:$0xff] %v4401_v21 }
 0x18e   : > { %784 = vrot.lane.b32.xlu1 %v4383_v16, %s3976_s17  ;;  %v4407_v22 = vpop.permute.xlu0 %516 }
 0x18f   : > { %6034 = vst [vmem:[#allocation26_spill] sm:$0xff] %v4407_v22 }
 0x190   : > { %v4409_v23 = vpop.permute.xlu1 %644  ;;  %912 = vrot.lane.b32.xlu0 %v4383_v16, %s3978_s26 }
 0x191   : > { %6035 = vst [vmem:[#allocation27_spill] sm:$0xff] %v4409_v23 }
 0x192   : > { %848 = vrot.lane.b32.xlu1 %v4383_v16, %s3977_s18  ;;  %v4415_v24 = vpop.permute.xlu0 %580 }
 0x193   : > { %6036 = vst [vmem:[#allocation28_spill] sm:$0xff] %v4415_v24 }
 0x194   : > { %v4417_v25 = vpop.permute.xlu1 %708  ;;  %976 = vrot.lane.b32.xlu0 %v4383_v16, %s3979_s13 }
 0x195   : > { %6037 = vst [vmem:[#allocation29_spill] sm:$0xff] %v4417_v25  ;;  %v5998_v25 = vmov 0.0  }
 0x196   : > { %1040 = vrot.lane.b32.xlu1 %v4383_v16, %s3980_s20  ;;  %v4423_v26 = vpop.permute.xlu0 %772  ;;  %3289 = vmatprep.subr.mxu1 %v5998_v25 }
 0x197   : > { %6038 = vst [vmem:[#allocation30_spill] sm:$0xff] %v4423_v26  ;;  %3324 = vmatprep.subr.mxu0 %v5998_v25 }
 0x198   : > { %v4425_v27 = vpop.permute.xlu1 %900  ;;  %1168 = vrot.lane.b32.xlu0 %v4383_v16, %s3981_s16 }
 0x199   : > { %6039 = vst [vmem:[#allocation31_spill] sm:$0xff] %v4425_v27 }
 0x19a   : > { %1104 = vrot.lane.b32.xlu1 %v4383_v16, %s5996_s19  ;;  %v4431_v28 = vpop.permute.xlu0 %836 }
 0x19b   : > { %6040 = vst [vmem:[#allocation32_spill] sm:$0xff] %v4431_v28 }
 0x19c   : > { %v4436_v33 = vpop.permute.xlu1 %964  ;;  %1232 = vrot.lane.b32.xlu0 %v4383_v16, %s3983_s10 }
 0x19d   : > { %6041 = vst [vmem:[#allocation33_spill] sm:$0xff] %v4436_v33 }
 0x19e   : > { %1296 = vrot.lane.b32.xlu1 %v4383_v16, %s3984_s11  ;;  %v4444_v36 = vpop.permute.xlu0 %578 }
 0x19f   : > { %6042 = vst [vmem:[#allocation34_spill] sm:$0xff] %v4444_v36 }
 0x1a0   : > { %v4446_v38 = vpop.permute.xlu1 %514  ;;  %526 = vrot.lane.b32.xlu0 %v4440_v35, %s6008_s28 }
 0x1a1   : > { %6043 = vst [vmem:[#allocation35_spill] sm:$0xff] %v4446_v38 }
 0x1a2   : > { %590 = vrot.lane.b32.xlu1 %v4440_v35, %s6009_s29  ;;  %v4452_v39 = vpop.permute.xlu0 %642 }
 0x1a3   : > { %6044 = vst [vmem:[#allocation36_spill] sm:$0xff] %v4452_v39 }
 0x1a4   : > { %v4454_v41 = vpop.permute.xlu1 %706  ;;  %718 = vrot.lane.b32.xlu0 %v4440_v35, %s6011_s12 }
 0x1a5   : > { %6045 = vst [vmem:[#allocation37_spill] sm:$0xff] %v4454_v41 }
 0x1a6   : > { %654 = vrot.lane.b32.xlu1 %v4440_v35, %s6010_s9  ;;  %v4460_v42 = vpop.permute.xlu0 %834 }
 0x1a7   : > { %6046 = vst [vmem:[#allocation38_spill] sm:$0xff] %v4460_v42 }
 0x1a8   : > { %v4462_v44 = vpop.permute.xlu1 %770  ;;  %782 = vrot.lane.b32.xlu0 %v4440_v35, %s3976_s17 }
 0x1a9   : > { %6047 = vst [vmem:[#allocation39_spill] sm:$0xff] %v4462_v44 }
 0x1aa   : > { %846 = vrot.lane.b32.xlu1 %v4440_v35, %s3977_s18  ;;  %v4468_v45 = vpop.permute.xlu0 %898 }
 0x1ab   : > { %6048 = vst [vmem:[#allocation40_spill] sm:$0xff] %v4468_v45 }
 0x1ac   : > { %v4470_v47 = vpop.permute.xlu1 %520  ;;  %974 = vrot.lane.b32.xlu0 %v4440_v35, %s3979_s13 }
 0x1ad   : > { %6049 = vst [vmem:[#allocation41_spill] sm:$0xff] %v4470_v47 }
 0x1ae   : > { %910 = vrot.lane.b32.xlu1 %v4440_v35, %s3978_s26  ;;  %v4476_v48 = vpop.permute.xlu0 %648 }
 0x1af   : > { %6050 = vst [vmem:[#allocation42_spill] sm:$0xff] %v4476_v48 }
 0x1b0   : > { %v4478_v50 = vpop.permute.xlu1 %584  ;;  %1038 = vrot.lane.b32.xlu0 %v4440_v35, %s3980_s20 }
 0x1b1   : > { %6051 = vst [vmem:[#allocation43_spill] sm:$0xff] %v4478_v50 }
 0x1b2   : > { %1102 = vrot.lane.b32.xlu1 %v4440_v35, %s5996_s19  ;;  %v4487_v53 = vpop.permute.xlu0 %712 }
 0x1b3   : > { %6052 = vst [vmem:[#allocation44_spill] sm:$0xff] %v4487_v53 }
 0x1b4   : > { %v4491_v57 = vpop.permute.xlu1 %776  ;;  %1230 = vrot.lane.b32.xlu0 %v4440_v35, %s3983_s10 }
 0x1b5   : > { %6053 = vst [vmem:[#allocation45_spill] sm:$0xff] %v4491_v57 }
 0x1b6   : > { %1166 = vrot.lane.b32.xlu1 %v4440_v35, %s3981_s16  ;;  %v4497_v0 = vpop.permute.xlu0 %904 }
 0x1b7   : > { %6054 = vst [vmem:[#allocation46_spill] sm:$0xff] %v4497_v0 }
 0x1b8   : > { %v4499_v1 = vpop.permute.xlu1 %840  ;;  %532 = vrot.lane.b32.xlu0 %v4489_v56, %s6008_s28 }
 0x1b9   : > { %6055 = vst [vmem:[#allocation47_spill] sm:$0xff] %v4499_v1 }
 0x1ba   : > { %596 = vrot.lane.b32.xlu1 %v4489_v56, %s6009_s29  ;;  %v4505_v12 = vpop.permute.xlu0 %968 }
 0x1bb   : > { %6056 = vst [vmem:[#allocation48_spill] sm:$0xff] %v4505_v12 }
 0x1bc   : > { %v4507_v13 = vpop.permute.xlu1 %1032  ;;  %788 = vrot.lane.b32.xlu0 %v4489_v56, %s3976_s17 }
 0x1bd   : > { %6057 = vst [vmem:[#allocation49_spill] sm:$0xff] %v4507_v13 }
 0x1be   : > { %660 = vrot.lane.b32.xlu1 %v4489_v56, %s6010_s9  ;;  %v4513_v30 = vpop.permute.xlu0 %518 }
 0x1bf   : > { %6058 = vst [vmem:[#allocation50_spill] sm:$0xff] %v4513_v30 }
 0x1c0   : > { %v4515_v31 = vpop.permute.xlu1 %582  ;;  %852 = vrot.lane.b32.xlu0 %v4489_v56, %s3977_s18 }
 0x1c1   : > { %6059 = vst [vmem:[#allocation51_spill] sm:$0xff] %v4515_v31 }
 0x1c2   : > { %724 = vrot.lane.b32.xlu1 %v4489_v56, %s6011_s12  ;;  %v4521_v51 = vpop.permute.xlu0 %710 }
 0x1c3   : > { %6060 = vst [vmem:[#allocation52_spill] sm:$0xff] %v4521_v51 }
 0x1c4   : > { %v4523_v54 = vpop.permute.xlu1 %646  ;;  %1044 = vrot.lane.b32.xlu0 %v4489_v56, %s3980_s20 }
 0x1c5   : > { %6061 = vst [vmem:[#allocation53_spill] sm:$0xff] %v4523_v54 }
 0x1c6   : > { %916 = vrot.lane.b32.xlu1 %v4489_v56, %s3978_s26  ;;  %v4529_v33 = vpop.permute.xlu0 %774 }
 0x1c7   : > { %6062 = vst [vmem:[#allocation54_spill] sm:$0xff] %v4529_v33 }
 0x1c8   : > { %v4531_v27 = vpop.permute.xlu1 %838  ;;  %1108 = vrot.lane.b32.xlu0 %v4489_v56, %s5996_s19  ;;  %s3986_s19 = smov 16  }
 0x1c9   : > { %6063 = vst [vmem:[#allocation55_spill] sm:$0xff] %v4531_v27  ;;  %v477_v27 = vpop.f32.mrf.mxu0 }
 0x1ca   : > { %980 = vrot.lane.b32.xlu1 %v4489_v56, %s3979_s13  ;;  %v4537_v28 = vpop.permute.xlu0 %966 }
 0x1cb   : > { %6064 = vst [vmem:[#allocation56_spill] sm:$0xff] %v4537_v28  ;;  %v290_v28 = vld [vmem:[%s5991_s2 + $0x70] sm:$0xff] }
 0x1cc   : > { %v4539_v26 = vpop.permute.xlu1 %902  ;;  %1300 = vrot.lane.b32.xlu0 %v4489_v56, %s3984_s11 }
 0x1cd   : > { %6065 = vst [vmem:[#allocation57_spill] sm:$0xff] %v4539_v26  ;;  %v4556_v26 = vadd.f32 %v477_v27, %v290_v28 }
 0x1ce   : > { %1172 = vrot.lane.b32.xlu1 %v4489_v56, %s3981_s16  ;;  %v4547_v23 = vpop.permute.xlu0 %524 }
 0x1d0   : > { %v4552_v24 = vpop.permute.xlu1 %652  ;;  %1364 = vrot.lane.b32.xlu0 %v4489_v56, %s3986_s19 }
 0x1d2   : > { %1236 = vrot.lane.b32.xlu1 %v4489_v56, %s3983_s10  ;;  %v4560_v25 = vpop.permute.xlu0 %588 }
 0x1d4   : > { %v4562_v22 = vpop.permute.xlu1 %716  ;;  %530 = vrot.lane.b32.xlu0 %v4556_v26, %s6008_s28  ;;  %s6159_s28 = smov 104  }
 0x1d6   : > { %1428 = vrot.lane.b32.xlu1 %v4489_v56, %s3987_s14  ;;  %v4568_v33 = vpop.permute.xlu0 %780 }
 0x1d8   : > { %v4570_v13 = vpop.permute.xlu1 %908  ;;  %594 = vrot.lane.b32.xlu0 %v4556_v26, %s6009_s29 }
 0x1da   : > { %722 = vrot.lane.b32.xlu1 %v4556_v26, %s6011_s12  ;;  %v4576_v27 = vpop.permute.xlu0 %844 }
 0x1dc   : > { %v4578_v28 = vpop.permute.xlu1 %972  ;;  %658 = vrot.lane.b32.xlu0 %v4556_v26, %s6010_s9 }
 0x1de   : > { %786 = vrot.lane.b32.xlu1 %v4556_v26, %s3976_s17  ;;  %v4584_v51 = vpop.permute.xlu0 %1036 }
 0x1e0   : > { %v4586_v12 = vpop.permute.xlu1 %1164  ;;  %850 = vrot.lane.b32.xlu0 %v4556_v26, %s3977_s18 }
 0x1e1   : > { %6066 = vst [vmem:[#allocation58_spill] sm:$0xff] %v4586_v12 }
 0x1e2   : > { %978 = vrot.lane.b32.xlu1 %v4556_v26, %s3979_s13  ;;  %v4592_v54 = vpop.permute.xlu0 %1100 }
 0x1e3   : > { %6067 = vst [vmem:[#allocation59_spill] sm:$0xff] %v4592_v54 }
 0x1e4   : > { %v4594_v0 = vpop.permute.xlu1 %522  ;;  %914 = vrot.lane.b32.xlu0 %v4556_v26, %s3978_s26 }
 0x1e6   : > { %1042 = vrot.lane.b32.xlu1 %v4556_v26, %s3980_s20  ;;  %v4600_v31 = vpop.permute.xlu0 %586 }
 0x1e7   : > { %6068 = vst [vmem:[#allocation60_spill] sm:$0xff] %v4600_v31 }
 0x1e8   : > { %v4602_v1 = vpop.permute.xlu1 %714  ;;  %1106 = vrot.lane.b32.xlu0 %v4556_v26, %s6070_s15 }
 0x1e9   : > { %6069 = vst [vmem:[#allocation61_spill] sm:$0xff] %v4602_v1 }
 0x1ea   : > { %1234 = vrot.lane.b32.xlu1 %v4556_v26, %s3983_s10  ;;  %v4608_v30 = vpop.permute.xlu0 %650 }
 0x1eb   : > { %6071 = vst [vmem:[#allocation62_spill] sm:$0xff] %v4608_v30 }
 0x1ec   : > { %v4610_v57 = vpop.permute.xlu1 %778  ;;  %1170 = vrot.lane.b32.xlu0 %v4556_v26, %s3981_s16 }
 0x1ed   : > { %6072 = vst [vmem:[#allocation63_spill] sm:$0xff] %v4610_v57 }
 0x1ee   : > { %1298 = vrot.lane.b32.xlu1 %v4556_v26, %s3984_s11  ;;  %v4616_v53 = vpop.permute.xlu0 %842 }
 0x1ef   : > { %6073 = vst [vmem:[#allocation64_spill] sm:$0xff] %v4616_v53 }
 0x1f0   : > { %v4618_v48 = vpop.permute.xlu1 %970  ;;  %1362 = vrot.lane.b32.xlu0 %v4556_v26, %s3986_s19 }
 0x1f1   : > { %6074 = vst [vmem:[#allocation65_spill] sm:$0xff] %v4618_v48 }
 0x1f2   : > { %1096 = vrot.lane.b32.xlu1 %v4255_v52, %s6070_s15  ;;  %v4624_v45 = vpop.permute.xlu0 %906 }
 0x1f3   : > { %6075 = vst [vmem:[#allocation66_spill] sm:$0xff] %v4624_v45 }
 0x1f4   : > { %v4626_v20 = vpop.permute.xlu1 %1034  ;;  %1030 = vrot.lane.b32.xlu0 %v4278_v55, %s3980_s20 }
 0x1f5   : > { %6076 = vst [vmem:[#allocation67_spill] sm:$0xff] %v4626_v20 }
 0x1f6   : > { %1228 = vrot.lane.b32.xlu1 %v4297_v58, %s3983_s10  ;;  %v4632_v50 = vpop.permute.xlu0 %1098 }
 0x1f7   : > { %6077 = vst [vmem:[#allocation68_spill] sm:$0xff] %v4632_v50 }
 0x1f8   : > { %v4634_v42 = vpop.permute.xlu1 %528  ;;  %1162 = vrot.lane.b32.xlu0 %v4338_v3, %s3981_s16 }
 0x1fa   : > { %1360 = vrot.lane.b32.xlu1 %v4383_v16, %s3986_s19  ;;  %v4640_v48 = vpop.permute.xlu0 %656 }
 0x1fc   : > { %v4642_v45 = vpop.permute.xlu1 %592  ;;  %1294 = vrot.lane.b32.xlu0 %v4440_v35, %s3984_s11 }
 0x1fe   : > { %566 = vrot.lane.b32.xlu1 %v4153_v32, %s6009_s29  ;;  %v4648_v20 = vpop.permute.xlu0 %720 }
 0x200   : > { %v4650_v50 = vpop.permute.xlu1 %784  ;;  %1426 = vrot.lane.b32.xlu0 %v4556_v26, %s3987_s14 }
 0x202   : > { %698 = vrot.lane.b32.xlu1 %v4172_v37, %s6011_s12  ;;  %v4656_v47 = vpop.permute.xlu0 %912 }
 0x204   : > { %v4658_v17 = vpop.permute.xlu1 %848  ;;  %632 = vrot.lane.b32.xlu0 %v4148_v29, %s6010_s9 }
 0x206   : > { %830 = vrot.lane.b32.xlu1 %v4198_v43, %s3977_s18  ;;  %v4664_v44 = vpop.permute.xlu0 %976 }
 0x208   : > { %v4666_v18 = vpop.permute.xlu1 %1040  ;;  %764 = vrot.lane.b32.xlu0 %v4157_v34, %s3976_s17 }
 0x20a   : > { %962 = vrot.lane.b32.xlu1 %v4236_v49, %s3979_s13  ;;  %v4672_v7 = vpop.permute.xlu0 %1168 }
 0x20c   : > { %v4674_v4 = vpop.permute.xlu1 %1104  ;;  %896 = vrot.lane.b32.xlu0 %v4183_v40, %s3978_s26 }
 0x20e   : > { %1094 = vrot.lane.b32.xlu1 %v4278_v55, %s6070_s15  ;;  %v4680_v53 = vpop.permute.xlu0 %1232 }
 0x210   : > { %v4682_v14 = vpop.permute.xlu1 %1296  ;;  %1028 = vrot.lane.b32.xlu0 %v4213_v46, %s3980_s20 }
 0x212   : > { %1226 = vrot.lane.b32.xlu1 %v4338_v3, %s3983_s10  ;;  %v4688_v60 = vpop.permute.xlu0 %526 }
 0x214   : > { %v4690_v41 = vpop.permute.xlu1 %590  ;;  %1160 = vrot.lane.b32.xlu0 %v4255_v52, %s3981_s16 }
 0x216   : > { %1358 = vrot.lane.b32.xlu1 %v4440_v35, %s3986_s19  ;;  %v4696_v21 = vpop.permute.xlu0 %718 }
 0x218   : > { %v4698_v5 = vpop.permute.xlu1 %654  ;;  %1292 = vrot.lane.b32.xlu0 %v4297_v58, %s3984_s11 }
 0x21a   : > { %630 = vrot.lane.b32.xlu1 %v4153_v32, %s6010_s9  ;;  %v4704_v63 = vpop.permute.xlu0 %782 }
 0x21c   : > { %v4706_v61 = vpop.permute.xlu1 %846  ;;  %1424 = vrot.lane.b32.xlu0 %v4383_v16, %s3987_s14 }
 0x21e   : > { %762 = vrot.lane.b32.xlu1 %v4172_v37, %s3976_s17  ;;  %v4712_v57 = vpop.permute.xlu0 %974 }
 0x220   : > { %v4714_v19 = vpop.permute.xlu1 %910  ;;  %696 = vrot.lane.b32.xlu0 %v4148_v29, %s6011_s12 }
 0x222   : > { %894 = vrot.lane.b32.xlu1 %v4198_v43, %s3978_s26  ;;  %v4720_v11 = vpop.permute.xlu0 %1038 }
 0x224   : > { %v4722_v59 = vpop.permute.xlu1 %1102  ;;  %828 = vrot.lane.b32.xlu0 %v4157_v34, %s3977_s18 }
 0x226   : > { %1026 = vrot.lane.b32.xlu1 %v4236_v49, %s3980_s20  ;;  %v4728_v39 = vpop.permute.xlu0 %1230 }
 0x228   : > { %v4730_v15 = vpop.permute.xlu1 %1166  ;;  %960 = vrot.lane.b32.xlu0 %v4183_v40, %s3979_s13 }
 0x22a   : > { %1158 = vrot.lane.b32.xlu1 %v4278_v55, %s3981_s16  ;;  %v533_v6 = vpop.permute.xlu0 %532 }
 0x22b   : > { %v565_v2 = vmax.f32 %v4489_v56, %v533_v6 }
 0x22c   : > { %v597_v12 = vpop.permute.xlu1 %596  ;;  %1092 = vrot.lane.b32.xlu0 %v4213_v46, %s6070_s15 }
 0x22d   : > { %v629_v62 = vmax.f32 %v565_v2, %v597_v12 }
 0x22e   : > { %1290 = vrot.lane.b32.xlu1 %v4338_v3, %s3984_s11  ;;  %v789_v1 = vpop.permute.xlu0 %788 }
 0x230   : > { %v661_v9 = vpop.permute.xlu1 %660  ;;  %1224 = vrot.lane.b32.xlu0 %v4255_v52, %s3983_s10 }
 0x231   : > { %v693_v54 = vmax.f32 %v629_v62, %v661_v9 }
 0x232   : > { %1422 = vrot.lane.b32.xlu1 %v4440_v35, %s3987_s14  ;;  %v853_v36 = vpop.permute.xlu0 %852 }
 0x234   : > { %v725_v30 = vpop.permute.xlu1 %724  ;;  %1356 = vrot.lane.b32.xlu0 %v4297_v58, %s3986_s19 }
 0x235   : > { %v757_v10 = vmax.f32 %v693_v54, %v725_v30 }
 0x236   : > { %760 = vrot.lane.b32.xlu1 %v4148_v29, %s3976_s17  ;;  %v1045_v6 = vpop.permute.xlu0 %1044 }
 0x237   : > { %v821_v56 = vmax.f32 %v757_v10, %v789_v1 }
 0x238   : > { %v917_v31 = vpop.permute.xlu1 %916  ;;  %694 = vrot.lane.b32.xlu0 %v4153_v32, %s6011_s12  ;;  %s242_s12 = sand.u32 1, %s3962_s22  }
 0x239   : > { %v885_v2 = vmax.f32 %v821_v56, %v853_v36 }
 0x23a   : > { %892 = vrot.lane.b32.xlu1 %v4157_v34, %s3978_s26  ;;  %v1109_v12 = vpop.permute.xlu0 %1108 }
 0x23b   : > { %v949_v62 = vmax.f32 %v885_v2, %v917_v31 }
 0x23c   : > { %v981_v9 = vpop.permute.xlu1 %980  ;;  %826 = vrot.lane.b32.xlu0 %v4172_v37, %s3977_s18 }
 0x23d   : > { %v1013_v30 = vmax.f32 %v949_v62, %v981_v9 }
 0x23e   : > { %1024 = vrot.lane.b32.xlu1 %v4183_v40, %s3980_s20  ;;  %v1301_v54 = vpop.permute.xlu0 %1300 }
 0x23f   : > { %v1077_v10 = vmax.f32 %v1013_v30, %v1045_v6 }
 0x240   : > { %v1173_v1 = vpop.permute.xlu1 %1172  ;;  %958 = vrot.lane.b32.xlu0 %v4198_v43, %s3979_s13 }
 0x241   : > { %v1141_v36 = vmax.f32 %v1077_v10, %v1109_v12 }
 0x242   : > { %1156 = vrot.lane.b32.xlu1 %v4213_v46, %s3981_s16  ;;  %v1365_v56 = vpop.permute.xlu0 %1364 }
 0x243   : > { %v1205_v31 = vmax.f32 %v1141_v36, %v1173_v1 }
 0x244   : > { %v1237_v2 = vpop.permute.xlu1 %1236  ;;  %1090 = vrot.lane.b32.xlu0 %v4236_v49, %s6070_s15 }
 0x245   : > { %v1269_v62 = vmax.f32 %v1205_v31, %v1237_v2 }
 0x246   : > { %1288 = vrot.lane.b32.xlu1 %v4255_v52, %s3984_s11  ;;  %v531_v9 = vpop.permute.xlu0 %530 }
 0x247   : > { %v1333_v6 = vmax.f32 %v1269_v62, %v1301_v54  ;;  %v564_v1 = vmax.f32 %v4556_v26, %v531_v9 }
 0x248   : > { %v1429_v30 = vpop.permute.xlu1 %1428  ;;  %1222 = vrot.lane.b32.xlu0 %v4278_v55, %s3983_s10 }
 0x249   : > { %v1397_v12 = vmax.f32 %v1333_v6, %v1365_v56  ;;  %v6079_v56 = vmov 0.0  }
 0x24a   : > { %1420 = vrot.lane.b32.xlu1 %v4297_v58, %s3987_s14  ;;  %v595_v10 = vpop.permute.xlu0 %594  ;;  %3321 = vmatprep.mubr.msk.f32.mxu1 %vm3988_vm1, %v6079_v56 }
 0x24b   : > { %v4770_v36 = vmax.f32 %v1397_v12, %v1429_v30  ;;  %v628_v31 = vmax.f32 %v564_v1, %v595_v10  ;;  %3356 = vmatprep.mubr.msk.f32.mxu0 %vm3988_vm1, %v6079_v56 }
 0x24c   : > { %v723_v38 = vpop.permute.xlu1 %722  ;;  %1354 = vrot.lane.b32.xlu0 %v4338_v3, %s3986_s19 }
 0x24d   : > { %6078 = vst [vmem:[#allocation69_spill] sm:$0xff] %v4770_v36  ;;  %3290 = vmatpush3.msra.mxu1 %v4770_v36  ;;  %3325 = vmatpush3.msra.mxu0 %v4770_v36 }
 0x24e   : > { %824 = vrot.lane.b32.xlu1 %v4148_v29, %s3977_s18  ;;  %v659_v54 = vpop.permute.xlu0 %658  ;;  %3291 = vmatprep.subr.mxu1 %v6079_v56 }
 0x24f   : > { %v692_v2 = vmax.f32 %v628_v31, %v659_v54  ;;  %3326 = vmatprep.subr.mxu0 %v6079_v56 }
 0x250   : > { %v787_v26 = vpop.permute.xlu1 %786  ;;  %758 = vrot.lane.b32.xlu0 %v4153_v32, %s3976_s17 }
 0x251   : > { %v756_v62 = vmax.f32 %v692_v2, %v723_v38 }
 0x252   : > { %956 = vrot.lane.b32.xlu1 %v4157_v34, %s3979_s13  ;;  %v851_v9 = vpop.permute.xlu0 %850 }
 0x253   : > { %v820_v6 = vmax.f32 %v756_v62, %v787_v26  ;;  %v563_v26 = vmax.f32 %v4383_v16, %v4634_v42 }
 0x254   : > { %v979_v30 = vpop.permute.xlu1 %978  ;;  %890 = vrot.lane.b32.xlu0 %v4172_v37, %s3978_s26 }
 0x255   : > { %v884_v12 = vmax.f32 %v820_v6, %v851_v9  ;;  %v627_v6 = vmax.f32 %v563_v26, %v4642_v45 }
 0x256   : > { %1088 = vrot.lane.b32.xlu1 %v4183_v40, %s6070_s15  ;;  %v915_v10 = vpop.permute.xlu0 %914 }
 0x257   : > { %v948_v1 = vmax.f32 %v884_v12, %v915_v10 }
 0x258   : > { %v1043_v31 = vpop.permute.xlu1 %1042  ;;  %1022 = vrot.lane.b32.xlu0 %v4198_v43, %s3980_s20 }
 0x259   : > { %v1012_v38 = vmax.f32 %v948_v1, %v979_v30  ;;  %v691_v1 = vmax.f32 %v627_v6, %v4640_v48 }
 0x25a   : > { %1220 = vrot.lane.b32.xlu1 %v4213_v46, %s3983_s10  ;;  %v1107_v54 = vpop.permute.xlu0 %1106 }
 0x25b   : > { %v1076_v62 = vmax.f32 %v1012_v38, %v1043_v31  ;;  %v755_v45 = vmax.f32 %v691_v1, %v4648_v20 }
 0x25c   : > { %v1235_v2 = vpop.permute.xlu1 %1234  ;;  %1154 = vrot.lane.b32.xlu0 %v4236_v49, %s3981_s16 }
 0x25d   : > { %v1140_v30 = vmax.f32 %v1076_v62, %v1107_v54  ;;  %v819_v54 = vmax.f32 %v755_v45, %v4650_v50 }
 0x25e   : > { %1352 = vrot.lane.b32.xlu1 %v4255_v52, %s3986_s19  ;;  %v1171_v9 = vpop.permute.xlu0 %1170 }
 0x25f   : > { %v1204_v16 = vmax.f32 %v1140_v30, %v1171_v9  ;;  %v883_v9 = vmax.f32 %v819_v54, %v4658_v17  ;;  %v562_v17 = vmax.f32 %v4440_v35, %v4688_v60 }
 0x260   : > { %v1299_v12 = vpop.permute.xlu1 %1298  ;;  %1286 = vrot.lane.b32.xlu0 %v4278_v55, %s3984_s11 }
 0x261   : > { %v1268_v38 = vmax.f32 %v1204_v16, %v1235_v2  ;;  %v947_v30 = vmax.f32 %v883_v9, %v4656_v47  ;;  %v626_v60 = vmax.f32 %v562_v17, %v4690_v41 }
 0x262   : > { %822 = vrot.lane.b32.xlu1 %v4153_v32, %s3977_s18  ;;  %v1363_v10 = vpop.permute.xlu0 %1362 }
 0x263   : > { %v1332_v62 = vmax.f32 %v1268_v38, %v1299_v12  ;;  %v1011_v47 = vmax.f32 %v947_v30, %v4664_v44  ;;  %v690_v38 = vmax.f32 %v626_v60, %v4698_v5 }
 0x264   : > { %v4804_v36 = vpop.permute.xlu1 %1096  ;;  %1418 = vrot.lane.b32.xlu0 %v4338_v3, %s3987_s14 }
 0x265   : > { %v1396_v6 = vmax.f32 %v1332_v62, %v1363_v10  ;;  %v1075_v45 = vmax.f32 %v1011_v47, %v4666_v18  ;;  %v754_v62 = vmax.f32 %v690_v38, %v4696_v21 }
 0x266   : > { %954 = vrot.lane.b32.xlu1 %v4172_v37, %s3979_s13  ;;  %v4810_v42 = vpop.permute.xlu0 %1030 }
 0x267   : > { %v1139_v41 = vmax.f32 %v1075_v45, %v4674_v4  ;;  %v561_v45 = vmax.f32 %v4297_v58, %v4547_v23 }
 0x268   : > { %v4813_v31 = vpop.permute.xlu1 %1228  ;;  %888 = vrot.lane.b32.xlu0 %v4148_v29, %s3978_s26 }
 0x269   : > { %v1203_v18 = vmax.f32 %v1139_v41, %v4672_v7 }
 0x26a   : > { %1086 = vrot.lane.b32.xlu1 %v4198_v43, %s6070_s15  ;;  %v4819_v48 = vpop.permute.xlu0 %1162 }
 0x26b   : > { %v1267_v21 = vmax.f32 %v1203_v18, %v4680_v53 }
 0x26c   : > { %v1361_v26 = vpop.permute.xlu1 %1360  ;;  %1020 = vrot.lane.b32.xlu0 %v4157_v34, %s3980_s20 }
 0x26d   : > { %v1331_v7 = vmax.f32 %v1267_v21, %v4682_v14 }
 0x26e   : > { %1218 = vrot.lane.b32.xlu1 %v4236_v49, %s3983_s10  ;;  %v4826_v20 = vpop.permute.xlu0 %1294 }
 0x26f   : > { %v1395_v53 = vmax.f32 %v1331_v7, %v1361_v26 }
 0x270   : > { %v4829_v2 = vpop.permute.xlu1 %566  ;;  %1152 = vrot.lane.b32.xlu0 %v4183_v40, %s3981_s16 }
 0x272   : > { %1350 = vrot.lane.b32.xlu1 %v4278_v55, %s3986_s19  ;;  %v1427_v50 = vpop.permute.xlu0 %1426 }
 0x273   : > { %v4836_v12 = vmax.f32 %v1396_v6, %v1427_v50  ;;  %v818_v6 = vmax.f32 %v754_v62, %v4704_v63 }
 0x274   : > { %v4838_v1 = vpop.permute.xlu1 %698  ;;  %1284 = vrot.lane.b32.xlu0 %v4213_v46, %s3984_s11 }
 0x275   : > { %6080 = vst [vmem:[#allocation70_spill] sm:$0xff] %v4836_v12  ;;  %3292 = vmatpush3.msra.mxu1 %v4836_v12  ;;  %3327 = vmatpush3.msra.mxu0 %v4836_v12  ;;  %v882_v30 = vmax.f32 %v818_v6, %v4706_v61 }
 0x276   : > { %886 = vrot.lane.b32.xlu1 %v4153_v32, %s3978_s26  ;;  %v4848_v10 = vpop.permute.xlu0 %632  ;;  %3293 = vmatprep.subr.mxu1 %v6079_v56 }
 0x277   : > { %3328 = vmatprep.subr.mxu0 %v6079_v56  ;;  %v946_v47 = vmax.f32 %v882_v30, %v4714_v19  ;;  %v625_v19 = vmax.f32 %v561_v45, %v4560_v25 }
 0x278   : > { %v4853_v16 = vpop.permute.xlu1 %830  ;;  %1416 = vrot.lane.b32.xlu0 %v4255_v52, %s3987_s14 }
 0x279   : > { %v1010_v38 = vmax.f32 %v946_v47, %v4712_v57  ;;  %v689_v25 = vmax.f32 %v625_v19, %v4552_v24 }
 0x27a   : > { %1018 = vrot.lane.b32.xlu1 %v4172_v37, %s3980_s20  ;;  %v4860_v35 = vpop.permute.xlu0 %764 }
 0x27b   : > { %v1074_v58 = vmax.f32 %v1010_v38, %v4720_v11  ;;  %v753_v11 = vmax.f32 %v689_v25, %v4562_v22  ;;  %v6086_v25 = vld [vmem:[#allocation35_spill] sm:$0xff] }
 0x27c   : > { %v4864_v54 = vpop.permute.xlu1 %962  ;;  %952 = vrot.lane.b32.xlu0 %v4148_v29, %s3979_s13 }
 0x27d   : > { %v1138_v62 = vmax.f32 %v1074_v58, %v4722_v59  ;;  %v817_v59 = vmax.f32 %v753_v11, %v4568_v33  ;;  %v6087_v11 = vld [vmem:[#allocation60_spill] sm:$0xff] }
 0x27e   : > { %1150 = vrot.lane.b32.xlu1 %v4198_v43, %s3981_s16  ;;  %v4870_v44 = vpop.permute.xlu0 %896 }
 0x27f   : > { %v1202_v24 = vmax.f32 %v1138_v62, %v4730_v15  ;;  %v881_v15 = vmax.f32 %v817_v59, %v4576_v27  ;;  %v556_v62 = vmax.f32 %v4236_v49, %v6086_v25  ;;  %v6094_v25 = vld [vmem:[#allocation61_spill] sm:$0xff] }
 0x280   : > { %v4874_v9 = vpop.permute.xlu1 %1094  ;;  %1084 = vrot.lane.b32.xlu0 %v4157_v34, %s6070_s15 }
 0x281   : > { %v1266_v22 = vmax.f32 %v1202_v24, %v4728_v39  ;;  %v945_v39 = vmax.f32 %v881_v15, %v4570_v13  ;;  %v560_v13 = vmax.f32 %v4338_v3, %v4594_v0  ;;  %v6088_v24 = vld [vmem:[#allocation17_spill] sm:$0xff] }
 0x282   : > { %1282 = vrot.lane.b32.xlu1 %v4236_v49, %s3984_s11  ;;  %v4880_v5 = vpop.permute.xlu0 %1028 }
 0x283   : > { %6081 = vst [vmem:[#allocation71_spill] sm:$0xff] %v4880_v5  ;;  %v1330_v47 = vmax.f32 %v1266_v22, %v4826_v20  ;;  %v624_v3 = vmax.f32 %v560_v13, %v6087_v11  ;;  %v6089_v22 = vld [vmem:[#allocation62_spill] sm:$0xff]  ;;  %v6093_v13 = vld [vmem:[#allocation16_spill] sm:$0xff] }
 0x284   : > { %v4884_v50 = vpop.permute.xlu1 %1226  ;;  %1216 = vrot.lane.b32.xlu0 %v4183_v40, %s3983_s10 }
 0x285   : > { %v688_v15 = vmax.f32 %v624_v3, %v6089_v22 }
 0x286   : > { %1414 = vrot.lane.b32.xlu1 %v4278_v55, %s3987_s14  ;;  %v4890_v4 = vpop.permute.xlu0 %1160 }
 0x287   : > { %v752_v11 = vmax.f32 %v688_v15, %v6094_v25  ;;  %v6101_v15 = vld [vmem:[#allocation6_spill] sm:$0xff]  ;;  %v6103_v25 = vld [vmem:[#allocation23_spill] sm:$0xff] }
 0x288   : > { %v1359_v17 = vpop.permute.xlu1 %1358  ;;  %1348 = vrot.lane.b32.xlu0 %v4213_v46, %s3986_s19 }
 0x28a   : > { %1016 = vrot.lane.b32.xlu1 %v4148_v29, %s3980_s20  ;;  %v4898_v63 = vpop.permute.xlu0 %1292 }
 0x28c   : > { %v4902_v60 = vpop.permute.xlu1 %630  ;;  %950 = vrot.lane.b32.xlu0 %v4153_v32, %s3979_s13 }
 0x28e   : > { %1148 = vrot.lane.b32.xlu1 %v4157_v34, %s3981_s16  ;;  %v1425_v61 = vpop.permute.xlu0 %1424 }
 0x28f   : > { %v4911_v41 = vmax.f32 %v1395_v53, %v1425_v61  ;;  %v1394_v53 = vmax.f32 %v1330_v47, %v1359_v17  ;;  %v1009_v17 = vmax.f32 %v945_v39, %v4578_v28  ;;  %v555_v28 = vmax.f32 %v4183_v40, %v4356_v8  ;;  %v6090_v8 = vld [vmem:[#allocation59_spill] sm:$0xff]  ;;  %v6092_v39 = vld [vmem:[#allocation9_spill] sm:$0xff] }
 0x290   : > { %v4913_v14 = vpop.permute.xlu1 %762  ;;  %1082 = vrot.lane.b32.xlu0 %v4172_v37, %s6070_s15 }
 0x291   : > { %6082 = vst [vmem:[#allocation72_spill] sm:$0xff] %v4911_v41  ;;  %3294 = vmatpush3.msra.mxu1 %v4911_v41  ;;  %3329 = vmatpush3.msra.mxu0 %v4911_v41  ;;  %v1073_v58 = vmax.f32 %v1009_v17, %v4584_v51  ;;  %v619_v59 = vmax.f32 %v555_v28, %v6088_v24 }
 0x292   : > { %1280 = vrot.lane.b32.xlu1 %v4183_v40, %s3984_s11  ;;  %v4922_v26 = vpop.permute.xlu0 %696  ;;  %3295 = vmatprep.subr.mxu1 %v6079_v56  ;;  %v553_v17 = vmax.f32 %v4157_v34, %v6092_v39  ;;  %v6100_v39 = vld [vmem:[#allocation36_spill] sm:$0xff] }
 0x293   : > { %3330 = vmatprep.subr.mxu0 %v6079_v56  ;;  %v1137_v51 = vmax.f32 %v1073_v58, %v6090_v8  ;;  %v683_v28 = vmax.f32 %v619_v59, %v6093_v13  ;;  %v6096_v58 = vld [vmem:[#allocation11_spill] sm:$0xff]  ;;  %v6098_v8 = vld [vmem:[#allocation14_spill] sm:$0xff] }
 0x294   : > { %v4927_v23 = vpop.permute.xlu1 %894  ;;  %1214 = vrot.lane.b32.xlu0 %v4198_v43, %s3983_s10  ;;  %v617_v24 = vmax.f32 %v553_v17, %v6096_v58  ;;  %v6102_v13 = vld [vmem:[#allocation18_spill] sm:$0xff] }
 0x296   : > { %1412 = vrot.lane.b32.xlu1 %v4213_v46, %s3987_s14  ;;  %v4934_v57 = vpop.permute.xlu0 %828 }
 0x298   : > { %v4937_v18 = vpop.permute.xlu1 %1026  ;;  %1346 = vrot.lane.b32.xlu0 %v4236_v49, %s3986_s19 }
 0x29a   : > { %1080 = vrot.lane.b32.xlu1 %v4148_v29, %s6070_s15  ;;  %v4944_v6 = vpop.permute.xlu0 %960 }
 0x29c   : > { %v4947_v21 = vpop.permute.xlu1 %1158  ;;  %1014 = vrot.lane.b32.xlu0 %v4153_v32, %s3980_s20 }
 0x29d   : > { %6083 = vst [vmem:[#allocation73_spill] sm:$0xff] %v4947_v21 }
 0x29e   : > { %1212 = vrot.lane.b32.xlu1 %v4157_v34, %s3983_s10  ;;  %v4954_v30 = vpop.permute.xlu0 %1092 }
 0x29f   : > { %6084 = vst [vmem:[#allocation74_spill] sm:$0xff] %v4954_v30 }
 0x2a0   : > { %v4957_v7 = vpop.permute.xlu1 %1290  ;;  %1146 = vrot.lane.b32.xlu0 %v4172_v37, %s3981_s16 }
 0x2a2   : > { %1344 = vrot.lane.b32.xlu1 %v4183_v40, %s3986_s19  ;;  %v4965_v33 = vpop.permute.xlu0 %1224 }
 0x2a4   : > { %v1423_v61 = vpop.permute.xlu1 %1422  ;;  %1278 = vrot.lane.b32.xlu0 %v4198_v43, %s3984_s11 }
 0x2a5   : > { %v4970_v45 = vmax.f32 %v1394_v53, %v1423_v61  ;;  %v6091_v53 = vld [vmem:[#allocation34_spill] sm:$0xff] }
 0x2a6   : > { %1078 = vrot.lane.b32.xlu1 %v4153_v32, %s6070_s15  ;;  %v1357_v27 = vpop.permute.xlu0 %1356 }
 0x2a7   : > { %6085 = vst [vmem:[#allocation75_spill] sm:$0xff] %v4970_v45  ;;  %3296 = vmatpush3.msra.mxu1 %v4970_v45  ;;  %3331 = vmatpush3.msra.mxu0 %v4970_v45  ;;  %v6099_v45 = vld [vmem:[#allocation20_spill] sm:$0xff] }
 0x2a8   : > { %v4976_v20 = vpop.permute.xlu1 %760  ;;  %1410 = vrot.lane.b32.xlu0 %v4236_v49, %s3987_s14  ;;  %3297 = vmatprep.subr.mxu1 %v6079_v56  ;;  %v620_v49 = vmax.f32 %v556_v62, %v6091_v53  ;;  %v6097_v62 = vld [vmem:[#allocation58_spill] sm:$0xff]  ;;  %v552_v53 = vmax.f32 %v4172_v37, %v6098_v8  ;;  %v554_v41 = vmax.f32 %v4198_v43, %v6099_v45  ;;  %v6105_v45 = vld [vmem:[#allocation8_spill] sm:$0xff] }
 0x2a9   : > { %3332 = vmatprep.subr.mxu0 %v6079_v56  ;;  %v1201_v22 = vmax.f32 %v1137_v51, %v6097_v62  ;;  %v747_v51 = vmax.f32 %v683_v28, %v6102_v13  ;;  %v6104_v62 = vld [vmem:[#allocation63_spill] sm:$0xff]  ;;  %v6109_v28 = vld [vmem:[#allocation37_spill] sm:$0xff] }
 0x2aa   : > { %1210 = vrot.lane.b32.xlu1 %v4172_v37, %s3983_s10  ;;  %v4987_v38 = vpop.permute.xlu0 %694  ;;  %v684_v12 = vmax.f32 %v620_v49, %v6100_v39  ;;  %v618_v58 = vmax.f32 %v554_v41, %v6103_v25  ;;  %v816_v8 = vmax.f32 %v752_v11, %v6104_v62  ;;  %v6106_v39 = vld [vmem:[#allocation10_spill] sm:$0xff]  ;;  %v6110_v11 = vld [vmem:[#allocation7_spill] sm:$0xff] }
 0x2ab   : > { %v1265_v17 = vmax.f32 %v1201_v22, %v4813_v31  ;;  %v681_v30 = vmax.f32 %v617_v24, %v6106_v39  ;;  %v6108_v31 = vld [vmem:[#allocation25_spill] sm:$0xff]  ;;  %v550_v25 = vmax.f32 %v4153_v32, %v6110_v11  ;;  %v6111_v24 = vld [vmem:[#allocation19_spill] sm:$0xff]  ;;  %v6119_v11 = vld [vmem:[#allocation66_spill] sm:$0xff] }
 0x2ac   : > { %v4989_v19 = vpop.permute.xlu1 %892  ;;  %1144 = vrot.lane.b32.xlu0 %v4148_v29, %s3981_s16  ;;  %v682_v22 = vmax.f32 %v618_v58, %v6108_v31  ;;  %v748_v13 = vmax.f32 %v684_v12, %v6109_v28  ;;  %v6113_v12 = vld [vmem:[#allocation12_spill] sm:$0xff]  ;;  %v6114_v31 = vld [vmem:[#allocation15_spill] sm:$0xff] }
 0x2ad   : > { %v1329_v5 = vmax.f32 %v1265_v17, %v4898_v63  ;;  %v6112_v63 = vld [vmem:[#allocation64_spill] sm:$0xff]  ;;  %v745_v58 = vmax.f32 %v681_v30, %v6113_v12 }
 0x2ae   : > { %1342 = vrot.lane.b32.xlu1 %v4198_v43, %s3986_s19  ;;  %v5001_v0 = vpop.permute.xlu0 %826  ;;  %v880_v17 = vmax.f32 %v816_v8, %v6112_v63 }
 0x2af   : > { %v1393_v62 = vmax.f32 %v1329_v5, %v1357_v27  ;;  %v6116_v27 = vld [vmem:[#allocation39_spill] sm:$0xff] }
 0x2b0   : > { %v5005_v47 = vpop.permute.xlu1 %1024  ;;  %1276 = vrot.lane.b32.xlu0 %v4157_v34, %s3984_s11 }
 0x2b2   : > { %1142 = vrot.lane.b32.xlu1 %v4153_v32, %s3981_s16  ;;  %v5013_v61 = vpop.permute.xlu0 %958 }
 0x2b4   : > { %v5019_v3 = vpop.permute.xlu1 %1156  ;;  %1408 = vrot.lane.b32.xlu0 %v4183_v40, %s3987_s14  ;;  %v551_v40 = vmax.f32 %v4148_v29, %v6101_v15  ;;  %v6107_v15 = vld [vmem:[#allocation13_spill] sm:$0xff] }
 0x2b5   : > { %6095 = vst [vmem:[#allocation35_spill] sm:$0xff] %v5019_v3  ;;  %v616_v21 = vmax.f32 %v552_v53, %v6107_v15 }
 0x2b6   : > { %1274 = vrot.lane.b32.xlu1 %v4172_v37, %s3984_s11  ;;  %v5032_v59 = vpop.permute.xlu0 %1090  ;;  %v615_v49 = vmax.f32 %v551_v40, %v6105_v45  ;;  %v811_v45 = vmax.f32 %v747_v51, %v6111_v24  ;;  %v812_v51 = vmax.f32 %v748_v13, %v6116_v27  ;;  %v6120_v24 = vld [vmem:[#allocation38_spill] sm:$0xff] }
 0x2b7   : > { %v680_v28 = vmax.f32 %v616_v21, %v6114_v31 }
 0x2b8   : > { %v5040_v3 = vpop.permute.xlu1 %1288  ;;  %1208 = vrot.lane.b32.xlu0 %v4148_v29, %s3983_s10  ;;  %v679_v40 = vmax.f32 %v615_v49, %v4848_v10  ;;  %v6115_v10 = vld [vmem:[#allocation22_spill] sm:$0xff]  ;;  %v809_v49 = vmax.f32 %v745_v58, %v4860_v35 }
 0x2b9   : > { %v746_v5 = vmax.f32 %v682_v22, %v6115_v10  ;;  %v6118_v22 = vld [vmem:[#allocation41_spill] sm:$0xff]  ;;  %v744_v35 = vmax.f32 %v680_v28, %v4838_v1 }
 0x2ba   : > { %1406 = vrot.lane.b32.xlu1 %v4198_v43, %s3987_s14  ;;  %v5052_v41 = vpop.permute.xlu0 %1222  ;;  %v614_v43 = vmax.f32 %v550_v25, %v4829_v2  ;;  %v743_v39 = vmax.f32 %v679_v40, %v4922_v26  ;;  %v6117_v26 = vld [vmem:[#allocation21_spill] sm:$0xff]  ;;  %v559_v13 = vmax.f32 %v4255_v52, %v6118_v22  ;;  %v944_v25 = vmax.f32 %v880_v17, %v6119_v11  ;;  %v6122_v17 = vld [vmem:[#allocation24_spill] sm:$0xff] }
 0x2bb   : > { %v875_v21 = vmax.f32 %v811_v45, %v6117_v26  ;;  %v876_v52 = vmax.f32 %v812_v51, %v6120_v24  ;;  %v6121_v45 = vld [vmem:[#allocation43_spill] sm:$0xff]  ;;  %v6127_v22 = vld [vmem:[#allocation44_spill] sm:$0xff] }
 0x2bc   : > { %v1421_v53 = vpop.permute.xlu1 %1420  ;;  %1340 = vrot.lane.b32.xlu0 %v4157_v34, %s3986_s19  ;;  %v678_v30 = vmax.f32 %v614_v43, %v4902_v60  ;;  %v807_v2 = vmax.f32 %v743_v39, %v4976_v20  ;;  %v873_v60 = vmax.f32 %v809_v49, %v4934_v57  ;;  %v623_v63 = vmax.f32 %v559_v13, %v6121_v45  ;;  %v6123_v43 = vld [vmem:[#allocation65_spill] sm:$0xff] }
 0x2bd   : > { %v5064_v15 = vmax.f32 %v1393_v62, %v1421_v53  ;;  %v810_v53 = vmax.f32 %v746_v5, %v6122_v17  ;;  %v939_v1 = vmax.f32 %v875_v21, %v4870_v44  ;;  %v808_v57 = vmax.f32 %v744_v35, %v4913_v14  ;;  %v6124_v44 = vld [vmem:[#allocation40_spill] sm:$0xff]  ;;  %v6125_v14 = vld [vmem:[#allocation42_spill] sm:$0xff] }
 0x2be   : > { %1272 = vrot.lane.b32.xlu1 %v4148_v29, %s3984_s11  ;;  %v5071_v8 = vpop.permute.xlu0 %1354  ;;  %v742_v20 = vmax.f32 %v678_v30, %v4987_v38  ;;  %v937_v38 = vmax.f32 %v873_v60, %v4989_v19  ;;  %v1008_v39 = vmax.f32 %v944_v25, %v6123_v43  ;;  %v940_v27 = vmax.f32 %v876_v52, %v6124_v44  ;;  %v6128_v35 = vld [vmem:[#allocation68_spill] sm:$0xff] }
 0x2bf   : > { %3298 = vmatpush3.msra.mxu1 %v5064_v15  ;;  %3333 = vmatpush3.msra.mxu0 %v5064_v15  ;;  %v874_v28 = vmax.f32 %v810_v53, %v4853_v16  ;;  %v1003_v10 = vmax.f32 %v939_v1, %v4944_v6  ;;  %v687_v51 = vmax.f32 %v623_v63, %v6125_v14  ;;  %v6126_v6 = vld [vmem:[#allocation67_spill] sm:$0xff]  ;;  %v6136_v44 = vld [vmem:[#allocation52_spill] sm:$0xff] }
 0x2c0   : > { %v825_v40 = vpop.permute.xlu1 %824  ;;  %1206 = vrot.lane.b32.xlu0 %v4153_v32, %s3983_s10  ;;  %3299 = vmatprep.subr.mxu1 %v6079_v56  ;;  %v1004_v26 = vmax.f32 %v940_v27, %v4864_v54 }
 0x2c1   : > { %v5088_v62 = vmax.f32 %v807_v2, %v825_v40  ;;  %3334 = vmatprep.subr.mxu0 %v6079_v56  ;;  %v938_v49 = vmax.f32 %v874_v28, %v4927_v23  ;;  %v1067_v30 = vmax.f32 %v1003_v10, %v5005_v47  ;;  %v751_v13 = vmax.f32 %v687_v51, %v6127_v22  ;;  %v6134_v28 = vld [vmem:[#allocation53_spill] sm:$0xff] }
 0x2c2   : > { %1404 = vrot.lane.b32.xlu1 %v4157_v34, %s3987_s14  ;;  %v759_v12 = vpop.permute.xlu0 %758  ;;  %v872_v34 = vmax.f32 %v808_v57, %v5001_v0  ;;  %v1072_v0 = vmax.f32 %v1008_v39, %v6126_v6  ;;  %v1068_v11 = vmax.f32 %v1004_v26, %v4937_v18 }
 0x2c3   : > { %v806_v58 = vmax.f32 %v742_v20, %v759_v12  ;;  %v1002_v23 = vmax.f32 %v938_v49, %v5013_v61  ;;  %v6129_v20 = vld [vmem:[#allocation45_spill] sm:$0xff] }
 0x2c4   : > { %v957_v31 = vpop.permute.xlu1 %956  ;;  %1338 = vrot.lane.b32.xlu0 %v4172_v37, %s3986_s19  ;;  %v1136_v54 = vmax.f32 %v1072_v0, %v6128_v35  ;;  %v5134_v61 = vmax.f32 %v1068_v11, %v5032_v59  ;;  %v815_v24 = vmax.f32 %v751_v13, %v6129_v20  ;;  %v6140_v13 = vld [vmem:[#allocation28_spill] sm:$0xff] }
 0x2c5   : > { %v5105_v5 = vmax.f32 %v937_v38, %v957_v31 }
 0x2c6   : > { %1336 = vrot.lane.b32.xlu1 %v4148_v29, %s3986_s19  ;;  %v891_v19 = vpop.permute.xlu0 %890  ;;  %v1200_v18 = vmax.f32 %v1136_v54, %v4819_v48  ;;  %v6132_v48 = vld [vmem:[#allocation51_spill] sm:$0xff] }
 0x2c7   : > { %v936_v2 = vmax.f32 %v872_v34, %v891_v19 }
 0x2c8   : > { %v1089_v16 = vpop.permute.xlu1 %1088  ;;  %1270 = vrot.lane.b32.xlu0 %v4153_v32, %s3984_s11  ;;  %v1264_v63 = vmax.f32 %v1200_v18, %v4884_v50 }
 0x2c9   : > { %v5122_v21 = vmax.f32 %v1067_v30, %v1089_v16  ;;  %v6137_v30 = vld [vmem:[#allocation49_spill] sm:$0xff]  ;;  %v6138_v16 = vld [vmem:[#allocation54_spill] sm:$0xff] }
 0x2ca   : > { %1334 = vrot.lane.b32.xlu1 %v4153_v32, %s3986_s19  ;;  %v1023_v47 = vpop.permute.xlu0 %1022  ;;  %v1328_v12 = vmax.f32 %v1264_v63, %v4957_v7  ;;  %v6143_v63 = vld [vmem:[#allocation57_spill] sm:$0xff] }
 0x2cb   : > { %v1066_v25 = vmax.f32 %v1002_v23, %v1023_v47  ;;  %v6139_v23 = vld [vmem:[#allocation26_spill] sm:$0xff] }
 0x2cc   : > { %v5128_v40 = vpop.permute.xlu1 %1220  ;;  %1402 = vrot.lane.b32.xlu0 %v4172_v37, %s3987_s14  ;;  %v6130_v37 = vld [vmem:[#allocation50_spill] sm:$0xff]  ;;  %v1392_v38 = vmax.f32 %v1328_v12, %v5071_v8  ;;  %v6135_v8 = vld [vmem:[#allocation48_spill] sm:$0xff]  ;;  %v557_v47 = vmax.f32 %v4213_v46, %v6139_v23 }
 0x2cd   : > { %v558_v59 = vmax.f32 %v4278_v55, %v6130_v37  ;;  %v6142_v37 = vld [vmem:[#allocation27_spill] sm:$0xff] }
 0x2ce   : > { %1398 = vrot.lane.b32.xlu1 %v4153_v32, %s3987_s14  ;;  %v5138_v60 = vpop.permute.xlu0 %1154  ;;  %v6131_v32 = vld [vmem:[#allocation47_spill] sm:$0xff]  ;;  %v621_v11 = vmax.f32 %v557_v47, %v6140_v13  ;;  %v6150_v13 = vld [vmem:[#allocation33_spill] sm:$0xff] }
 0x2cf   : > { %v1196_v52 = vmax.f32 %v5134_v61, %v5138_v60  ;;  %v879_v53 = vmax.f32 %v815_v24, %v6131_v32  ;;  %v622_v57 = vmax.f32 %v558_v59, %v6132_v48  ;;  %v6144_v48 = vld [vmem:[#allocation29_spill] sm:$0xff] }
 0x2d0   : > { %v1353_v45 = vpop.permute.xlu1 %1352  ;;  %1400 = vrot.lane.b32.xlu0 %v4148_v29, %s3987_s14  ;;  %v6133_v29 = vld [vmem:[#allocation46_spill] sm:$0xff]  ;;  %v685_v59 = vmax.f32 %v621_v11, %v6142_v37  ;;  %v6153_v37 = vld [vmem:[#allocation35_spill] sm:$0xff] }
 0x2d1   : > { %v943_v31 = vmax.f32 %v879_v53, %v6133_v29  ;;  %v686_v55 = vmax.f32 %v622_v57, %v6134_v28 }
 0x2d2   : > { %v5149_v17 = vpop.permute.xlu0 %1286  ;;  %v749_v57 = vmax.f32 %v685_v59, %v6144_v48 }
 0x2d3   : > { %v750_v27 = vmax.f32 %v686_v55, %v6136_v44  ;;  %v6148_v44 = vld [vmem:[#allocation32_spill] sm:$0xff] }
 0x2d4   : > { %v823_v1 = vpop.permute.xlu1 %822 }
 0x2d5   : > { %v5155_v43 = vmax.f32 %v806_v58, %v823_v1  ;;  %v1007_v58 = vmax.f32 %v943_v31, %v6135_v8  ;;  %v814_v6 = vmax.f32 %v750_v27, %v6138_v16  ;;  %v6146_v31 = vld [vmem:[#allocation30_spill] sm:$0xff] }
 0x2d6   : > { %v1419_v39 = vpop.permute.xlu0 %1418  ;;  %v813_v28 = vmax.f32 %v749_v57, %v6146_v31 }
 0x2d7   : > { %v5159_v10 = vmax.f32 %v1392_v38, %v1419_v39 }
 0x2d8   : > { %v955_v50 = vpop.permute.xlu1 %954  ;;  %v877_v27 = vmax.f32 %v813_v28, %v6148_v44 }
 0x2d9   : > { %v5161_v34 = vmax.f32 %v936_v2, %v955_v50  ;;  %3300 = vmatpush3.msra.mxu1 %v5159_v10  ;;  %3335 = vmatpush3.msra.mxu0 %v5159_v10  ;;  %v1071_v2 = vmax.f32 %v1007_v58, %v6137_v30 }
 0x2da   : > { %v889_v7 = vpop.permute.xlu0 %888  ;;  %3301 = vmatprep.subr.mxu1 %v6079_v56  ;;  %3336 = vmatprep.subr.mxu0 %v6079_v56 }
 0x2db   : > { %v935_v14 = vmax.f32 %v5088_v62, %v889_v7  ;;  %v1135_v22 = vmax.f32 %v1071_v2, %v4804_v36 }
 0x2dc   : > { %v1087_v51 = vpop.permute.xlu1 %1086 }
 0x2dd   : > { %v5170_v19 = vmax.f32 %v1066_v25, %v1087_v51  ;;  %v6141_v25 = vld [vmem:[#allocation55_spill] sm:$0xff]  ;;  %v1199_v54 = vmax.f32 %v1135_v22, %v4890_v4  ;;  %v6145_v4 = vld [vmem:[#allocation56_spill] sm:$0xff] }
 0x2de   : > { %v5172_v49 = vpop.permute.xlu0 %1020  ;;  %v878_v35 = vmax.f32 %v814_v6, %v6141_v25  ;;  %v6149_v6 = vld [vmem:[#allocation31_spill] sm:$0xff] }
 0x2df   : > { %v1065_v0 = vmax.f32 %v5105_v5, %v5172_v49  ;;  %v1263_v24 = vmax.f32 %v1199_v54, %v4965_v33  ;;  %v941_v23 = vmax.f32 %v877_v27, %v6149_v6  ;;  %v6152_v54 = vld [vmem:[#allocation74_spill] sm:$0xff] }
 0x2e0   : > { %v5178_v26 = vpop.permute.xlu1 %1218  ;;  %v942_v32 = vmax.f32 %v878_v35, %v6143_v63 }
 0x2e1   : > { %v1327_v46 = vmax.f32 %v1263_v24, %v5040_v3  ;;  %v1005_v11 = vmax.f32 %v941_v23, %v6150_v13  ;;  %v1260_v28 = vmax.f32 %v1196_v52, %v5178_v26 }
 0x2e2   : > { %v5183_v62 = vpop.permute.xlu0 %1152  ;;  %v1006_v38 = vmax.f32 %v942_v32, %v6145_v4 }
 0x2e3   : > { %v1391_v36 = vmax.f32 %v1327_v46, %v1353_v45  ;;  %v1195_v61 = vmax.f32 %v5122_v21, %v5183_v62 }
 0x2e4   : > { %v1351_v20 = vpop.permute.xlu1 %1350  ;;  %v1070_v29 = vmax.f32 %v1006_v38, %v4810_v42  ;;  %v6147_v42 = vld [vmem:[#allocation73_spill] sm:$0xff] }
 0x2e6   : > { %v1285_v18 = vpop.permute.xlu0 %1284  ;;  %v1134_v55 = vmax.f32 %v1070_v29, %v4874_v9 }
 0x2e8   : > { %v5192_v53 = vpop.permute.xlu1 %886  ;;  %v1198_v8 = vmax.f32 %v1134_v55, %v6147_v42 }
 0x2e9   : > { %v934_v12 = vmax.f32 %v5155_v43, %v5192_v53 }
 0x2ea   : > { %v1417_v1 = vpop.permute.xlu0 %1416  ;;  %v1262_v51 = vmax.f32 %v1198_v8, %v5052_v41  ;;  %v6151_v41 = vld [vmem:[#allocation71_spill] sm:$0xff] }
 0x2eb   : > { %v5198_v39 = vmax.f32 %v1391_v36, %v1417_v1 }
 0x2ec   : > { %v5200_v33 = vpop.permute.xlu1 %1018  ;;  %v1326_v2 = vmax.f32 %v1262_v51, %v5149_v17  ;;  %v1069_v17 = vmax.f32 %v1005_v11, %v6151_v41 }
 0x2ed   : > { %v1064_v3 = vmax.f32 %v5161_v34, %v5200_v33  ;;  %3302 = vmatpush3.msra.mxu1 %v5198_v39  ;;  %3337 = vmatpush3.msra.mxu0 %v5198_v39 }
 0x2ee   : > { %v953_v45 = vpop.permute.xlu0 %952  ;;  %3303 = vmatprep.subr.mxu1 %v6079_v56  ;;  %3338 = vmatprep.subr.mxu0 %v6079_v56  ;;  %v1390_v47 = vmax.f32 %v1326_v2, %v1351_v20  ;;  %v1133_v20 = vmax.f32 %v1069_v17, %v6152_v54 }
 0x2ef   : > { %v5211_v50 = vmax.f32 %v935_v14, %v953_v45 }
 0x2f0   : > { %v5213_v7 = vpop.permute.xlu1 %1150  ;;  %v1197_v59 = vmax.f32 %v1133_v20, %v6153_v37 }
 0x2f2   : > { %v5216_v58 = vpop.permute.xlu0 %1084  ;;  %v1261_v32 = vmax.f32 %v1197_v59, %v5128_v40 }
 0x2f4   : > { %v1283_v30 = vpop.permute.xlu1 %1282  ;;  %v1325_v36 = vmax.f32 %v1261_v32, %v1285_v18 }
 0x2f5   : > { %v1324_v42 = vmax.f32 %v1260_v28, %v1283_v30 }
 0x2f6   : > { %v1217_v16 = vpop.permute.xlu0 %1216 }
 0x2f7   : > { %v1259_v52 = vmax.f32 %v1195_v61, %v1217_v16  ;;  %v6154_v61 = vld [vmem:[#allocation69_spill] sm:$0xff] }
 0x2f8   : > { %v1415_v9 = vpop.permute.xlu1 %1414 }
 0x2f9   : > { %v5222_v14 = vmax.f32 %v1390_v47, %v1415_v9  ;;  %v1194_v47 = vmax.f32 %v5170_v19, %v5213_v7  ;;  %v1129_v19 = vmax.f32 %v1065_v0, %v5216_v58 }
 0x2fa   : > { %v1349_v22 = vpop.permute.xlu0 %1348 }
 0x2fb   : > { %3304 = vmatpush3.msra.mxu1 %v5222_v14  ;;  %3339 = vmatpush3.msra.mxu0 %v5222_v14  ;;  %v1389_v48 = vmax.f32 %v1325_v36, %v1349_v22 }
 0x2fc   : > { %v5227_v25 = vpop.permute.xlu1 %1016  ;;  %3305 = vmatprep.subr.mxu1 %v6079_v56  ;;  %3340 = vmatprep.subr.mxu0 %v6079_v56 }
 0x2fe   : > { %v5232_v35 = vpop.permute.xlu0 %950 }
 0x2ff   : > { %v998_v0 = vmax.f32 %v934_v12, %v5232_v35 }
 0x300   : > { %v1149_v24 = vpop.permute.xlu1 %1148 }
 0x301   : > { %v1193_v16 = vmax.f32 %v1129_v19, %v1149_v24  ;;  %v2937_v19 = vld [vmem:[%s5992_s3 + $0x58] sm:$0xff] }
 0x302   : > { %v5236_v63 = vpop.permute.xlu0 %1082 }
 0x303   : > { %v1128_v58 = vmax.f32 %v1064_v3, %v5236_v63 }
 0x304   : > { %v1281_v46 = vpop.permute.xlu1 %1280 }
 0x305   : > { %v1323_v30 = vmax.f32 %v1259_v52, %v1281_v46  ;;  %v6156_v52 = vld [vmem:[#allocation72_spill] sm:$0xff] }
 0x306   : > { %v1215_v1 = vpop.permute.xlu0 %1214 }
 0x307   : > { %v1258_v13 = vmax.f32 %v1194_v47, %v1215_v1  ;;  %v1063_v1 = vmax.f32 %v5211_v50, %v5227_v25  ;;  %v2930_v47 = vld [vmem:[%s5992_s3 + $0x20] sm:$0xff] }
 0x308   : > { %v1413_v57 = vpop.permute.xlu1 %1412 }
 0x309   : > { %v5239_v4 = vmax.f32 %v1389_v48, %v1413_v57 }
 0x30a   : > { %v1347_v38 = vpop.permute.xlu0 %1346 }
 0x30b   : > { %3306 = vmatpush3.msra.mxu1 %v5239_v4  ;;  %3341 = vmatpush3.msra.mxu0 %v5239_v4  ;;  %v1388_v44 = vmax.f32 %v1324_v42, %v1347_v38 }
 0x30c   : > { %v5243_v29 = vpop.permute.xlu1 %1080  ;;  %3307 = vmatprep.subr.mxu1 %v6079_v56  ;;  %3342 = vmatprep.subr.mxu0 %v6079_v56 }
 0x30d   : > { %v1127_v34 = vmax.f32 %v1063_v1, %v5243_v29 }
 0x30e   : > { %v5247_v45 = vpop.permute.xlu0 %1014 }
 0x30f   : > { %v1062_v48 = vmax.f32 %v998_v0, %v5247_v45 }
 0x310   : > { %v1213_v40 = vpop.permute.xlu1 %1212 }
 0x311   : > { %v1257_v37 = vmax.f32 %v1193_v16, %v1213_v40 }
 0x312   : > { %v5249_v18 = vpop.permute.xlu0 %1146 }
 0x313   : > { %v1192_v57 = vmax.f32 %v1128_v58, %v5249_v18 }
 0x314   : > { %v1345_v31 = vpop.permute.xlu1 %1344 }
 0x315   : > { %v1387_v9 = vmax.f32 %v1323_v30, %v1345_v31  ;;  %v2928_v30 = vld [vmem:[%s5992_s3 + $0x10] sm:$0xff] }
 0x316   : > { %v1279_v55 = vpop.permute.xlu0 %1278 }
 0x317   : > { %v1322_v17 = vmax.f32 %v1258_v13, %v1279_v55  ;;  %v2933_v13 = vld [vmem:[%s5992_s3 + $0x38] sm:$0xff] }
 0x318   : > { %v1079_v8 = vpop.permute.xlu1 %1078 }
 0x319   : > { %v1126_v53 = vmax.f32 %v1062_v48, %v1079_v8 }
 0x31a   : > { %v1411_v27 = vpop.permute.xlu0 %1410 }
 0x31b   : > { %v5255_v51 = vmax.f32 %v1388_v44, %v1411_v27 }
 0x31c   : > { %v1211_v2 = vpop.permute.xlu1 %1210 }
 0x31d   : > { %3308 = vmatpush3.msra.mxu1 %v5255_v51  ;;  %3343 = vmatpush3.msra.mxu0 %v5255_v51  ;;  %v1256_v12 = vmax.f32 %v1192_v57, %v1211_v2  ;;  %v1462_v2 = vld [vmem:[%s5992_s3] sm:$0xff] }
 0x31e   : > { %v1145_v6 = vpop.permute.xlu0 %1144  ;;  %3309 = vmatprep.subr.mxu1 %v6079_v56  ;;  %3344 = vmatprep.subr.mxu0 %v6079_v56 }
 0x31f   : > { %v1191_v3 = vmax.f32 %v1127_v34, %v1145_v6  ;;  %v2927_v6 = vld [vmem:[%s5992_s3 + $0x8] sm:$0xff] }
 0x320   : > { %v1343_v60 = vpop.permute.xlu1 %1342 }
 0x321   : > { %v1386_v62 = vmax.f32 %v1322_v17, %v1343_v60  ;;  %v6155_v60 = vld [vmem:[#allocation70_spill] sm:$0xff]  ;;  %v2935_v17 = vld [vmem:[%s5992_s3 + $0x48] sm:$0xff] }
 0x322   : > { %v1277_v26 = vpop.permute.xlu0 %1276 }
 0x323   : > { %v1321_v32 = vmax.f32 %v1257_v37, %v1277_v26  ;;  %v6157_v26 = vld [vmem:[#allocation75_spill] sm:$0xff] }
 0x324   : > { %v1143_v23 = vpop.permute.xlu1 %1142  ;;  %v2938_v37 = vld [vmem:[%s5992_s3 + $0x60] sm:$0xff] }
 0x325   : > { %v1190_v50 = vmax.f32 %v1126_v53, %v1143_v23  ;;  %v2929_v23 = vld [vmem:[%s5992_s3 + $0x18] sm:$0xff] }
 0x326   : > { %v1409_v22 = vpop.permute.xlu0 %1408 }
 0x327   : > { %v5265_v11 = vmax.f32 %v1387_v9, %v1409_v22  ;;  %v2931_v9 = vld [vmem:[%s5992_s3 + $0x28] sm:$0xff]  ;;  %v2932_v22 = vld [vmem:[%s5992_s3 + $0x30] sm:$0xff] }
 0x328   : > { %v1275_v41 = vpop.permute.xlu1 %1274 }
 0x329   : > { %3310 = vmatpush3.msra.mxu1 %v5265_v11  ;;  %3345 = vmatpush3.msra.mxu0 %v5265_v11  ;;  %v1320_v25 = vmax.f32 %v1256_v12, %v1275_v41  ;;  %v2934_v41 = vld [vmem:[%s5992_s3 + $0x40] sm:$0xff] }
 0x32a   : > { %v1209_v21 = vpop.permute.xlu0 %1208  ;;  %3311 = vmatprep.subr.mxu1 %v6079_v56  ;;  %3346 = vmatprep.subr.mxu0 %v6079_v56 }
 0x32b   : > { %v1255_v63 = vmax.f32 %v1191_v3, %v1209_v21  ;;  %v2936_v21 = vld [vmem:[%s5992_s3 + $0x50] sm:$0xff] }
 0x32c   : > { %v1407_v7 = vpop.permute.xlu1 %1406 }
 0x32d   : > { %v5275_v54 = vmax.f32 %v1386_v62, %v1407_v7 }
 0x32e   : > { %v1341_v20 = vpop.permute.xlu0 %1340 }
 0x32f   : > { %3312 = vmatpush3.msra.mxu1 %v5275_v54  ;;  %3347 = vmatpush3.msra.mxu0 %v5275_v54  ;;  %v1385_v5 = vmax.f32 %v1321_v32, %v1341_v20 }
 0x330   : > { %v1273_v59 = vpop.permute.xlu1 %1272  ;;  %3313 = vmatprep.subr.mxu1 %v6079_v56  ;;  %3348 = vmatprep.subr.mxu0 %v6079_v56 }
 0x331   : > { %v1319_v18 = vmax.f32 %v1255_v63, %v1273_v59  ;;  %v2939_v59 = vld [vmem:[%s5992_s3 + $0x68] sm:$0xff] }
 0x332   : > { %v1207_v46 = vpop.permute.xlu0 %1206  ;;  %v2735_v63 = vld [vmem:[%s5993_s4 + $0xe8] sm:$0xff] }
 0x333   : > { %v1254_v38 = vmax.f32 %v1190_v50, %v1207_v46 }
 0x334   : > { %v1405_v49 = vpop.permute.xlu1 %1404 }
 0x335   : > { %v5289_v24 = vmax.f32 %v1385_v5, %v1405_v49 }
 0x336   : > { %v1339_v36 = vpop.permute.xlu0 %1338 }
 0x337   : > { %3314 = vmatpush3.msra.mxu1 %v5289_v24  ;;  %3349 = vmatpush3.msra.mxu0 %v5289_v24  ;;  %v1384_v45 = vmax.f32 %v1320_v25, %v1339_v36  ;;  %v2737_v25 = vld [vmem:[%s5993_s4 + $0xf8] sm:$0xff] }
 0x338   : > { %v1337_v43 = vpop.permute.xlu1 %1336  ;;  %3315 = vmatprep.subr.mxu1 %v6079_v56  ;;  %3350 = vmatprep.subr.mxu0 %v6079_v56 }
 0x339   : > { %v1383_v55 = vmax.f32 %v1319_v18, %v1337_v43  ;;  %v2731_v18 = vld [vmem:[%s5993_s4 + $0xc8] sm:$0xff] }
 0x33a   : > { %v1271_v33 = vpop.permute.xlu0 %1270 }
 0x33b   : > { %v1318_v31 = vmax.f32 %v1254_v38, %v1271_v33  ;;  %v2734_v38 = vld [vmem:[%s5993_s4 + $0xe0] sm:$0xff] }
 0x33c   : > { %v1335_v35 = vpop.permute.xlu1 %1334 }
 0x33d   : > { %v1382_v8 = vmax.f32 %v1318_v31, %v1335_v35  ;;  %v2736_v35 = vld [vmem:[%s5993_s4 + $0xf0] sm:$0xff]  ;;  %v2730_v31 = vld [vmem:[%s5993_s4 + $0xc0] sm:$0xff] }
 0x33e   : > { %v1403_v40 = vpop.permute.xlu0 %1402 }
 0x33f   : > { %v5300_v28 = vmax.f32 %v1384_v45, %v1403_v40  ;;  %v2733_v45 = vld [vmem:[%s5993_s4 + $0xd8] sm:$0xff]  ;;  %v2732_v40 = vld [vmem:[%s5993_s4 + $0xd0] sm:$0xff] }
 0x340   : > { %v1399_v29 = vpop.permute.xlu1 %1398 }
 0x341   : > { %3316 = vmatpush3.msra.mxu1 %v5300_v28  ;;  %3351 = vmatpush3.msra.mxu0 %v5300_v28  ;;  %v5308_v27 = vmax.f32 %v1382_v8, %v1399_v29  ;;  %v2727_v29 = vld [vmem:[%s5993_s4 + $0xa8] sm:$0xff] }
 0x342   : > { %v1401_v42 = vpop.permute.xlu0 %1400  ;;  %3317 = vmatprep.subr.mxu1 %v6079_v56  ;;  %3352 = vmatprep.subr.mxu0 %v6079_v56 }
 0x343   : > { %v5306_v44 = vmax.f32 %v1383_v55, %v1401_v42  ;;  %v2728_v55 = vld [vmem:[%s5993_s4 + $0xb0] sm:$0xff]  ;;  %v2726_v42 = vld [vmem:[%s5993_s4 + $0xa0] sm:$0xff] }
 0x345   : > { %3318 = vmatpush3.msra.mxu1 %v5306_v44  ;;  %3353 = vmatpush3.msra.mxu0 %v5306_v44 }
 0x346   : > { %3319 = vmatprep.subr.mxu1 %v6079_v56  ;;  %3354 = vmatprep.subr.mxu0 %v6079_v56 }
 0x347   : > { %3320 = vmatpush3.msra.mxu1 %v5308_v27  ;;  %3355 = vmatpush3.msra.mxu0 %v5308_v27 }
 0x348   : > { %3322 = vmatmul.mubr.f32.vlgmr.msra.gmra.mxu1 %v1462_v2  ;;  %3357 = vmatmul.mubr.f32.vlgmr.msra.gmra.mxu0 %v2927_v6  ;;  %v2724_v2 = vld [vmem:[%s5993_s4 + $0x90] sm:$0xff] }
 0x349   : > { %3359 = vmatprep.subr.mxu1 %v6079_v56  ;;  %3394 = vmatprep.subr.mxu0 %v6079_v56 }
 0x34a   : > { %3360 = vmatpush3.msra.mxu1 %v6154_v61  ;;  %3395 = vmatpush3.msra.mxu0 %v6154_v61 }
 0x34b   : > { %3361 = vmatprep.subr.mxu1 %v6079_v56  ;;  %3396 = vmatprep.subr.mxu0 %v6079_v56 }
 0x34c   : > { %3362 = vmatpush3.msra.mxu1 %v6155_v60  ;;  %3397 = vmatpush3.msra.mxu0 %v6155_v60 }
 0x34d   : > { %3363 = vmatprep.subr.mxu1 %v6079_v56  ;;  %3398 = vmatprep.subr.mxu0 %v6079_v56 }
 0x34e   : > { %3364 = vmatpush3.msra.mxu1 %v6156_v52  ;;  %3399 = vmatpush3.msra.mxu0 %v6156_v52 }
 0x34f   : > { %3365 = vmatprep.subr.mxu1 %v6079_v56  ;;  %3400 = vmatprep.subr.mxu0 %v6079_v56 }
 0x350   : > { %3366 = vmatpush3.msra.mxu1 %v6157_v26  ;;  %3401 = vmatpush3.msra.mxu0 %v6157_v26 }
 0x351   : > { %3367 = vmatprep.subr.mxu1 %v6079_v56  ;;  %3402 = vmatprep.subr.mxu0 %v6079_v56 }
 0x352   : > { %3368 = vmatpush3.msra.mxu1 %v5064_v15  ;;  %3403 = vmatpush3.msra.mxu0 %v5064_v15 }
 0x353   : > { %3369 = vmatprep.subr.mxu1 %v6079_v56  ;;  %3404 = vmatprep.subr.mxu0 %v6079_v56 }
 0x354   : > { %3370 = vmatpush3.msra.mxu1 %v5159_v10  ;;  %3405 = vmatpush3.msra.mxu0 %v5159_v10 }
 0x355   : > { %3371 = vmatprep.subr.mxu1 %v6079_v56  ;;  %3406 = vmatprep.subr.mxu0 %v6079_v56 }
 0x356   : > { %3372 = vmatpush3.msra.mxu1 %v5198_v39  ;;  %3407 = vmatpush3.msra.mxu0 %v5198_v39 }
 0x357   : > { %3373 = vmatprep.subr.mxu1 %v6079_v56  ;;  %3408 = vmatprep.subr.mxu0 %v6079_v56 }
 0x358   : > { %3374 = vmatpush3.msra.mxu1 %v5222_v14  ;;  %3409 = vmatpush3.msra.mxu0 %v5222_v14 }
 0x359   : > { %3375 = vmatprep.subr.mxu1 %v6079_v56  ;;  %3410 = vmatprep.subr.mxu0 %v6079_v56 }
 0x35a   : > { %3376 = vmatpush3.msra.mxu1 %v5239_v4  ;;  %3411 = vmatpush3.msra.mxu0 %v5239_v4 }
 0x35b   : > { %3377 = vmatprep.subr.mxu1 %v6079_v56  ;;  %3412 = vmatprep.subr.mxu0 %v6079_v56 }
 0x35c   : > { %3378 = vmatpush3.msra.mxu1 %v5255_v51  ;;  %3413 = vmatpush3.msra.mxu0 %v5255_v51 }
 0x35d   : > { %3379 = vmatprep.subr.mxu1 %v6079_v56  ;;  %3414 = vmatprep.subr.mxu0 %v6079_v56 }
 0x35e   : > { %3380 = vmatpush3.msra.mxu1 %v5265_v11  ;;  %3415 = vmatpush3.msra.mxu0 %v5265_v11 }
 0x35f   : > { %3381 = vmatprep.subr.mxu1 %v6079_v56  ;;  %3416 = vmatprep.subr.mxu0 %v6079_v56 }
 0x360   : > { %3382 = vmatpush3.msra.mxu1 %v5275_v54  ;;  %3417 = vmatpush3.msra.mxu0 %v5275_v54 }
 0x361   : > { %3383 = vmatprep.subr.mxu1 %v6079_v56  ;;  %3418 = vmatprep.subr.mxu0 %v6079_v56 }
 0x362   : > { %3384 = vmatpush3.msra.mxu1 %v5289_v24  ;;  %3419 = vmatpush3.msra.mxu0 %v5289_v24 }
 0x363   : > { %3385 = vmatprep.subr.mxu1 %v6079_v56  ;;  %3420 = vmatprep.subr.mxu0 %v6079_v56 }
 0x364   : > { %3386 = vmatpush3.msra.mxu1 %v5300_v28  ;;  %3421 = vmatpush3.msra.mxu0 %v5300_v28 }
 0x365   : > { %3387 = vmatprep.subr.mxu1 %v6079_v56  ;;  %3422 = vmatprep.subr.mxu0 %v6079_v56 }
 0x366   : > { %3388 = vmatpush3.msra.mxu1 %v5306_v44  ;;  %3423 = vmatpush3.msra.mxu0 %v5306_v44 }
 0x367   : > { %3389 = vmatprep.subr.mxu1 %v6079_v56  ;;  %3424 = vmatprep.subr.mxu0 %v6079_v56 }
 0x368   : > { %3390 = vmatpush3.msra.mxu1 %v5308_v27  ;;  %3391 = vmatprep.mubr.msk.f32.mxu1 %vm3988_vm1, %v6079_v56 }
 0x369   : > { %3425 = vmatpush3.msra.mxu0 %v5308_v27  ;;  %3426 = vmatprep.mubr.msk.f32.mxu0 %vm3988_vm1, %v6079_v56 }
 0x36a   : > { %3392 = vmatmul.mubr.f32.vlgmr.msra.gmra.mxu1 %v2928_v30  ;;  %3427 = vmatmul.mubr.f32.vlgmr.msra.gmra.mxu0 %v2929_v23  ;;  %v2720_v30 = vld [vmem:[%s5993_s4 + $0x70] sm:$0xff]  ;;  %v2719_v23 = vld [vmem:[%s5993_s4 + $0x68] sm:$0xff] }
 0x36b   : > { %3429 = vmatprep.subr.mxu1 %v6079_v56  ;;  %3464 = vmatprep.subr.mxu0 %v6079_v56 }
 0x36c   : > { %3430 = vmatpush3.msra.mxu1 %v6154_v61  ;;  %3465 = vmatpush3.msra.mxu0 %v6154_v61 }
 0x36d   : > { %3431 = vmatprep.subr.mxu1 %v6079_v56  ;;  %3466 = vmatprep.subr.mxu0 %v6079_v56 }
 0x36e   : > { %3432 = vmatpush3.msra.mxu1 %v6155_v60  ;;  %3467 = vmatpush3.msra.mxu0 %v6155_v60 }
 0x36f   : > { %3433 = vmatprep.subr.mxu1 %v6079_v56  ;;  %3468 = vmatprep.subr.mxu0 %v6079_v56 }
 0x370   : > { %3434 = vmatpush3.msra.mxu1 %v6156_v52  ;;  %3469 = vmatpush3.msra.mxu0 %v6156_v52 }
 0x371   : > { %3435 = vmatprep.subr.mxu1 %v6079_v56  ;;  %3470 = vmatprep.subr.mxu0 %v6079_v56 }
 0x372   : > { %3436 = vmatpush3.msra.mxu1 %v6157_v26  ;;  %3471 = vmatpush3.msra.mxu0 %v6157_v26 }
 0x373   : > { %3437 = vmatprep.subr.mxu1 %v6079_v56  ;;  %3472 = vmatprep.subr.mxu0 %v6079_v56 }
 0x374   : > { %3438 = vmatpush3.msra.mxu1 %v5064_v15  ;;  %3473 = vmatpush3.msra.mxu0 %v5064_v15 }
 0x375   : > { %3439 = vmatprep.subr.mxu1 %v6079_v56  ;;  %3474 = vmatprep.subr.mxu0 %v6079_v56 }
 0x376   : > { %3440 = vmatpush3.msra.mxu1 %v5159_v10  ;;  %3475 = vmatpush3.msra.mxu0 %v5159_v10 }
 0x377   : > { %3441 = vmatprep.subr.mxu1 %v6079_v56  ;;  %3476 = vmatprep.subr.mxu0 %v6079_v56 }
 0x378   : > { %3442 = vmatpush3.msra.mxu1 %v5198_v39  ;;  %3477 = vmatpush3.msra.mxu0 %v5198_v39 }
 0x379   : > { %3443 = vmatprep.subr.mxu1 %v6079_v56  ;;  %3478 = vmatprep.subr.mxu0 %v6079_v56 }
 0x37a   : > { %3444 = vmatpush3.msra.mxu1 %v5222_v14  ;;  %3479 = vmatpush3.msra.mxu0 %v5222_v14 }
 0x37b   : > { %3445 = vmatprep.subr.mxu1 %v6079_v56  ;;  %3480 = vmatprep.subr.mxu0 %v6079_v56 }
 0x37c   : > { %3446 = vmatpush3.msra.mxu1 %v5239_v4  ;;  %3481 = vmatpush3.msra.mxu0 %v5239_v4 }
 0x37d   : > { %3447 = vmatprep.subr.mxu1 %v6079_v56  ;;  %3482 = vmatprep.subr.mxu0 %v6079_v56 }
 0x37e   : > { %3448 = vmatpush3.msra.mxu1 %v5255_v51  ;;  %3483 = vmatpush3.msra.mxu0 %v5255_v51 }
 0x37f   : > { %3449 = vmatprep.subr.mxu1 %v6079_v56  ;;  %3484 = vmatprep.subr.mxu0 %v6079_v56 }
 0x380   : > { %3450 = vmatpush3.msra.mxu1 %v5265_v11  ;;  %3485 = vmatpush3.msra.mxu0 %v5265_v11 }
 0x381   : > { %3451 = vmatprep.subr.mxu1 %v6079_v56  ;;  %3486 = vmatprep.subr.mxu0 %v6079_v56 }
 0x382   : > { %3452 = vmatpush3.msra.mxu1 %v5275_v54  ;;  %3487 = vmatpush3.msra.mxu0 %v5275_v54 }
 0x383   : > { %3453 = vmatprep.subr.mxu1 %v6079_v56  ;;  %3488 = vmatprep.subr.mxu0 %v6079_v56 }
 0x384   : > { %3454 = vmatpush3.msra.mxu1 %v5289_v24  ;;  %3489 = vmatpush3.msra.mxu0 %v5289_v24 }
 0x385   : > { %3455 = vmatprep.subr.mxu1 %v6079_v56  ;;  %3490 = vmatprep.subr.mxu0 %v6079_v56 }
 0x386   : > { %3456 = vmatpush3.msra.mxu1 %v5300_v28  ;;  %3491 = vmatpush3.msra.mxu0 %v5300_v28 }
 0x387   : > { %3457 = vmatprep.subr.mxu1 %v6079_v56  ;;  %3492 = vmatprep.subr.mxu0 %v6079_v56 }
 0x388   : > { %3458 = vmatpush3.msra.mxu1 %v5306_v44  ;;  %3493 = vmatpush3.msra.mxu0 %v5306_v44 }
 0x389   : > { %3459 = vmatprep.subr.mxu1 %v6079_v56  ;;  %3494 = vmatprep.subr.mxu0 %v6079_v56 }
 0x38a   : > { %3460 = vmatpush3.msra.mxu1 %v5308_v27  ;;  %3461 = vmatprep.mubr.msk.f32.mxu1 %vm3988_vm1, %v6079_v56 }
 0x38b   : > { %3495 = vmatpush3.msra.mxu0 %v5308_v27  ;;  %3496 = vmatprep.mubr.msk.f32.mxu0 %vm3988_vm1, %v6079_v56 }
 0x38c   : > { %3462 = vmatmul.mubr.f32.vlgmr.msra.gmra.mxu1 %v2930_v47  ;;  %3497 = vmatmul.mubr.f32.vlgmr.msra.gmra.mxu0 %v2931_v9  ;;  %v2718_v47 = vld [vmem:[%s5993_s4 + $0x60] sm:$0xff]  ;;  %v2717_v9 = vld [vmem:[%s5993_s4 + $0x58] sm:$0xff] }
 0x38d   : > { %3499 = vmatprep.subr.mxu1 %v6079_v56  ;;  %3534 = vmatprep.subr.mxu0 %v6079_v56 }
 0x38e   : > { %3500 = vmatpush3.msra.mxu1 %v6154_v61  ;;  %3535 = vmatpush3.msra.mxu0 %v6154_v61 }
 0x38f   : > { %3501 = vmatprep.subr.mxu1 %v6079_v56  ;;  %3536 = vmatprep.subr.mxu0 %v6079_v56 }
 0x390   : > { %3502 = vmatpush3.msra.mxu1 %v6155_v60  ;;  %3537 = vmatpush3.msra.mxu0 %v6155_v60 }
 0x391   : > { %3503 = vmatprep.subr.mxu1 %v6079_v56  ;;  %3538 = vmatprep.subr.mxu0 %v6079_v56 }
 0x392   : > { %3504 = vmatpush3.msra.mxu1 %v6156_v52  ;;  %3539 = vmatpush3.msra.mxu0 %v6156_v52 }
 0x393   : > { %3505 = vmatprep.subr.mxu1 %v6079_v56  ;;  %3540 = vmatprep.subr.mxu0 %v6079_v56 }
 0x394   : > { %3506 = vmatpush3.msra.mxu1 %v6157_v26  ;;  %3541 = vmatpush3.msra.mxu0 %v6157_v26 }
 0x395   : > { %3507 = vmatprep.subr.mxu1 %v6079_v56  ;;  %3542 = vmatprep.subr.mxu0 %v6079_v56 }
 0x396   : > { %3508 = vmatpush3.msra.mxu1 %v5064_v15  ;;  %3543 = vmatpush3.msra.mxu0 %v5064_v15 }
 0x397   : > { %3509 = vmatprep.subr.mxu1 %v6079_v56  ;;  %3544 = vmatprep.subr.mxu0 %v6079_v56 }
 0x398   : > { %3510 = vmatpush3.msra.mxu1 %v5159_v10  ;;  %3545 = vmatpush3.msra.mxu0 %v5159_v10 }
 0x399   : > { %3511 = vmatprep.subr.mxu1 %v6079_v56  ;;  %3546 = vmatprep.subr.mxu0 %v6079_v56 }
 0x39a   : > { %3512 = vmatpush3.msra.mxu1 %v5198_v39  ;;  %3547 = vmatpush3.msra.mxu0 %v5198_v39 }
 0x39b   : > { %3513 = vmatprep.subr.mxu1 %v6079_v56  ;;  %3548 = vmatprep.subr.mxu0 %v6079_v56 }
 0x39c   : > { %3514 = vmatpush3.msra.mxu1 %v5222_v14  ;;  %3549 = vmatpush3.msra.mxu0 %v5222_v14 }
 0x39d   : > { %3515 = vmatprep.subr.mxu1 %v6079_v56  ;;  %3550 = vmatprep.subr.mxu0 %v6079_v56 }
 0x39e   : > { %3516 = vmatpush3.msra.mxu1 %v5239_v4  ;;  %3551 = vmatpush3.msra.mxu0 %v5239_v4 }
 0x39f   : > { %3517 = vmatprep.subr.mxu1 %v6079_v56  ;;  %3552 = vmatprep.subr.mxu0 %v6079_v56 }
 0x3a0   : > { %3518 = vmatpush3.msra.mxu1 %v5255_v51  ;;  %3553 = vmatpush3.msra.mxu0 %v5255_v51 }
 0x3a1   : > { %3519 = vmatprep.subr.mxu1 %v6079_v56  ;;  %3554 = vmatprep.subr.mxu0 %v6079_v56 }
 0x3a2   : > { %3520 = vmatpush3.msra.mxu1 %v5265_v11  ;;  %3555 = vmatpush3.msra.mxu0 %v5265_v11 }
 0x3a3   : > { %3521 = vmatprep.subr.mxu1 %v6079_v56  ;;  %3556 = vmatprep.subr.mxu0 %v6079_v56 }
 0x3a4   : > { %3522 = vmatpush3.msra.mxu1 %v5275_v54  ;;  %3557 = vmatpush3.msra.mxu0 %v5275_v54 }
 0x3a5   : > { %3523 = vmatprep.subr.mxu1 %v6079_v56  ;;  %3558 = vmatprep.subr.mxu0 %v6079_v56 }
 0x3a6   : > { %3524 = vmatpush3.msra.mxu1 %v5289_v24  ;;  %3559 = vmatpush3.msra.mxu0 %v5289_v24 }
 0x3a7   : > { %3525 = vmatprep.subr.mxu1 %v6079_v56  ;;  %3560 = vmatprep.subr.mxu0 %v6079_v56 }
 0x3a8   : > { %3526 = vmatpush3.msra.mxu1 %v5300_v28  ;;  %3561 = vmatpush3.msra.mxu0 %v5300_v28 }
 0x3a9   : > { %3527 = vmatprep.subr.mxu1 %v6079_v56  ;;  %3562 = vmatprep.subr.mxu0 %v6079_v56 }
 0x3aa   : > { %3528 = vmatpush3.msra.mxu1 %v5306_v44  ;;  %3563 = vmatpush3.msra.mxu0 %v5306_v44 }
 0x3ab   : > { %3529 = vmatprep.subr.mxu1 %v6079_v56  ;;  %3564 = vmatprep.subr.mxu0 %v6079_v56 }
 0x3ac   : > { %3530 = vmatpush3.msra.mxu1 %v5308_v27  ;;  %3531 = vmatprep.mubr.msk.f32.mxu1 %vm3988_vm1, %v6079_v56 }
 0x3ad   : > { %3565 = vmatpush3.msra.mxu0 %v5308_v27  ;;  %3566 = vmatprep.mubr.msk.f32.mxu0 %vm3988_vm1, %v6079_v56 }
 0x3ae   : > { %3532 = vmatmul.mubr.f32.vlgmr.msra.gmra.mxu1 %v2932_v22  ;;  %3567 = vmatmul.mubr.f32.vlgmr.msra.gmra.mxu0 %v2933_v13  ;;  %v2716_v22 = vld [vmem:[%s5993_s4 + $0x50] sm:$0xff]  ;;  %v2715_v13 = vld [vmem:[%s5993_s4 + $0x48] sm:$0xff] }
 0x3af   : > { %3569 = vmatprep.subr.mxu1 %v6079_v56  ;;  %3604 = vmatprep.subr.mxu0 %v6079_v56 }
 0x3b0   : > { %3570 = vmatpush3.msra.mxu1 %v6154_v61  ;;  %3605 = vmatpush3.msra.mxu0 %v6154_v61 }
 0x3b1   : > { %3571 = vmatprep.subr.mxu1 %v6079_v56  ;;  %3606 = vmatprep.subr.mxu0 %v6079_v56 }
 0x3b2   : > { %3572 = vmatpush3.msra.mxu1 %v6155_v60  ;;  %3607 = vmatpush3.msra.mxu0 %v6155_v60 }
 0x3b3   : > { %3573 = vmatprep.subr.mxu1 %v6079_v56  ;;  %3608 = vmatprep.subr.mxu0 %v6079_v56 }
 0x3b4   : > { %3574 = vmatpush3.msra.mxu1 %v6156_v52  ;;  %3609 = vmatpush3.msra.mxu0 %v6156_v52 }
 0x3b5   : > { %3575 = vmatprep.subr.mxu1 %v6079_v56  ;;  %3610 = vmatprep.subr.mxu0 %v6079_v56 }
 0x3b6   : > { %3576 = vmatpush3.msra.mxu1 %v6157_v26  ;;  %3611 = vmatpush3.msra.mxu0 %v6157_v26 }
 0x3b7   : > { %3577 = vmatprep.subr.mxu1 %v6079_v56  ;;  %3612 = vmatprep.subr.mxu0 %v6079_v56 }
 0x3b8   : > { %3578 = vmatpush3.msra.mxu1 %v5064_v15  ;;  %3613 = vmatpush3.msra.mxu0 %v5064_v15 }
 0x3b9   : > { %3579 = vmatprep.subr.mxu1 %v6079_v56  ;;  %3614 = vmatprep.subr.mxu0 %v6079_v56 }
 0x3ba   : > { %3580 = vmatpush3.msra.mxu1 %v5159_v10  ;;  %3615 = vmatpush3.msra.mxu0 %v5159_v10 }
 0x3bb   : > { %3581 = vmatprep.subr.mxu1 %v6079_v56  ;;  %3616 = vmatprep.subr.mxu0 %v6079_v56 }
 0x3bc   : > { %3582 = vmatpush3.msra.mxu1 %v5198_v39  ;;  %3617 = vmatpush3.msra.mxu0 %v5198_v39 }
 0x3bd   : > { %3583 = vmatprep.subr.mxu1 %v6079_v56  ;;  %3618 = vmatprep.subr.mxu0 %v6079_v56 }
 0x3be   : > { %3584 = vmatpush3.msra.mxu1 %v5222_v14  ;;  %3619 = vmatpush3.msra.mxu0 %v5222_v14 }
 0x3bf   : > { %3585 = vmatprep.subr.mxu1 %v6079_v56  ;;  %3620 = vmatprep.subr.mxu0 %v6079_v56 }
 0x3c0   : > { %3586 = vmatpush3.msra.mxu1 %v5239_v4  ;;  %3621 = vmatpush3.msra.mxu0 %v5239_v4 }
 0x3c1   : > { %3587 = vmatprep.subr.mxu1 %v6079_v56  ;;  %3622 = vmatprep.subr.mxu0 %v6079_v56 }
 0x3c2   : > { %3588 = vmatpush3.msra.mxu1 %v5255_v51  ;;  %3623 = vmatpush3.msra.mxu0 %v5255_v51 }
 0x3c3   : > { %3589 = vmatprep.subr.mxu1 %v6079_v56  ;;  %3624 = vmatprep.subr.mxu0 %v6079_v56 }
 0x3c4   : > { %3590 = vmatpush3.msra.mxu1 %v5265_v11  ;;  %3625 = vmatpush3.msra.mxu0 %v5265_v11 }
 0x3c5   : > { %3591 = vmatprep.subr.mxu1 %v6079_v56  ;;  %3626 = vmatprep.subr.mxu0 %v6079_v56 }
 0x3c6   : > { %3592 = vmatpush3.msra.mxu1 %v5275_v54  ;;  %3627 = vmatpush3.msra.mxu0 %v5275_v54 }
 0x3c7   : > { %3593 = vmatprep.subr.mxu1 %v6079_v56  ;;  %3628 = vmatprep.subr.mxu0 %v6079_v56 }
 0x3c8   : > { %3594 = vmatpush3.msra.mxu1 %v5289_v24  ;;  %3629 = vmatpush3.msra.mxu0 %v5289_v24 }
 0x3c9   : > { %3595 = vmatprep.subr.mxu1 %v6079_v56  ;;  %3630 = vmatprep.subr.mxu0 %v6079_v56 }
 0x3ca   : > { %3596 = vmatpush3.msra.mxu1 %v5300_v28  ;;  %3631 = vmatpush3.msra.mxu0 %v5300_v28 }
 0x3cb   : > { %3597 = vmatprep.subr.mxu1 %v6079_v56  ;;  %3632 = vmatprep.subr.mxu0 %v6079_v56 }
 0x3cc   : > { %3598 = vmatpush3.msra.mxu1 %v5306_v44  ;;  %3633 = vmatpush3.msra.mxu0 %v5306_v44 }
 0x3cd   : > { %3599 = vmatprep.subr.mxu1 %v6079_v56  ;;  %3634 = vmatprep.subr.mxu0 %v6079_v56 }
 0x3ce   : > { %3600 = vmatpush3.msra.mxu1 %v5308_v27  ;;  %3601 = vmatprep.mubr.msk.f32.mxu1 %vm3988_vm1, %v6079_v56 }
 0x3cf   : > { %3635 = vmatpush3.msra.mxu0 %v5308_v27  ;;  %3636 = vmatprep.mubr.msk.f32.mxu0 %vm3988_vm1, %v6079_v56 }
 0x3d0   : > { %3602 = vmatmul.mubr.f32.vlgmr.msra.gmra.mxu1 %v2934_v41  ;;  %3637 = vmatmul.mubr.f32.vlgmr.msra.gmra.mxu0 %v2935_v17 }
 0x3d1   : > { %3639 = vmatprep.subr.mxu1 %v6079_v56  ;;  %3674 = vmatprep.subr.mxu0 %v6079_v56 }
 0x3d2   : > { %3640 = vmatpush3.msra.mxu1 %v6154_v61  ;;  %3675 = vmatpush3.msra.mxu0 %v6154_v61 }
 0x3d3   : > { %3641 = vmatprep.subr.mxu1 %v6079_v56  ;;  %3676 = vmatprep.subr.mxu0 %v6079_v56 }
 0x3d4   : > { %3642 = vmatpush3.msra.mxu1 %v6155_v60  ;;  %3677 = vmatpush3.msra.mxu0 %v6155_v60 }
 0x3d5   : > { %3643 = vmatprep.subr.mxu1 %v6079_v56  ;;  %3678 = vmatprep.subr.mxu0 %v6079_v56 }
 0x3d6   : > { %3644 = vmatpush3.msra.mxu1 %v6156_v52  ;;  %3679 = vmatpush3.msra.mxu0 %v6156_v52 }
 0x3d7   : > { %3645 = vmatprep.subr.mxu1 %v6079_v56  ;;  %3680 = vmatprep.subr.mxu0 %v6079_v56 }
 0x3d8   : > { %3646 = vmatpush3.msra.mxu1 %v6157_v26  ;;  %3681 = vmatpush3.msra.mxu0 %v6157_v26 }
 0x3d9   : > { %3647 = vmatprep.subr.mxu1 %v6079_v56  ;;  %3682 = vmatprep.subr.mxu0 %v6079_v56 }
 0x3da   : > { %3648 = vmatpush3.msra.mxu1 %v5064_v15  ;;  %3683 = vmatpush3.msra.mxu0 %v5064_v15 }
 0x3db   : > { %3649 = vmatprep.subr.mxu1 %v6079_v56  ;;  %3684 = vmatprep.subr.mxu0 %v6079_v56 }
 0x3dc   : > { %3650 = vmatpush3.msra.mxu1 %v5159_v10  ;;  %3685 = vmatpush3.msra.mxu0 %v5159_v10 }
 0x3dd   : > { %3651 = vmatprep.subr.mxu1 %v6079_v56  ;;  %3686 = vmatprep.subr.mxu0 %v6079_v56 }
 0x3de   : > { %3652 = vmatpush3.msra.mxu1 %v5198_v39  ;;  %3687 = vmatpush3.msra.mxu0 %v5198_v39 }
 0x3df   : > { %3653 = vmatprep.subr.mxu1 %v6079_v56  ;;  %3688 = vmatprep.subr.mxu0 %v6079_v56 }
 0x3e0   : > { %3654 = vmatpush3.msra.mxu1 %v5222_v14  ;;  %3689 = vmatpush3.msra.mxu0 %v5222_v14 }
 0x3e1   : > { %3655 = vmatprep.subr.mxu1 %v6079_v56  ;;  %3690 = vmatprep.subr.mxu0 %v6079_v56 }
 0x3e2   : > { %3656 = vmatpush3.msra.mxu1 %v5239_v4  ;;  %3691 = vmatpush3.msra.mxu0 %v5239_v4 }
 0x3e3   : > { %3657 = vmatprep.subr.mxu1 %v6079_v56  ;;  %3692 = vmatprep.subr.mxu0 %v6079_v56 }
 0x3e4   : > { %3658 = vmatpush3.msra.mxu1 %v5255_v51  ;;  %3693 = vmatpush3.msra.mxu0 %v5255_v51 }
 0x3e5   : > { %3659 = vmatprep.subr.mxu1 %v6079_v56  ;;  %3694 = vmatprep.subr.mxu0 %v6079_v56 }
 0x3e6   : > { %3660 = vmatpush3.msra.mxu1 %v5265_v11  ;;  %3695 = vmatpush3.msra.mxu0 %v5265_v11 }
 0x3e7   : > { %3661 = vmatprep.subr.mxu1 %v6079_v56  ;;  %3696 = vmatprep.subr.mxu0 %v6079_v56 }
 0x3e8   : > { %3662 = vmatpush3.msra.mxu1 %v5275_v54  ;;  %3697 = vmatpush3.msra.mxu0 %v5275_v54 }
 0x3e9   : > { %3663 = vmatprep.subr.mxu1 %v6079_v56  ;;  %3698 = vmatprep.subr.mxu0 %v6079_v56 }
 0x3ea   : > { %3664 = vmatpush3.msra.mxu1 %v5289_v24  ;;  %3699 = vmatpush3.msra.mxu0 %v5289_v24 }
 0x3eb   : > { %3665 = vmatprep.subr.mxu1 %v6079_v56  ;;  %3700 = vmatprep.subr.mxu0 %v6079_v56 }
 0x3ec   : > { %3666 = vmatpush3.msra.mxu1 %v5300_v28  ;;  %3701 = vmatpush3.msra.mxu0 %v5300_v28 }
 0x3ed   : > { %3667 = vmatprep.subr.mxu1 %v6079_v56  ;;  %3702 = vmatprep.subr.mxu0 %v6079_v56 }
 0x3ee   : > { %3668 = vmatpush3.msra.mxu1 %v5306_v44  ;;  %3703 = vmatpush3.msra.mxu0 %v5306_v44 }
 0x3ef   : > { %3669 = vmatprep.subr.mxu1 %v6079_v56  ;;  %3704 = vmatprep.subr.mxu0 %v6079_v56 }
 0x3f0   : > { %3670 = vmatpush3.msra.mxu1 %v5308_v27  ;;  %3671 = vmatprep.mubr.msk.f32.mxu1 %vm3988_vm1, %v6079_v56 }
 0x3f1   : > { %3705 = vmatpush3.msra.mxu0 %v5308_v27  ;;  %3706 = vmatprep.mubr.msk.f32.mxu0 %vm3988_vm1, %v6079_v56 }
 0x3f2   : > { %3672 = vmatmul.mubr.f32.vlgmr.msra.gmra.mxu1 %v2936_v21  ;;  %3707 = vmatmul.mubr.f32.vlgmr.msra.gmra.mxu0 %v2937_v19  ;;  %v2714_v21 = vld [vmem:[%s5993_s4 + $0x40] sm:$0xff]  ;;  %v2713_v19 = vld [vmem:[%s5993_s4 + $0x38] sm:$0xff] }
 0x3f3   : > { %3709 = vmatprep.subr.mxu1 %v6079_v56  ;;  %3744 = vmatprep.subr.mxu0 %v6079_v56 }
 0x3f4   : > { %3710 = vmatpush3.msra.mxu1 %v6154_v61  ;;  %3745 = vmatpush3.msra.mxu0 %v6154_v61 }
 0x3f5   : > { %3711 = vmatprep.subr.mxu1 %v6079_v56  ;;  %3746 = vmatprep.subr.mxu0 %v6079_v56 }
 0x3f6   : > { %3712 = vmatpush3.msra.mxu1 %v6155_v60  ;;  %3747 = vmatpush3.msra.mxu0 %v6155_v60 }
 0x3f7   : > { %3713 = vmatprep.subr.mxu1 %v6079_v56  ;;  %3748 = vmatprep.subr.mxu0 %v6079_v56 }
 0x3f8   : > { %3714 = vmatpush3.msra.mxu1 %v6156_v52  ;;  %3749 = vmatpush3.msra.mxu0 %v6156_v52 }
 0x3f9   : > { %3715 = vmatprep.subr.mxu1 %v6079_v56  ;;  %3750 = vmatprep.subr.mxu0 %v6079_v56 }
 0x3fa   : > { %3716 = vmatpush3.msra.mxu1 %v6157_v26  ;;  %3751 = vmatpush3.msra.mxu0 %v6157_v26 }
 0x3fb   : > { %3717 = vmatprep.subr.mxu1 %v6079_v56  ;;  %3752 = vmatprep.subr.mxu0 %v6079_v56 }
 0x3fc   : > { %3718 = vmatpush3.msra.mxu1 %v5064_v15  ;;  %3753 = vmatpush3.msra.mxu0 %v5064_v15 }
 0x3fd   : > { %3719 = vmatprep.subr.mxu1 %v6079_v56  ;;  %3754 = vmatprep.subr.mxu0 %v6079_v56 }
 0x3fe   : > { %3720 = vmatpush3.msra.mxu1 %v5159_v10  ;;  %3755 = vmatpush3.msra.mxu0 %v5159_v10 }
 0x3ff   : > { %3721 = vmatprep.subr.mxu1 %v6079_v56  ;;  %3756 = vmatprep.subr.mxu0 %v6079_v56 }
 0x400   : > { %3722 = vmatpush3.msra.mxu1 %v5198_v39  ;;  %3757 = vmatpush3.msra.mxu0 %v5198_v39 }
 0x401   : > { %3723 = vmatprep.subr.mxu1 %v6079_v56  ;;  %3758 = vmatprep.subr.mxu0 %v6079_v56 }
 0x402   : > { %3724 = vmatpush3.msra.mxu1 %v5222_v14  ;;  %3759 = vmatpush3.msra.mxu0 %v5222_v14 }
 0x403   : > { %3725 = vmatprep.subr.mxu1 %v6079_v56  ;;  %3760 = vmatprep.subr.mxu0 %v6079_v56 }
 0x404   : > { %3726 = vmatpush3.msra.mxu1 %v5239_v4  ;;  %3761 = vmatpush3.msra.mxu0 %v5239_v4 }
 0x405   : > { %3727 = vmatprep.subr.mxu1 %v6079_v56  ;;  %3762 = vmatprep.subr.mxu0 %v6079_v56 }
 0x406   : > { %3728 = vmatpush3.msra.mxu1 %v5255_v51  ;;  %3763 = vmatpush3.msra.mxu0 %v5255_v51 }
 0x407   : > { %3729 = vmatprep.subr.mxu1 %v6079_v56  ;;  %3764 = vmatprep.subr.mxu0 %v6079_v56 }
 0x408   : > { %3730 = vmatpush3.msra.mxu1 %v5265_v11  ;;  %3765 = vmatpush3.msra.mxu0 %v5265_v11  ;;  %v1529_v62 = vpop.f32.mrf.mxu1  ;;  %v1603_v7 = vpop.f32.mrf.mxu0 }
 0x409   : > { %3731 = vmatprep.subr.mxu1 %v6079_v56  ;;  %3766 = vmatprep.subr.mxu0 %v6079_v56  ;;  %1534 = vst.msk [vmem:[#allocation2] sm:$0xff] %vm1533_vm2, %v1529_v62  ;;  %v2712_v62 = vld [vmem:[%s5993_s4 + $0x30] sm:$0xff] }
 0x40a   : > { %3732 = vmatpush3.msra.mxu1 %v5275_v54  ;;  %3767 = vmatpush3.msra.mxu0 %v5275_v54  ;;  %v3323_v16 = vpop.f32.mrf.mxu1  ;;  %v3358_v20 = vpop.f32.mrf.mxu0 }
 0x40b   : > { %3733 = vmatprep.subr.mxu1 %v6079_v56  ;;  %3768 = vmatprep.subr.mxu0 %v6079_v56  ;;  %v2710_v16 = vld [vmem:[%s5993_s4 + $0x20] sm:$0xff]  ;;  %v2709_v20 = vld [vmem:[%s5993_s4 + $0x18] sm:$0xff] }
 0x40c   : > { %3734 = vmatpush3.msra.mxu1 %v5289_v24  ;;  %3769 = vmatpush3.msra.mxu0 %v5289_v24 }
 0x40d   : > { %3735 = vmatprep.subr.mxu1 %v6079_v56  ;;  %3770 = vmatprep.subr.mxu0 %v6079_v56 }
 0x40e   : > { %3736 = vmatpush3.msra.mxu1 %v5300_v28  ;;  %3771 = vmatpush3.msra.mxu0 %v5300_v28 }
 0x40f   : > { %3737 = vmatprep.subr.mxu1 %v6079_v56  ;;  %3772 = vmatprep.subr.mxu0 %v6079_v56 }
 0x410   : > { %3738 = vmatpush3.msra.mxu1 %v5306_v44  ;;  %3773 = vmatpush3.msra.mxu0 %v5306_v44 }
 0x411   : > { %3739 = vmatprep.subr.mxu1 %v6079_v56  ;;  %3774 = vmatprep.subr.mxu0 %v6079_v56 }
 0x412   : > { %3740 = vmatpush3.msra.mxu1 %v5308_v27  ;;  %3741 = vmatprep.mubr.msk.f32.mxu1 %vm3988_vm1, %v6079_v56 }
 0x413   : > { %3775 = vmatpush3.msra.mxu0 %v5308_v27  ;;  %3776 = vmatprep.mubr.msk.f32.mxu0 %vm3988_vm1, %v6079_v56 }
 0x414   : > { %3742 = vmatmul.mubr.f32.vlgmr.msra.gmra.mxu1 %v2938_v37  ;;  %3777 = vmatmul.mubr.f32.vlgmr.msra.gmra.mxu0 %v2939_v59  ;;  %v2708_v37 = vld [vmem:[%s5993_s4 + $0x10] sm:$0xff]  ;;  %v2707_v59 = vld [vmem:[%s5993_s4 + $0x8] sm:$0xff] }
 0x415   : > { %3779 = vmatprep.subr.mxu1 %v6079_v56  ;;  %3814 = vmatprep.subr.mxu0 %v6079_v56 }
 0x416   : > { %3780 = vmatpush3.msra.mxu1 %v6154_v61  ;;  %3815 = vmatpush3.msra.mxu0 %v6154_v61 }
 0x417   : > { %3781 = vmatprep.subr.mxu1 %v6079_v56  ;;  %3816 = vmatprep.subr.mxu0 %v6079_v56 }
 0x418   : > { %3817 = vmatpush3.msra.mxu0 %v6155_v60  ;;  %1608 = vrot.lane.b32.xlu0 %v1603_v7, %s3987_s14  ;;  %s6158_s14 = smov 96   ;;  %v2711_v7 = vld [vmem:[%s5993_s4 + $0x28] sm:$0xff] }
 0x419   : > { %3782 = vmatpush3.msra.mxu1 %v6155_v60  ;;  %3818 = vmatprep.subr.mxu0 %v6079_v56  ;;  %v2723_v60 = vld [vmem:[%s5993_s4 + $0x88] sm:$0xff] }
 0x41a   : > { %3783 = vmatprep.subr.mxu1 %v6079_v56  ;;  %3819 = vmatpush3.msra.mxu0 %v6156_v52 }
 0x41b   : > { %3784 = vmatpush3.msra.mxu1 %v6156_v52  ;;  %3820 = vmatprep.subr.mxu0 %v6079_v56  ;;  %v2722_v52 = vld [vmem:[%s5993_s4 + $0x80] sm:$0xff] }
 0x41c   : > { %3785 = vmatprep.subr.mxu1 %v6079_v56  ;;  %3821 = vmatpush3.msra.mxu0 %v6157_v26 }
 0x41d   : > { %3786 = vmatpush3.msra.mxu1 %v6157_v26  ;;  %3822 = vmatprep.subr.mxu0 %v6079_v56  ;;  %v2721_v26 = vld [vmem:[%s5993_s4 + $0x78] sm:$0xff] }
 0x41e   : > { %3787 = vmatprep.subr.mxu1 %v6079_v56  ;;  %3823 = vmatpush3.msra.mxu0 %v5064_v15 }
 0x41f   : > { %3788 = vmatpush3.msra.mxu1 %v5064_v15  ;;  %3824 = vmatprep.subr.mxu0 %v6079_v56 }
 0x420   : > { %3789 = vmatprep.subr.mxu1 %v6079_v56  ;;  %3825 = vmatpush3.msra.mxu0 %v5159_v10 }
 0x421   : > { %3790 = vmatpush3.msra.mxu1 %v5159_v10  ;;  %3826 = vmatprep.subr.mxu0 %v6079_v56 }
 0x422   : > { %3791 = vmatprep.subr.mxu1 %v6079_v56  ;;  %3827 = vmatpush3.msra.mxu0 %v5198_v39 }
 0x423   : > { %3792 = vmatpush3.msra.mxu1 %v5198_v39  ;;  %3828 = vmatprep.subr.mxu0 %v6079_v56 }
 0x424   : > { %3793 = vmatprep.subr.mxu1 %v6079_v56  ;;  %3829 = vmatpush3.msra.mxu0 %v5222_v14 }
 0x425   : > { %3794 = vmatpush3.msra.mxu1 %v5222_v14  ;;  %3830 = vmatprep.subr.mxu0 %v6079_v56 }
 0x426   : > { %3795 = vmatprep.subr.mxu1 %v6079_v56  ;;  %3831 = vmatpush3.msra.mxu0 %v5239_v4 }
 0x427   : > { %3796 = vmatpush3.msra.mxu1 %v5239_v4  ;;  %3832 = vmatprep.subr.mxu0 %v6079_v56  ;;  %v2940_v4 = vld [vmem:[%s5992_s3 + $0x70] sm:$0xff] }
 0x428   : > { %3797 = vmatprep.subr.mxu1 %v6079_v56  ;;  %3833 = vmatpush3.msra.mxu0 %v5255_v51 }
 0x429   : > { %3798 = vmatpush3.msra.mxu1 %v5255_v51  ;;  %3834 = vmatprep.subr.mxu0 %v6079_v56  ;;  %v2941_v51 = vld [vmem:[%s5992_s3 + $0x78] sm:$0xff] }
 0x42a   : > { %3799 = vmatprep.subr.mxu1 %v6079_v56  ;;  %3835 = vmatpush3.msra.mxu0 %v5265_v11  ;;  %v1681_v15 = vpop.f32.mrf.mxu1  ;;  %v1759_v10 = vpop.f32.mrf.mxu0 }
 0x42b   : > { %3800 = vmatpush3.msra.mxu1 %v5265_v11  ;;  %3836 = vmatprep.subr.mxu0 %v6079_v56 }
 0x42c   : > { %3801 = vmatprep.subr.mxu1 %v6079_v56  ;;  %3837 = vmatpush3.msra.mxu0 %v5275_v54  ;;  %v3428_v39 = vpop.f32.mrf.mxu0  ;;  %v3393_v14 = vpop.f32.mrf.mxu1 }
 0x42d   : > { %3802 = vmatpush3.msra.mxu1 %v5275_v54  ;;  %3838 = vmatprep.subr.mxu0 %v6079_v56 }
 0x42e   : > { %3803 = vmatprep.subr.mxu1 %v6079_v56  ;;  %3839 = vmatpush3.msra.mxu0 %v5289_v24 }
 0x42f   : > { %3804 = vmatpush3.msra.mxu1 %v5289_v24  ;;  %3840 = vmatprep.subr.mxu0 %v6079_v56 }
 0x430   : > { %3805 = vmatprep.subr.mxu1 %v6079_v56  ;;  %3841 = vmatpush3.msra.mxu0 %v5300_v28 }
 0x431   : > { %3806 = vmatpush3.msra.mxu1 %v5300_v28  ;;  %3842 = vmatprep.subr.mxu0 %v6079_v56  ;;  %v2729_v28 = vld [vmem:[%s5993_s4 + $0xb8] sm:$0xff] }
 0x432   : > { %3807 = vmatprep.subr.mxu1 %v6079_v56  ;;  %3843 = vmatpush3.msra.mxu0 %v5306_v44 }
 0x433   : > { %3808 = vmatpush3.msra.mxu1 %v5306_v44  ;;  %3844 = vmatprep.subr.mxu0 %v6079_v56 }
 0x434   : > { %3809 = vmatprep.subr.mxu1 %v6079_v56  ;;  %3811 = vmatprep.mubr.msk.f32.mxu1 %vm3988_vm1, %v6079_v56 }
 0x435   : > { %3810 = vmatpush3.msra.mxu1 %v5308_v27  ;;  %3845 = vmatpush3.msra.mxu0 %v5308_v27  ;;  %v2725_v27 = vld [vmem:[%s5993_s4 + $0x98] sm:$0xff] }
 0x436   : > { %3846 = vmatprep.mubr.msk.f32.mxu0 %vm3988_vm1, %v6079_v56  ;;  %3812 = vmatmul.mubr.f32.vlgmr.msra.gmra.mxu1 %v2940_v4  ;;  %vm2703_vm1 = vcmask 1048512  }
 0x437   : > { %3847 = vmatmul.mubr.f32.vlgmr.msra.gmra.mxu0 %v2941_v51  ;;  %1686 = vrot.lane.b32.xlu1 %v1681_v15, %s3986_s19  ;;  %v2706_v15 = vld [vmem:[%s5993_s4] sm:$0xff] }
 0x438   : > { %1764 = vrot.lane.b32.xlu0 %v1759_v10, %s3984_s11  ;;  %2814 = vmatprep.mubr.f32.mxu1 %v6079_v56 }
 0x439   : > { %2750 = vmatprep.subr.mxu1 %v2737_v25 }
 0x43a   : > { %2751 = vmatpush1.msra.mxu1 %v2736_v35 }
 0x43b   : > { %2752 = vmatprep.subr.mxu1 %v2735_v63 }
 0x43c   : > { %2753 = vmatpush1.msra.mxu1 %v2734_v38 }
 0x43d   : > { %2754 = vmatprep.subr.mxu1 %v2733_v45 }
 0x43e   : > { %2755 = vmatpush1.msra.mxu1 %v2732_v40 }
 0x43f   : > { %2756 = vmatprep.subr.mxu1 %v2731_v18 }
 0x440   : > { %2757 = vmatpush1.msra.mxu1 %v2730_v31 }
 0x441   : > { %2758 = vmatprep.subr.mxu1 %v2729_v28 }
 0x442   : > { %2759 = vmatpush1.msra.mxu1 %v2728_v55 }
 0x443   : > { %2760 = vmatprep.subr.mxu1 %v2727_v29 }
 0x444   : > { %2761 = vmatpush1.msra.mxu1 %v2726_v42 }
 0x445   : > { %2762 = vmatprep.subr.mxu1 %v2725_v27 }
 0x446   : > { %2763 = vmatpush1.msra.mxu1 %v2724_v2 }
 0x447   : > { %2764 = vmatprep.subr.mxu1 %v2723_v60 }
 0x448   : > { %2765 = vmatpush1.msra.mxu1 %v2722_v52 }
 0x449   : > { %2766 = vmatprep.subr.mxu1 %v2721_v26 }
 0x44a   : > { %2767 = vmatpush1.msra.mxu1 %v2720_v30 }
 0x44b   : > { %2768 = vmatprep.subr.mxu1 %v2719_v23 }
 0x44c   : > { %v1837_v11 = vpop.f32.mrf.mxu1  ;;  %v1915_v54 = vpop.f32.mrf.mxu0  ;;  %2769 = vmatpush1.msra.mxu1 %v2718_v47 }
 0x44d   : > { %1842 = vrot.lane.b32.xlu1 %v1837_v11, %s3983_s10  ;;  %1920 = vrot.lane.b32.xlu0 %v1915_v54, %s3981_s16  ;;  %s6161_s10 = smov 120   ;;  %s2833_s16 = scalar_lea.sflag [#allocation4], %s242_s12 }
 0x44e   : > { %v3498_v32 = vpop.f32.mrf.mxu0  ;;  %v3463_v46 = vpop.f32.mrf.mxu1  ;;  %2770 = vmatprep.subr.mxu1 %v2717_v9 }
 0x44f   : > { %2771 = vmatpush1.msra.mxu1 %v2716_v22 }
 0x450   : > { %2772 = vmatprep.subr.mxu1 %v2715_v13 }
 0x451   : > { %2773 = vmatpush1.msra.mxu1 %v2714_v21 }
 0x452   : > { %2774 = vmatprep.subr.mxu1 %v2713_v19 }
 0x453   : > { %2775 = vmatpush1.msra.mxu1 %v2712_v62 }
 0x454   : > { %2776 = vmatprep.subr.mxu1 %v2711_v7 }
 0x455   : > { %2777 = vmatpush1.msra.mxu1 %v2710_v16 }
 0x456   : > { %2778 = vmatprep.subr.mxu1 %v2709_v20 }
 0x457   : > { %2779 = vmatpush1.msra.mxu1 %v2708_v37 }
 0x458   : > { %2780 = vmatprep.subr.mxu1 %v2707_v59 }
 0x459   : > { %2781 = vmatpush1.msra.mxu1 %v2706_v15 }
 0x46e   : > { %v1993_v5 = vpop.f32.mrf.mxu1  ;;  %v2071_v49 = vpop.f32.mrf.mxu0 }
 0x46f   : > { %1998 = vrot.lane.b32.xlu1 %v1993_v5, %s6070_s15  ;;  %2076 = vrot.lane.b32.xlu0 %v2071_v49, %s3980_s20 }
 0x470   : > { %v3568_v0 = vpop.f32.mrf.mxu0  ;;  %v3533_v58 = vpop.f32.mrf.mxu1 }
 0x48a   : > { %v1609_v24 = vpop.permute.xlu0 %1608 }
 0x48b   : > { %1612 = vst.msk [vmem:[#allocation2] sm:$0xff] %vm1611_vm3, %v1609_v24  ;;  %v2740_v24 = vlaneseq }
 0x490   : > { %v2149_v56 = vpop.f32.mrf.mxu1  ;;  %v2227_v36 = vpop.f32.mrf.mxu0 }
 0x491   : > { %2154 = vrot.lane.b32.xlu1 %v2149_v56, %s3979_s13  ;;  %2232 = vrot.lane.b32.xlu0 %v2227_v36, %s3978_s26  ;;  %v2741_v56 = vshrl.u32 %v2740_v24, 7 }
 0x492   : > { %v3638_v1 = vpop.f32.mrf.mxu0  ;;  %v3603_v48 = vpop.f32.mrf.mxu1 }
 0x493   : > { %v2746_v36 = vsub.s32 1, %v2741_v56  ;;  %v2738_v1 = vld [vmem:[%s5994_s5] sm:$0x3] }
 0x495   : > { %v2747_v48 = vrot.slane %v2738_v1, %v2746_v36 }
 0x4a9   : > { %v1687_v57 = vpop.permute.xlu1 %1686 }
 0x4aa   : > { %1690 = vst.msk [vmem:[#allocation2] sm:$0xff] %vm1689_vm4, %v1687_v57  ;;  %v1765_v43 = vpop.permute.xlu0 %1764 }
 0x4ab   : > { %1768 = vst.msk [vmem:[#allocation2] sm:$0xff] %vm1767_vm5, %v1765_v43 }
 0x4b2   : > { %v2305_v34 = vpop.f32.mrf.mxu1  ;;  %v2383_v53 = vpop.f32.mrf.mxu0 }
 0x4b3   : > { %2310 = vrot.lane.b32.xlu1 %v2305_v34, %s3977_s18  ;;  %2388 = vrot.lane.b32.xlu0 %v2383_v53, %s3976_s17  ;;  %s6160_s17 = smov 112   ;;  %s3989_s18 = smov [#allocation3]  }
 0x4b4   : > { %v3708_v12 = vpop.f32.mrf.mxu0  ;;  %v3673_v33 = vpop.f32.mrf.mxu1 }
 0x4b5   : > { %v2742_v12 = vsub.s32 0, %v2741_v56 }
 0x4bf   : > { %v1843_v3 = vpop.permute.xlu1 %1842  ;;  %v1921_v50 = vpop.permute.xlu0 %1920 }
 0x4c0   : > { %1846 = vst.msk [vmem:[#allocation2] sm:$0xff] %vm1845_vm6, %v1843_v3 }
 0x4c1   : > { %1924 = vst.msk [vmem:[#allocation2] sm:$0xff] %vm1923_vm7, %v1921_v50  ;;  %v2743_v50 = vrot.slane %v2738_v1, %v2742_v12 }
 0x4d4   : > { %v2461_v8 = vpop.f32.mrf.mxu1  ;;  %v2539_v44 = vpop.f32.mrf.mxu0 }
 0x4d5   : > { %2466 = vrot.lane.b32.xlu1 %v2461_v8, %s6158_s14  ;;  %2544 = vrot.lane.b32.xlu0 %v2539_v44, %s6159_s28  ;;  %s2909_s14 = sshll.u32 %s242_s12, 3  ;;  %s2944_s28 = sshll.u32 %s4046_s25, 7 }
 0x4d6   : > { %v3778_v6 = vpop.f32.mrf.mxu0  ;;  %v3743_v61 = vpop.f32.mrf.mxu1  ;;  %s244_s29 = scalar_lea.vmem [#allocation3], %s2909_s14  ;;  %s2844_s20 = scalar_lea.hbm %s5995_s6, %s2944_s28 }
 0x4d7   : > { %s2846_s9 = sshll.u32 %s244_s29, 4  ;;  %s2847_s9 = int_to_ptr.vmem [resolvable:$true] %s2846_s9 }
 0x4d8   : > { %s3910_s19 = scalar_lea.vmem %s2847_s9, 128 }
 0x4d9   : > { %p3911_p11 = scmp.ne.s32.totalorder %s2847_s9, %s3910_s19 }
 0x4db   : > { %p3912_p12 = pnand %p3911_p11, %p4063_p5 }
 0x4dd   : > { %p3913_p13 = pneg %p3912_p12 }
 0x4e1   : > { %v1999_v41 = vpop.permute.xlu1 %1998  ;;  %v2077_v17 = vpop.permute.xlu0 %2076 }
 0x4e2   : > { %2002 = vst.msk [vmem:[#allocation2] sm:$0xff] %vm2001_vm8, %v1999_v41 }
 0x4e3   : > { %2080 = vst.msk [vmem:[#allocation2] sm:$0xff] %vm2079_vm9, %v2077_v17 }
 0x4f6   : > { %v2617_v10 = vpop.f32.mrf.mxu1 }
 0x4f7   : > { %v2695_v39 = vpop.f32.mrf.mxu0  ;;  %2622 = vrot.lane.b32.xlu1 %v2617_v10, %s6160_s17  ;;  %s3914_s17 = sshll.u32 %s3989_s18, 4  ;;  %s3915_s17 = int_to_ptr.vmem [resolvable:$false] %s3914_s17 }
 0x4f8   : > { %2700 = vrot.lane.b32.xlu0 %v2695_v39, %s6161_s10  ;;  %v3813_v14 = vpop.f32.mrf.mxu1  ;;  %s3916_s25 = scalar_lea.vmem %s3915_s17, 256  ;;  %p3917_p0 = scmp.lt.s32.totalorder %s2847_s9, %s3915_s17 }
 0x4f9   : > { %v3848_v4 = vpop.f32.mrf.mxu0  ;;  %p3918_p1 = scmp.lt.s32.totalorder %s3916_s25, %s3910_s19 }
 0x4fb   : > { %p3919_p2 = por %p3918_p1, %p3917_p0 }
 0x4fd   : > { %p3920_p3 = pnand %p3919_p2, %p3913_p13 }
 0x503   : > { %v2155_v51 = vpop.permute.xlu1 %2154  ;;  %v2233_v11 = vpop.permute.xlu0 %2232 }
 0x504   : > { %2158 = vst.msk [vmem:[#allocation2] sm:$0xff] %vm2157_vm10, %v2155_v51 }
 0x505   : > { %2236 = vst.msk [vmem:[#allocation2] sm:$0xff] %vm2235_vm11, %v2233_v11 }
 0x525   : > { %v2311_v54 = vpop.permute.xlu1 %2310  ;;  %v2389_v32 = vpop.permute.xlu0 %2388 }
 0x526   : > { %2314 = vst.msk [vmem:[#allocation2] sm:$0xff] %vm2313_vm12, %v2311_v54 }
 0x527   : > { %2392 = vst.msk [vmem:[#allocation2] sm:$0xff] %vm2391_vm13, %v2389_v32 }
 0x547   : > { %v2467_v46 = vpop.permute.xlu1 %2466  ;;  %v2545_v5 = vpop.permute.xlu0 %2544 }
 0x548   : > { %2470 = vst.msk [vmem:[#allocation2] sm:$0xff] %vm2469_vm14, %v2467_v46 }
 0x549   : > { %2548 = vst.msk [vmem:[#allocation2] sm:$0xff] %vm2547_vm15, %v2545_v5 }
 0x569   : > { %v2623_v49 = vpop.permute.xlu1 %2622 }
 0x56a   : > { %2626 = vst.msk [vmem:[#allocation2] sm:$0xff] %vm2625_vm0, %v2623_v49  ;;  %v2701_v0 = vpop.permute.xlu0 %2700 }
 0x56b   : > { %2704 = vst.msk [vmem:[#allocation2] sm:$0xff] %vm2703_vm1, %v2701_v0 }
 0x572   : > { %v2705_v58 = vld [vmem:[#allocation2] sm:$0xff] }
 0x573   : > { %2815 = vmatmul.mubr.f32.vlgmr.msra.gmra.mxu1 %v2705_v58 }
 0x633   : > { %v2816_v57 = vpop.f32.mrf.mxu1 }
 0x634   : > { %v2817_v25 = vadd.f32 %v2816_v57, %v2743_v50 }
 0x635   : > { %v2818_v43 = vpop.f32.mrf.mxu1 }
 0x636   : > { %v2819_v34 = vadd.f32 %v2818_v43, %v2747_v48  ;;  %v2821_v35 = vmax.f32 %v2817_v25, 0.0 }
 0x638   : > { %v2942_v53 = vmul.f32 -1.442695, %v2819_v34  ;;  %v2828_v63 = vsub.f32 %v2821_v35, %v2705_v58 }
 0x63a   : > { %3906 = vpow2.f32 %v2942_v53 }
 0x647   : > { %v3907_v33 = vpop.eup %3906 }
 0x648   : > { %v2825_v3 = vadd.f32 1.0, %v3907_v33 }
 0x64a   : > { %3908 = vrcp.f32 %v2825_v3 }
 0x657   : > { %v3909_v38 = vpop.eup %3908 }
 0x658   : > { %v2829_v45 = vmul.f32 %v3909_v38, %v2828_v63 }
 0x65a   : > { %v2830_v40 = vadd.f32 %v2829_v45, %v2705_v58 }
 0x65c   : > { %2831 = vst [vmem:[%s244_s29] sm:$0xff] %v2830_v40 }
 0x65d   : > { %3923 = shalt.err (!%p3920_p3)
}
 0x65e   : > { %s3924_s10 = scalar_lea.hbm %s2844_s20, 128  ;;  %s3928_s12 = scalar_lea.hbm %s5995_s6, 256 }
 0x65f   : > { %p3925_p4 = scmp.ne.s32.totalorder %s2844_s20, %s3924_s10  ;;  %p3929_p9 = scmp.lt.s32.totalorder %s2844_s20, %s5995_s6 }
 0x660   : > { %p3930_p10 = scmp.lt.s32.totalorder %s3928_s12, %s3924_s10 }
 0x661   : > { %p3926_p7 = pnand %p3925_p4, %p4063_p5 }
 0x662   : > { %p3931_p11 = por %p3930_p10, %p3929_p9 }
 0x663   : > { %p3927_p8 = pneg %p3926_p7 }
 0x665   : > { %p3932_p12 = pnand %p3931_p11, %p3927_p8 }
 0x667   : > { %3935 = shalt.err (!%p3932_p12)
}
 0x668   : > { %3850 = dma.vmem_to_hbm [thread:$0]  (%p4063_p5), %s2847_s9, 128, %s2844_s20, %s2833_s16  }
 0x669 PF: > { %p3856_p13 = scmp.ge.s32.totalorder %s3970_s24, 2  ;;  %s2858_s29 = sand.u32 1, %s3958_s21  }
 0x66a   : > { %s2859_s26 = scalar_lea.sflag [#allocation4], %s2858_s29 }
 0x66b   : > { %p3853_p0 = pnand %p3856_p13, %p4067_p6 }
 0x66d   : > { %p3854_p1 = pneg %p3853_p0 }
 0x66f   : > { %3953 = dma.done.wait (%p3854_p1), %s2859_s26, 128  }
 0x670   : > { %3955 = vsyncadd (%p3854_p1), %s2859_s26, 4294967168  ;;  %p16_p2 = scmp.ge.s32.totalorder %s4050_s27, 4   ;;  %s6162_s21 = smov %s3962_s22 }
 0x671   : > { %s6163_s22 = smov %s3966_s23  ;;  %s6164_s23 = smov %s4061_s30 }
 0x672   : > { %s6165_s24 = smov %s4050_s27  ;;  %18 = sbr.rel (!%p16_p2) target bundleno = 3 (0x3), region = 94 }
 0x677   :  { %2864 = vsyncpa [#allocation4], 1 }
 0x678   :  { %2866 = vsyncpa [#allocation4 + $0x1], 1 }

</bundles_post_ra>
